<compile_context>
chip_gen: v7x
topology: tpu7x:2x2x1
jax: 0.10.0
libtpu: 0.0.40
codegen_flags: <defaults>
</compile_context>

<pallas_src>
import functools
import math

import jax
import jax.numpy as jnp
from jax.experimental import pallas as pl
from jax.experimental.pallas import tpu as pltpu

EPSILON = 1e-16   # module-level constant in the original repo (undefined in the snippet)
COS_EPS = 1e-8    # F.cosine_similarity default eps
LOGIT_PAD = 128   # lane-dense padded width of the per-step logits output


# ---------------------------------------------------------------------------
# Core per-step math (traced INSIDE the Pallas kernel; also the pure-JAX ref)
# ---------------------------------------------------------------------------
def _split_kbgsr(p, M, S):
    """k(identity), b(softplus), g(sigmoid), s(softmax), r(1+softplus) slices."""
    k = p[:, 0:M]
    b = jax.nn.softplus(p[:, M:M + 1])
    g = jax.nn.sigmoid(p[:, M + 1:M + 2])
    s = jax.nn.softmax(p[:, M + 2:M + 3 + 2 * S], axis=1)
    r = 1.0 + jax.nn.softplus(p[:, M + 3 + 2 * S:M + 4 + 2 * S])
    return k, b, g, s, r


def _head_move(bank, k, b, g, s, r, w_prev, N, S, approx):
    """Head.move(): content addressing -> interpolation -> circular shift -> sharpen."""
    # content addressing: cosine similarity (one rsqrt), scaled by b, softmax over N
    dot = jnp.sum(bank * k[:, None, :], axis=2)                 # (B, N)
    ssq_m = jnp.sum(bank * bank, axis=2)                        # (B, N)
    ssq_k = jnp.sum(k * k, axis=1, keepdims=True)               # (B, 1)
    cos = dot * jax.lax.rsqrt(jnp.maximum(ssq_m * ssq_k, COS_EPS * COS_EPS))
    w = jax.nn.softmax(b * cos, axis=1)                         # (B, N)
    # interpolation exactly as written in the reference module: w + (1 - g) * w_prev
    w = w + (1.0 - g) * w_prev
    # location shift: F.conv1d of the modulo-unrolled w with s (cross-correlation)
    w_un = jnp.concatenate([w[:, N - S:], w, w[:, :S]], axis=1)  # (B, N + 2S)
    w_shift = s[:, 0:1] * w_un[:, 0:N]
    for j in range(1, 2 * S + 1):
        w_shift = w_shift + s[:, j:j + 1] * w_un[:, j:j + N]
    # sharpen: w**r / (sum(w**r) + EPSILON); clamp before log to avoid -inf on underflow
    w_sf = jnp.maximum(w_shift, 1e-30)
    wr = jnp.exp(r * jnp.log(w_sf))
    denom = jnp.sum(wr, axis=1, keepdims=True) + EPSILON
    if approx:
        return wr * pl.reciprocal(denom, approx=True)
    return wr / denom


def _ntm_step(x, h, c, bank, rprev, wprev,
              w_lstm, b_lstm, w_heads, b_heads, wo, bo,
              *, H, N, M, S, HN, approx):
    f32 = jnp.float32

    # --- Controller: nn.LSTMCell (PyTorch gate order i, f, g, o), fused matmul ---
    xh = jnp.concatenate([x, h], axis=1)                               # (B, E+H)
    gates = jnp.dot(xh, w_lstm, preferred_element_type=f32) + b_lstm   # (B, 4H)
    i_g = jax.nn.sigmoid(gates[:, 0 * H:1 * H])
    f_g = jax.nn.sigmoid(gates[:, 1 * H:2 * H])
    g_g = jnp.tanh(gates[:, 2 * H:3 * H])
    o_g = jax.nn.sigmoid(gates[:, 3 * H:4 * H])
    c = f_g * c + i_g * g_g
    h = o_g * jnp.tanh(c)

    r_out = M + 4 + 2 * S        # read head linear output width
    w_out = 3 * M + 4 + 2 * S    # write head linear output width

    # all read + write head projections fused into ONE matmul
    proj = jnp.dot(h, w_heads, preferred_element_type=f32) + b_heads   # (B, HN*(r+w))
    proj_r = proj[:, :HN * r_out]
    proj_w = proj[:, HN * r_out:]

    reads, new_r, new_w = [], [], []
    for hi in range(HN):
        # ---- write head (on the current bank), then Memory.write ----
        pw = proj_w[:, hi * w_out:(hi + 1) * w_out]
        k, b, g, s, r = _split_kbgsr(pw, M, S)
        e = jax.nn.sigmoid(pw[:, M + 4 + 2 * S:2 * M + 4 + 2 * S])
        a = pw[:, 2 * M + 4 + 2 * S:3 * M + 4 + 2 * S]
        w_addr = _head_move(bank, k, b, g, s, r, wprev[hi], N, S, approx)
        new_w.append(w_addr)
        bank = bank * (1.0 - w_addr[:, :, None] * e[:, None, :])
        bank = bank + w_addr[:, :, None] * a[:, None, :]

        # ---- read head (on the just-updated bank), then Memory.read ----
        pr = proj_r[:, hi * r_out:(hi + 1) * r_out]
        k, b, g, s, r = _split_kbgsr(pr, M, S)
        r_addr = _head_move(bank, k, b, g, s, r, rprev[hi], N, S, approx)
        new_r.append(r_addr)
        reads.append(jnp.sum(r_addr[:, :, None] * bank, axis=1))        # (B, M)

    feat = jnp.concatenate(reads + [h], axis=1)                          # (B, HN*M + H)
    logits = jnp.dot(feat, wo, preferred_element_type=f32) + bo          # (B, LOGIT_PAD)
    return logits, h, c, bank, jnp.stack(new_r), jnp.stack(new_w)


# ---------------------------------------------------------------------------
# Pallas kernel: grid iterates over timesteps; bank / h / c are resident
# output accumulators; rprev / wprev live in VMEM scratch.
# ---------------------------------------------------------------------------
def ntm_kernel(x_ref, h0_ref, c0_ref, wl_ref, bl_ref, bank0_ref,
               wh_ref, bh_ref, wo_ref, bo_ref,
               logits_ref, bank_ref, h_ref, c_ref,
               rprev_scr, wprev_scr, *, H, N, M, S, HN):
    t = pl.program_id(0)

    @pl.when(t == 0)
    def _init():
        h_ref[...] = h0_ref[...]                       # Controller.reset
        c_ref[...] = c0_ref[...]
        bank_ref[...] = bank0_ref[...]                 # Memory.reset (initial bank)
        rprev_scr[...] = jnp.zeros_like(rprev_scr)     # Head.reset -> zeros (no HBM DMA)
        wprev_scr[...] = jnp.zeros_like(wprev_scr)

    logits, h_new, c_new, bank_new, rprev_new, wprev_new = _ntm_step(
        x_ref[0], h_ref[...], c_ref[...], bank_ref[...],
        rprev_scr[...], wprev_scr[...],
        wl_ref[...], bl_ref[...], wh_ref[...], bh_ref[...],
        wo_ref[...], bo_ref[...],
        H=H, N=N, M=M, S=S, HN=HN, approx=True)

    logits_ref[0] = logits          # lane-dense (B, 128) store for this timestep
    h_ref[...] = h_new              # carried state (resident, written back once)
    c_ref[...] = c_new
    bank_ref[...] = bank_new
    rprev_scr[...] = rprev_new
    wprev_scr[...] = wprev_new


# ---------------------------------------------------------------------------
# Parameter init (deterministic, mirrors the PyTorch module's shapes / init)
# ---------------------------------------------------------------------------
def init_ntm_params(key, *, B, E, H, N, M, S, HN, O):
    ks = jax.random.split(key, 13)

    def unif(k, shape, bound):
        return jax.random.uniform(k, shape, jnp.float32, -bound, bound)

    r_out = M + 4 + 2 * S
    w_out = 3 * M + 4 + 2 * S
    bnd_lstm = 1.0 / math.sqrt(H)
    bnd_head = 1.0 / math.sqrt(H)
    bnd_out = 1.0 / math.sqrt(HN * M + H)
    xav = math.sqrt(6.0 / (N * M + B * M))   # xavier_uniform on the (B, N, M) bank

    return dict(
        w_ih=unif(ks[0], (4 * H, E), bnd_lstm),
        w_hh=unif(ks[1], (4 * H, H), bnd_lstm),
        b_ih=unif(ks[2], (4 * H,), bnd_lstm),
        b_hh=unif(ks[3], (4 * H,), bnd_lstm),
        h_bias=jax.random.normal(ks[4], (H,), jnp.float32),
        c_bias=jax.random.normal(ks[5], (H,), jnp.float32),
        wr=unif(ks[6], (HN, r_out, H), bnd_head),
        br=unif(ks[7], (HN, r_out), bnd_head),
        ww=unif(ks[8], (HN, w_out, H), bnd_head),
        bw=unif(ks[9], (HN, w_out), bnd_head),
        wo=unif(ks[10], (O, HN * M + H), bnd_out),
        bo=unif(ks[11], (O,), bnd_out),
        bank=unif(ks[12], (B, N, M), xav),
    )


def assemble_inputs(xs, params, *, H, N, M, S, HN, O):
    """Fused / pre-transposed kernel argument tuple."""
    T, B, E = xs.shape
    p = params
    h0 = jnp.tile(p["h_bias"][None, :], (B, 1))                            # Controller.reset
    c0 = jnp.tile(p["c_bias"][None, :], (B, 1))
    # fused LSTM: [x, h] @ [Wih; Whh] + (bih + bhh)
    w_lstm = jnp.concatenate([jnp.transpose(p["w_ih"]),
                              jnp.transpose(p["w_hh"])], axis=0)            # (E+H, 4H)
    b_lstm = (p["b_ih"] + p["b_hh"])[None, :]                               # (1, 4H)
    # fused head projection: [read heads | write heads]
    wr_t = jnp.transpose(p["wr"].reshape(-1, H))                            # (H, HN*r_out)
    ww_t = jnp.transpose(p["ww"].reshape(-1, H))                            # (H, HN*w_out)
    w_heads = jnp.concatenate([wr_t, ww_t], axis=1)
    b_heads = jnp.concatenate([p["br"].reshape(-1), p["bw"].reshape(-1)])[None, :]
    # output linear, zero-padded to 128 lanes so per-step stores are unmasked
    wo_pad = jnp.zeros((HN * M + H, LOGIT_PAD), jnp.float32).at[:, :O].set(
        jnp.transpose(p["wo"]))
    bo_pad = jnp.zeros((1, LOGIT_PAD), jnp.float32).at[:, :O].set(p["bo"][None, :])
    return (xs, h0, c0, w_lstm, b_lstm, p["bank"], w_heads, b_heads, wo_pad, bo_pad)


# ---------------------------------------------------------------------------
# pallas_call wrapper: whole rollout in one kernel launch
# ---------------------------------------------------------------------------
def ntm_forward(xs, params, *, H, N, M, S, HN, O):
    T, B, E = xs.shape
    r_out = M + 4 + 2 * S
    w_out = 3 * M + 4 + 2 * S
    inputs = assemble_inputs(xs, params, H=H, N=N, M=M, S=S, HN=HN, O=O)
    kernel = functools.partial(ntm_kernel, H=H, N=N, M=M, S=S, HN=HN)

    def once(shape):   # loaded once / resident across the whole rollout
        return pl.BlockSpec(shape, lambda t, _s=shape: tuple(0 for _ in _s))

    in_specs = [
        pl.BlockSpec((1, B, E), lambda t: (t, 0, 0)),          # x[t] streamed per step
        once((B, H)), once((B, H)),                             # h0, c0
        once((E + H, 4 * H)), once((1, 4 * H)),                 # fused LSTM W, b
        once((B, N, M)),                                        # initial bank
        once((H, HN * (r_out + w_out))),                        # fused head W
        once((1, HN * (r_out + w_out))),                        # fused head b
        once((HN * M + H, LOGIT_PAD)), once((1, LOGIT_PAD)),    # padded output linear
    ]
    out_specs = (
        pl.BlockSpec((1, B, LOGIT_PAD), lambda t: (t, 0, 0)),   # per-step logits (lane-dense)
        once((B, N, M)),                                        # final bank (resident accumulator)
        once((B, H)), once((B, H)),                             # final h, c
    )
    out_shape = (
        jax.ShapeDtypeStruct((T, B, LOGIT_PAD), jnp.float32),
        jax.ShapeDtypeStruct((B, N, M), jnp.float32),
        jax.ShapeDtypeStruct((B, H), jnp.float32),
        jax.ShapeDtypeStruct((B, H), jnp.float32),
    )
    grid_spec = pltpu.PrefetchScalarGridSpec(
        num_scalar_prefetch=0, grid=(T,),
        in_specs=in_specs, out_specs=out_specs,
        scratch_shapes=[pltpu.VMEM((HN, B, N), jnp.float32),   # read-head prev weights
                        pltpu.VMEM((HN, B, N), jnp.float32)])  # write-head prev weights

    logits_pad, bank_f, h_f, c_f = pl.pallas_call(
        kernel, out_shape=out_shape, grid_spec=grid_spec,
        compiler_params=pltpu.CompilerParams(
            dimension_semantics=("arbitrary",)),               # recurrence: sequential axis
    )(*inputs)
    return logits_pad[:, :, :O], bank_f, h_f, c_f


# ---------------------------------------------------------------------------
# Pure-JAX reference (identical per-step math, Python loop over time)
# ---------------------------------------------------------------------------
def ntm_reference(xs, h0, c0, w_lstm, b_lstm, bank0, w_heads, b_heads, wo, bo,
                  *, H, N, M, S, HN):
    T, B, _ = xs.shape
    h, c, bank = h0, c0, bank0
    rprev = jnp.zeros((HN, B, N), jnp.float32)
    wprev = jnp.zeros((HN, B, N), jnp.float32)
    outs = []
    for t in range(T):
        logits, h, c, bank, rprev, wprev = _ntm_step(
            xs[t], h, c, bank, rprev, wprev,
            w_lstm, b_lstm, w_heads, b_heads, wo, bo,
            H=H, N=N, M=M, S=S, HN=HN, approx=False)
        outs.append(logits)
    return jnp.stack(outs), bank, h, c


# ---------------------------------------------------------------------------
if __name__ == "__main__":
    # small, module-consistent shapes (B multiple of 8 -> full sublane occupancy;
    # N*M = 128 -> bank rows line up with one vreg row)
    B, E, H = 8, 8, 32           # batch, embedding_size, hidden_size
    N, M = 16, 8                 # memory_size, memory_feature_size
    S, HN, O = 1, 2, 8           # max_shift_size, head_num, output_size
    T = 8                        # timesteps, iterated inside the kernel grid

    key = jax.random.PRNGKey(0)
    kx, kp = jax.random.split(key)
    xs = jax.random.normal(kx, (T, B, E), jnp.float32)
    params = init_ntm_params(kp, B=B, E=E, H=H, N=N, M=M, S=S, HN=HN, O=O)

    logits, bank_f, h_f, c_f = ntm_forward(xs, params, H=H, N=N, M=M, S=S, HN=HN, O=O)
    logits = jax.block_until_ready(logits)
    bank_f = jax.block_until_ready(bank_f)
    h_f = jax.block_until_ready(h_f)
    c_f = jax.block_until_ready(c_f)

    # pure-JAX reference as a sanity check
    ref_in = assemble_inputs(xs, params, H=H, N=N, M=M, S=S, HN=HN, O=O)
    ref_logits_pad, ref_bank, ref_h, ref_c = ntm_reference(
        *ref_in, H=H, N=N, M=M, S=S, HN=HN)
    ref_logits = ref_logits_pad[:, :, :O]

    assert logits.shape == (T, B, O) and bank_f.shape == (B, N, M)
    assert h_f.shape == (B, H) and c_f.shape == (B, H)
    assert jnp.allclose(logits, ref_logits, rtol=2e-2, atol=2e-2)
    assert jnp.allclose(bank_f, ref_bank, rtol=2e-2, atol=2e-2)
    assert jnp.allclose(h_f, ref_h, rtol=2e-2, atol=2e-2)
    assert jnp.allclose(c_f, ref_c, rtol=2e-2, atol=2e-2)

    print("KERNEL_OK")
</pallas_src>

<mosaic_0001>
module attributes {stable_mosaic.version = 11 : i64} {
  func.func @ntm_kernel(%arg0: i32, %arg1: memref<1x8x8xf32, #tpu.memory_space<vmem>>, %arg2: memref<8x32xf32, #tpu.memory_space<vmem>>, %arg3: memref<8x32xf32, #tpu.memory_space<vmem>>, %arg4: memref<40x128xf32, #tpu.memory_space<vmem>>, %arg5: memref<1x128xf32, #tpu.memory_space<vmem>>, %arg6: memref<8x16x8xf32, #tpu.memory_space<vmem>>, %arg7: memref<32x88xf32, #tpu.memory_space<vmem>>, %arg8: memref<1x88xf32, #tpu.memory_space<vmem>>, %arg9: memref<48x128xf32, #tpu.memory_space<vmem>>, %arg10: memref<1x128xf32, #tpu.memory_space<vmem>>, %arg11: memref<1x8x128xf32, #tpu.memory_space<vmem>>, %arg12: memref<8x16x8xf32, #tpu.memory_space<vmem>>, %arg13: memref<8x32xf32, #tpu.memory_space<vmem>>, %arg14: memref<8x32xf32, #tpu.memory_space<vmem>>, %arg15: memref<2x8x16xf32, #tpu.memory_space<vmem>>, %arg16: memref<2x8x16xf32, #tpu.memory_space<vmem>>) attributes {dimension_semantics = [#tpu.dimension_semantics<arbitrary>], iteration_bounds = array<i64: 8>, scalar_prefetch = 0 : i64, scratch_operands = 2 : i64, tpu.core_type = #tpu.core_type<tc>, window_params = [{transform_indices = @transform_0, window_bounds = array<i64: 1, 8, 8>}, {pipeline_mode = #tpu.pipeline_mode<synchronous>, transform_indices = @transform_1, window_bounds = array<i64: 8, 32>}, {pipeline_mode = #tpu.pipeline_mode<synchronous>, transform_indices = @transform_2, window_bounds = array<i64: 8, 32>}, {pipeline_mode = #tpu.pipeline_mode<synchronous>, transform_indices = @transform_3, window_bounds = array<i64: 40, 128>}, {pipeline_mode = #tpu.pipeline_mode<synchronous>, transform_indices = @transform_4, window_bounds = array<i64: 1, 128>}, {pipeline_mode = #tpu.pipeline_mode<synchronous>, transform_indices = @transform_5, window_bounds = array<i64: 8, 16, 8>}, {pipeline_mode = #tpu.pipeline_mode<synchronous>, transform_indices = @transform_6, window_bounds = array<i64: 32, 88>}, {pipeline_mode = #tpu.pipeline_mode<synchronous>, transform_indices = @transform_7, window_bounds = array<i64: 1, 88>}, {pipeline_mode = #tpu.pipeline_mode<synchronous>, transform_indices = @transform_8, window_bounds = array<i64: 48, 128>}, {pipeline_mode = #tpu.pipeline_mode<synchronous>, transform_indices = @transform_9, window_bounds = array<i64: 1, 128>}, {transform_indices = @transform_10, window_bounds = array<i64: 1, 8, 128>}, {pipeline_mode = #tpu.pipeline_mode<synchronous>, transform_indices = @transform_11, window_bounds = array<i64: 8, 16, 8>}, {pipeline_mode = #tpu.pipeline_mode<synchronous>, transform_indices = @transform_12, window_bounds = array<i64: 8, 32>}, {pipeline_mode = #tpu.pipeline_mode<synchronous>, transform_indices = @transform_13, window_bounds = array<i64: 8, 32>}]} {
    %c0_i32 = arith.constant 0 : i32
    %0 = arith.cmpi eq, %arg0, %c0_i32 : i32
    %1 = arith.extui %0 : i1 to i32
    %c0_i32_0 = arith.constant 0 : i32
    %2 = arith.cmpi ne, %1, %c0_i32_0 : i32
    scf.if %2 {
      %c0_135 = arith.constant 0 : index
      %c0_136 = arith.constant 0 : index
      %586 = vector.load %arg2[%c0_135, %c0_136] : memref<8x32xf32, #tpu.memory_space<vmem>>, vector<8x32xf32>
      %c0_137 = arith.constant 0 : index
      %c0_138 = arith.constant 0 : index
      %587 = vector.load %arg13[%c0_137, %c0_138] : memref<8x32xf32, #tpu.memory_space<vmem>>, vector<8x32xf32>
      tpu.vector_store %arg13[%c0_137, %c0_138], %586 {strides = array<i32>} : memref<8x32xf32, #tpu.memory_space<vmem>>, vector<8x32xf32>,
      %c0_139 = arith.constant 0 : index
      %c0_140 = arith.constant 0 : index
      %588 = vector.load %arg3[%c0_139, %c0_140] : memref<8x32xf32, #tpu.memory_space<vmem>>, vector<8x32xf32>
      %c0_141 = arith.constant 0 : index
      %c0_142 = arith.constant 0 : index
      %589 = vector.load %arg14[%c0_141, %c0_142] : memref<8x32xf32, #tpu.memory_space<vmem>>, vector<8x32xf32>
      tpu.vector_store %arg14[%c0_141, %c0_142], %588 {strides = array<i32>} : memref<8x32xf32, #tpu.memory_space<vmem>>, vector<8x32xf32>,
      %c0_143 = arith.constant 0 : index
      %c0_144 = arith.constant 0 : index
      %c0_145 = arith.constant 0 : index
      %590 = vector.load %arg6[%c0_143, %c0_144, %c0_145] : memref<8x16x8xf32, #tpu.memory_space<vmem>>, vector<8x16x8xf32>
      %c0_146 = arith.constant 0 : index
      %c0_147 = arith.constant 0 : index
      %c0_148 = arith.constant 0 : index
      %591 = vector.load %arg12[%c0_146, %c0_147, %c0_148] : memref<8x16x8xf32, #tpu.memory_space<vmem>>, vector<8x16x8xf32>
      tpu.vector_store %arg12[%c0_146, %c0_147, %c0_148], %590 {strides = array<i32>} : memref<8x16x8xf32, #tpu.memory_space<vmem>>, vector<8x16x8xf32>,
      %cst_149 = arith.constant 0.000000e+00 : f32
      %592 = vector.broadcast %cst_149 : f32 to vector<2x8x16xf32>
      %c0_150 = arith.constant 0 : index
      %c0_151 = arith.constant 0 : index
      %c0_152 = arith.constant 0 : index
      %593 = vector.load %arg15[%c0_150, %c0_151, %c0_152] : memref<2x8x16xf32, #tpu.memory_space<vmem>>, vector<2x8x16xf32>
      tpu.vector_store %arg15[%c0_150, %c0_151, %c0_152], %592 {strides = array<i32>} : memref<2x8x16xf32, #tpu.memory_space<vmem>>, vector<2x8x16xf32>,
      %cst_153 = arith.constant 0.000000e+00 : f32
      %594 = vector.broadcast %cst_153 : f32 to vector<2x8x16xf32>
      %c0_154 = arith.constant 0 : index
      %c0_155 = arith.constant 0 : index
      %c0_156 = arith.constant 0 : index
      %595 = vector.load %arg16[%c0_154, %c0_155, %c0_156] : memref<2x8x16xf32, #tpu.memory_space<vmem>>, vector<2x8x16xf32>
      tpu.vector_store %arg16[%c0_154, %c0_155, %c0_156], %594 {strides = array<i32>} : memref<2x8x16xf32, #tpu.memory_space<vmem>>, vector<2x8x16xf32>,
    } else {
    }
    %c0 = arith.constant 0 : index
    %c0_1 = arith.constant 0 : index
    %c0_2 = arith.constant 0 : index
    %3 = vector.load %arg1[%c0, %c0_1, %c0_2] : memref<1x8x8xf32, #tpu.memory_space<vmem>>, vector<1x8x8xf32>
    %4 = vector.shape_cast %3 : vector<1x8x8xf32> to vector<8x8xf32>
    %c0_3 = arith.constant 0 : index
    %c0_4 = arith.constant 0 : index
    %5 = vector.load %arg13[%c0_3, %c0_4] : memref<8x32xf32, #tpu.memory_space<vmem>>, vector<8x32xf32>
    %c0_5 = arith.constant 0 : index
    %c0_6 = arith.constant 0 : index
    %6 = vector.load %arg14[%c0_5, %c0_6] : memref<8x32xf32, #tpu.memory_space<vmem>>, vector<8x32xf32>
    %c0_7 = arith.constant 0 : index
    %c0_8 = arith.constant 0 : index
    %c0_9 = arith.constant 0 : index
    %7 = vector.load %arg12[%c0_7, %c0_8, %c0_9] : memref<8x16x8xf32, #tpu.memory_space<vmem>>, vector<8x16x8xf32>
    %c0_10 = arith.constant 0 : index
    %c0_11 = arith.constant 0 : index
    %c0_12 = arith.constant 0 : index
    %8 = vector.load %arg15[%c0_10, %c0_11, %c0_12] : memref<2x8x16xf32, #tpu.memory_space<vmem>>, vector<2x8x16xf32>
    %c0_13 = arith.constant 0 : index
    %c0_14 = arith.constant 0 : index
    %c0_15 = arith.constant 0 : index
    %9 = vector.load %arg16[%c0_13, %c0_14, %c0_15] : memref<2x8x16xf32, #tpu.memory_space<vmem>>, vector<2x8x16xf32>
    %c0_16 = arith.constant 0 : index
    %c0_17 = arith.constant 0 : index
    %10 = vector.load %arg4[%c0_16, %c0_17] : memref<40x128xf32, #tpu.memory_space<vmem>>, vector<40x128xf32>
    %c0_18 = arith.constant 0 : index
    %c0_19 = arith.constant 0 : index
    %11 = vector.load %arg5[%c0_18, %c0_19] : memref<1x128xf32, #tpu.memory_space<vmem>>, vector<1x128xf32>
    %c0_20 = arith.constant 0 : index
    %c0_21 = arith.constant 0 : index
    %12 = vector.load %arg7[%c0_20, %c0_21] : memref<32x88xf32, #tpu.memory_space<vmem>>, vector<32x88xf32>
    %c0_22 = arith.constant 0 : index
    %c0_23 = arith.constant 0 : index
    %13 = vector.load %arg8[%c0_22, %c0_23] : memref<1x88xf32, #tpu.memory_space<vmem>>, vector<1x88xf32>
    %c0_24 = arith.constant 0 : index
    %c0_25 = arith.constant 0 : index
    %14 = vector.load %arg9[%c0_24, %c0_25] : memref<48x128xf32, #tpu.memory_space<vmem>>, vector<48x128xf32>
    %c0_26 = arith.constant 0 : index
    %c0_27 = arith.constant 0 : index
    %15 = vector.load %arg10[%c0_26, %c0_27] : memref<1x128xf32, #tpu.memory_space<vmem>>, vector<1x128xf32>
    %16 = tpu.concatenate %4, %5 in 1 : vector<8x8xf32>, vector<8x32xf32> -> vector<8x40xf32>
    %cst = arith.constant dense<0.000000e+00> : vector<8x128xf32>
    %17 = tpu.matmul %16, %10, %cst {dimension_numbers = #tpu.dot_dimension_numbers<[1], [0], [0], [1], [0, 0, 1, 1], [], []>} : vector<8x40xf32>, vector<40x128xf32>, vector<8x128xf32> -> vector<8x128xf32>
    %18 = vector.broadcast %11 : vector<1x128xf32> to vector<8x128xf32>
    %19 = arith.addf %17, %18 : vector<8x128xf32>
    %20 = vector.extract_strided_slice %19 {offsets = [0, 0], sizes = [8, 32], strides = [1, 1]} : vector<8x128xf32> to vector<8x32xf32>
    %21 = arith.negf %20 : vector<8x32xf32>
    %22 = math.exp %21 : vector<8x32xf32>
    %cst_28 = arith.constant 1.000000e+00 : f32
    %23 = vector.broadcast %cst_28 : f32 to vector<8x32xf32>
    %24 = arith.addf %23, %22 : vector<8x32xf32>
    %25 = arith.divf %23, %24 : vector<8x32xf32>
    %26 = vector.extract_strided_slice %19 {offsets = [0, 32], sizes = [8, 32], strides = [1, 1]} : vector<8x128xf32> to vector<8x32xf32>
    %27 = arith.negf %26 : vector<8x32xf32>
    %28 = math.exp %27 : vector<8x32xf32>
    %cst_29 = arith.constant 1.000000e+00 : f32
    %29 = vector.broadcast %cst_29 : f32 to vector<8x32xf32>
    %30 = arith.addf %29, %28 : vector<8x32xf32>
    %31 = arith.divf %29, %30 : vector<8x32xf32>
    %32 = vector.extract_strided_slice %19 {offsets = [0, 64], sizes = [8, 32], strides = [1, 1]} : vector<8x128xf32> to vector<8x32xf32>
    %33 = math.tanh %32 : vector<8x32xf32>
    %34 = vector.extract_strided_slice %19 {offsets = [0, 96], sizes = [8, 32], strides = [1, 1]} : vector<8x128xf32> to vector<8x32xf32>
    %35 = arith.negf %34 : vector<8x32xf32>
    %36 = math.exp %35 : vector<8x32xf32>
    %cst_30 = arith.constant 1.000000e+00 : f32
    %37 = vector.broadcast %cst_30 : f32 to vector<8x32xf32>
    %38 = arith.addf %37, %36 : vector<8x32xf32>
    %39 = arith.divf %37, %38 : vector<8x32xf32>
    %40 = arith.mulf %31, %6 : vector<8x32xf32>
    %41 = arith.mulf %25, %33 : vector<8x32xf32>
    %42 = arith.addf %40, %41 : vector<8x32xf32>
    %43 = math.tanh %42 : vector<8x32xf32>
    %44 = arith.mulf %39, %43 : vector<8x32xf32>
    %cst_31 = arith.constant dense<0.000000e+00> : vector<8x88xf32>
    %45 = tpu.matmul %44, %12, %cst_31 {dimension_numbers = #tpu.dot_dimension_numbers<[1], [0], [0], [1], [0, 0, 1, 1], [], []>} : vector<8x32xf32>, vector<32x88xf32>, vector<8x88xf32> -> vector<8x88xf32>
    %46 = vector.broadcast %13 : vector<1x88xf32> to vector<8x88xf32>
    %47 = arith.addf %45, %46 : vector<8x88xf32>
    %48 = vector.extract_strided_slice %47 {offsets = [0, 0], sizes = [8, 28], strides = [1, 1]} : vector<8x88xf32> to vector<8x28xf32>
    %49 = vector.extract_strided_slice %47 {offsets = [0, 28], sizes = [8, 60], strides = [1, 1]} : vector<8x88xf32> to vector<8x60xf32>
    %50 = vector.extract_strided_slice %49 {offsets = [0, 0], sizes = [8, 30], strides = [1, 1]} : vector<8x60xf32> to vector<8x30xf32>
    %51 = vector.extract_strided_slice %50 {offsets = [0, 0], sizes = [8, 8], strides = [1, 1]} : vector<8x30xf32> to vector<8x8xf32>
    %52 = vector.extract_strided_slice %50 {offsets = [0, 8], sizes = [8, 1], strides = [1, 1]} : vector<8x30xf32> to vector<8x1xf32>
    %cst_32 = arith.constant 0.000000e+00 : f32
    %53 = vector.broadcast %cst_32 : f32 to vector<8x1xf32>
    %54 = arith.maximumf %52, %53 : vector<8x1xf32>
    %55 = vector.broadcast %cst_32 : f32 to vector<8x1xf32>
    %56 = arith.subf %52, %55 : vector<8x1xf32>
    %57 = arith.cmpf one, %56, %56 : vector<8x1xf32>
    %58 = vector.broadcast %cst_32 : f32 to vector<8x1xf32>
    %59 = arith.addf %52, %58 : vector<8x1xf32>
    %60 = math.absf %56 : vector<8x1xf32>
    %cst_33 = arith.constant 0.000000e+00 : f32
    %61 = vector.broadcast %cst_33 : f32 to vector<8x1xf32>
    %62 = arith.subf %61, %60 : vector<8x1xf32>
    %63 = math.exp %62 : vector<8x1xf32>
    %64 = math.log1p %63 : vector<8x1xf32>
    %65 = arith.addf %54, %64 : vector<8x1xf32>
    %66 = arith.select %57, %59, %65 : vector<8x1xi1>, vector<8x1xf32>
    %67 = vector.extract_strided_slice %50 {offsets = [0, 9], sizes = [8, 1], strides = [1, 1]} : vector<8x30xf32> to vector<8x1xf32>
    %68 = arith.negf %67 : vector<8x1xf32>
    %69 = math.exp %68 : vector<8x1xf32>
    %cst_34 = arith.constant 1.000000e+00 : f32
    %70 = vector.broadcast %cst_34 : f32 to vector<8x1xf32>
    %71 = arith.addf %70, %69 : vector<8x1xf32>
    %72 = arith.divf %70, %71 : vector<8x1xf32>
    %73 = vector.extract_strided_slice %50 {offsets = [0, 10], sizes = [8, 3], strides = [1, 1]} : vector<8x30xf32> to vector<8x3xf32>
    %cst_35 = arith.constant dense<0xFF800000> : vector<8xf32>
    %74 = vector.multi_reduction <maximumf>, %73, %cst_35 [1] : vector<8x3xf32> to vector<8xf32>
    %cst_36 = arith.constant 0xFF800000 : f32
    %75 = vector.broadcast %cst_36 : f32 to vector<8xf32>
    %76 = arith.maximumf %75, %74 : vector<8xf32>
    %77 = vector.shape_cast %76 : vector<8xf32> to vector<8x1xf32>
    %78 = vector.broadcast %77 : vector<8x1xf32> to vector<8x3xf32>
    %79 = arith.subf %73, %78 : vector<8x3xf32>
    %80 = math.exp %79 : vector<8x3xf32>
    %cst_37 = arith.constant dense<0.000000e+00> : vector<8xf32>
    %81 = vector.multi_reduction <add>, %80, %cst_37 [1] : vector<8x3xf32> to vector<8xf32>
    %82 = vector.shape_cast %81 : vector<8xf32> to vector<8x1xf32>
    %83 = vector.broadcast %82 : vector<8x1xf32> to vector<8x3xf32>
    %84 = arith.divf %80, %83 : vector<8x3xf32>
    %85 = vector.extract_strided_slice %50 {offsets = [0, 13], sizes = [8, 1], strides = [1, 1]} : vector<8x30xf32> to vector<8x1xf32>
    %cst_38 = arith.constant 0.000000e+00 : f32
    %86 = vector.broadcast %cst_38 : f32 to vector<8x1xf32>
    %87 = arith.maximumf %85, %86 : vector<8x1xf32>
    %88 = vector.broadcast %cst_38 : f32 to vector<8x1xf32>
    %89 = arith.subf %85, %88 : vector<8x1xf32>
    %90 = arith.cmpf one, %89, %89 : vector<8x1xf32>
    %91 = vector.broadcast %cst_38 : f32 to vector<8x1xf32>
    %92 = arith.addf %85, %91 : vector<8x1xf32>
    %93 = math.absf %89 : vector<8x1xf32>
    %cst_39 = arith.constant 0.000000e+00 : f32
    %94 = vector.broadcast %cst_39 : f32 to vector<8x1xf32>
    %95 = arith.subf %94, %93 : vector<8x1xf32>
    %96 = math.exp %95 : vector<8x1xf32>
    %97 = math.log1p %96 : vector<8x1xf32>
    %98 = arith.addf %87, %97 : vector<8x1xf32>
    %99 = arith.select %90, %92, %98 : vector<8x1xi1>, vector<8x1xf32>
    %cst_40 = arith.constant 1.000000e+00 : f32
    %100 = vector.broadcast %cst_40 : f32 to vector<8x1xf32>
    %101 = arith.addf %100, %99 : vector<8x1xf32>
    %102 = vector.extract_strided_slice %50 {offsets = [0, 14], sizes = [8, 8], strides = [1, 1]} : vector<8x30xf32> to vector<8x8xf32>
    %103 = arith.negf %102 : vector<8x8xf32>
    %104 = math.exp %103 : vector<8x8xf32>
    %cst_41 = arith.constant 1.000000e+00 : f32
    %105 = vector.broadcast %cst_41 : f32 to vector<8x8xf32>
    %106 = arith.addf %105, %104 : vector<8x8xf32>
    %107 = arith.divf %105, %106 : vector<8x8xf32>
    %108 = vector.extract_strided_slice %50 {offsets = [0, 22], sizes = [8, 8], strides = [1, 1]} : vector<8x30xf32> to vector<8x8xf32>
    %109 = vector.extract_strided_slice %9 {offsets = [0, 0, 0], sizes = [1, 8, 16], strides = [1, 1, 1]} : vector<2x8x16xf32> to vector<1x8x16xf32>
    %110 = vector.shape_cast %109 : vector<1x8x16xf32> to vector<8x16xf32>
    %111 = vector.shape_cast %51 : vector<8x8xf32> to vector<8x1x8xf32>
    %112 = vector.broadcast %111 : vector<8x1x8xf32> to vector<8x16x8xf32>
    %113 = arith.mulf %7, %112 : vector<8x16x8xf32>
    %cst_42 = arith.constant dense<0.000000e+00> : vector<8x16xf32>
    %114 = vector.multi_reduction <add>, %113, %cst_42 [2] : vector<8x16x8xf32> to vector<8x16xf32>
    %115 = arith.mulf %7, %7 : vector<8x16x8xf32>
    %cst_43 = arith.constant dense<0.000000e+00> : vector<8x16xf32>
    %116 = vector.multi_reduction <add>, %115, %cst_43 [2] : vector<8x16x8xf32> to vector<8x16xf32>
    %117 = arith.mulf %51, %51 : vector<8x8xf32>
    %cst_44 = arith.constant dense<0.000000e+00> : vector<8xf32>
    %118 = vector.multi_reduction <add>, %117, %cst_44 [1] : vector<8x8xf32> to vector<8xf32>
    %119 = vector.shape_cast %118 : vector<8xf32> to vector<8x1xf32>
    %120 = vector.broadcast %119 : vector<8x1xf32> to vector<8x16xf32>
    %121 = arith.mulf %116, %120 : vector<8x16xf32>
    %cst_45 = arith.constant 1.000000e-16 : f32
    %122 = vector.broadcast %cst_45 : f32 to vector<8x16xf32>
    %123 = arith.maximumf %121, %122 : vector<8x16xf32>
    %124 = math.rsqrt %123 : vector<8x16xf32>
    %125 = arith.mulf %114, %124 : vector<8x16xf32>
    %126 = vector.broadcast %66 : vector<8x1xf32> to vector<8x16xf32>
    %127 = arith.mulf %126, %125 : vector<8x16xf32>
    %cst_46 = arith.constant dense<0xFF800000> : vector<8xf32>
    %128 = vector.multi_reduction <maximumf>, %127, %cst_46 [1] : vector<8x16xf32> to vector<8xf32>
    %cst_47 = arith.constant 0xFF800000 : f32
    %129 = vector.broadcast %cst_47 : f32 to vector<8xf32>
    %130 = arith.maximumf %129, %128 : vector<8xf32>
    %131 = vector.shape_cast %130 : vector<8xf32> to vector<8x1xf32>
    %132 = vector.broadcast %131 : vector<8x1xf32> to vector<8x16xf32>
    %133 = arith.subf %127, %132 : vector<8x16xf32>
    %134 = math.exp %133 : vector<8x16xf32>
    %cst_48 = arith.constant dense<0.000000e+00> : vector<8xf32>
    %135 = vector.multi_reduction <add>, %134, %cst_48 [1] : vector<8x16xf32> to vector<8xf32>
    %136 = vector.shape_cast %135 : vector<8xf32> to vector<8x1xf32>
    %137 = vector.broadcast %136 : vector<8x1xf32> to vector<8x16xf32>
    %138 = arith.divf %134, %137 : vector<8x16xf32>
    %cst_49 = arith.constant 1.000000e+00 : f32
    %139 = vector.broadcast %cst_49 : f32 to vector<8x1xf32>
    %140 = arith.subf %139, %72 : vector<8x1xf32>
    %141 = vector.broadcast %140 : vector<8x1xf32> to vector<8x16xf32>
    %142 = arith.mulf %141, %110 : vector<8x16xf32>
    %143 = arith.addf %138, %142 : vector<8x16xf32>
    %144 = vector.extract_strided_slice %143 {offsets = [0, 15], sizes = [8, 1], strides = [1, 1]} : vector<8x16xf32> to vector<8x1xf32>
    %145 = vector.extract_strided_slice %143 {offsets = [0, 0], sizes = [8, 1], strides = [1, 1]} : vector<8x16xf32> to vector<8x1xf32>
    %146 = tpu.concatenate %144, %143, %145 in 1 : vector<8x1xf32>, vector<8x16xf32>, vector<8x1xf32> -> vector<8x18xf32>
    %147 = vector.extract_strided_slice %84 {offsets = [0, 0], sizes = [8, 1], strides = [1, 1]} : vector<8x3xf32> to vector<8x1xf32>
    %148 = vector.extract_strided_slice %146 {offsets = [0, 0], sizes = [8, 16], strides = [1, 1]} : vector<8x18xf32> to vector<8x16xf32>
    %149 = vector.broadcast %147 : vector<8x1xf32> to vector<8x16xf32>
    %150 = arith.mulf %149, %148 : vector<8x16xf32>
    %151 = vector.extract_strided_slice %84 {offsets = [0, 1], sizes = [8, 1], strides = [1, 1]} : vector<8x3xf32> to vector<8x1xf32>
    %152 = vector.extract_strided_slice %146 {offsets = [0, 1], sizes = [8, 16], strides = [1, 1]} : vector<8x18xf32> to vector<8x16xf32>
    %153 = vector.broadcast %151 : vector<8x1xf32> to vector<8x16xf32>
    %154 = arith.mulf %153, %152 : vector<8x16xf32>
    %155 = arith.addf %150, %154 : vector<8x16xf32>
    %156 = vector.extract_strided_slice %84 {offsets = [0, 2], sizes = [8, 1], strides = [1, 1]} : vector<8x3xf32> to vector<8x1xf32>
    %157 = vector.extract_strided_slice %146 {offsets = [0, 2], sizes = [8, 16], strides = [1, 1]} : vector<8x18xf32> to vector<8x16xf32>
    %158 = vector.broadcast %156 : vector<8x1xf32> to vector<8x16xf32>
    %159 = arith.mulf %158, %157 : vector<8x16xf32>
    %160 = arith.addf %155, %159 : vector<8x16xf32>
    %cst_50 = arith.constant 1.000000e-30 : f32
    %161 = vector.broadcast %cst_50 : f32 to vector<8x16xf32>
    %162 = arith.maximumf %160, %161 : vector<8x16xf32>
    %163 = math.log %162 : vector<8x16xf32>
    %164 = vector.broadcast %101 : vector<8x1xf32> to vector<8x16xf32>
    %165 = arith.mulf %164, %163 : vector<8x16xf32>
    %166 = math.exp %165 : vector<8x16xf32>
    %cst_51 = arith.constant dense<0.000000e+00> : vector<8xf32>
    %167 = vector.multi_reduction <add>, %166, %cst_51 [1] : vector<8x16xf32> to vector<8xf32>
    %168 = vector.shape_cast %167 : vector<8xf32> to vector<8x1xf32>
    %cst_52 = arith.constant 1.000000e-16 : f32
    %169 = vector.broadcast %cst_52 : f32 to vector<8x1xf32>
    %170 = arith.addf %168, %169 : vector<8x1xf32>
    %171 = tpu.reciprocal %170 {approx = true} : vector<8x1xf32> -> vector<8x1xf32>
    %172 = vector.broadcast %171 : vector<8x1xf32> to vector<8x16xf32>
    %173 = arith.mulf %166, %172 : vector<8x16xf32>
    %174 = vector.shape_cast %173 : vector<8x16xf32> to vector<8x16x1xf32>
    %175 = vector.shape_cast %107 : vector<8x8xf32> to vector<8x1x8xf32>
    %176 = vector.broadcast %174 : vector<8x16x1xf32> to vector<8x16x8xf32>
    %177 = vector.broadcast %175 : vector<8x1x8xf32> to vector<8x16x8xf32>
    %178 = arith.mulf %176, %177 : vector<8x16x8xf32>
    %cst_53 = arith.constant 1.000000e+00 : f32
    %179 = vector.broadcast %cst_53 : f32 to vector<8x16x8xf32>
    %180 = arith.subf %179, %178 : vector<8x16x8xf32>
    %181 = arith.mulf %7, %180 : vector<8x16x8xf32>
    %182 = vector.shape_cast %173 : vector<8x16xf32> to vector<8x16x1xf32>
    %183 = vector.shape_cast %108 : vector<8x8xf32> to vector<8x1x8xf32>
    %184 = vector.broadcast %182 : vector<8x16x1xf32> to vector<8x16x8xf32>
    %185 = vector.broadcast %183 : vector<8x1x8xf32> to vector<8x16x8xf32>
    %186 = arith.mulf %184, %185 : vector<8x16x8xf32>
    %187 = arith.addf %181, %186 : vector<8x16x8xf32>
    %188 = vector.extract_strided_slice %48 {offsets = [0, 0], sizes = [8, 14], strides = [1, 1]} : vector<8x28xf32> to vector<8x14xf32>
    %189 = vector.extract_strided_slice %188 {offsets = [0, 0], sizes = [8, 8], strides = [1, 1]} : vector<8x14xf32> to vector<8x8xf32>
    %190 = vector.extract_strided_slice %188 {offsets = [0, 8], sizes = [8, 1], strides = [1, 1]} : vector<8x14xf32> to vector<8x1xf32>
    %cst_54 = arith.constant 0.000000e+00 : f32
    %191 = vector.broadcast %cst_54 : f32 to vector<8x1xf32>
    %192 = arith.maximumf %190, %191 : vector<8x1xf32>
    %193 = vector.broadcast %cst_54 : f32 to vector<8x1xf32>
    %194 = arith.subf %190, %193 : vector<8x1xf32>
    %195 = arith.cmpf one, %194, %194 : vector<8x1xf32>
    %196 = vector.broadcast %cst_54 : f32 to vector<8x1xf32>
    %197 = arith.addf %190, %196 : vector<8x1xf32>
    %198 = math.absf %194 : vector<8x1xf32>
    %cst_55 = arith.constant 0.000000e+00 : f32
    %199 = vector.broadcast %cst_55 : f32 to vector<8x1xf32>
    %200 = arith.subf %199, %198 : vector<8x1xf32>
    %201 = math.exp %200 : vector<8x1xf32>
    %202 = math.log1p %201 : vector<8x1xf32>
    %203 = arith.addf %192, %202 : vector<8x1xf32>
    %204 = arith.select %195, %197, %203 : vector<8x1xi1>, vector<8x1xf32>
    %205 = vector.extract_strided_slice %188 {offsets = [0, 9], sizes = [8, 1], strides = [1, 1]} : vector<8x14xf32> to vector<8x1xf32>
    %206 = arith.negf %205 : vector<8x1xf32>
    %207 = math.exp %206 : vector<8x1xf32>
    %cst_56 = arith.constant 1.000000e+00 : f32
    %208 = vector.broadcast %cst_56 : f32 to vector<8x1xf32>
    %209 = arith.addf %208, %207 : vector<8x1xf32>
    %210 = arith.divf %208, %209 : vector<8x1xf32>
    %211 = vector.extract_strided_slice %188 {offsets = [0, 10], sizes = [8, 3], strides = [1, 1]} : vector<8x14xf32> to vector<8x3xf32>
    %cst_57 = arith.constant dense<0xFF800000> : vector<8xf32>
    %212 = vector.multi_reduction <maximumf>, %211, %cst_57 [1] : vector<8x3xf32> to vector<8xf32>
    %cst_58 = arith.constant 0xFF800000 : f32
    %213 = vector.broadcast %cst_58 : f32 to vector<8xf32>
    %214 = arith.maximumf %213, %212 : vector<8xf32>
    %215 = vector.shape_cast %214 : vector<8xf32> to vector<8x1xf32>
    %216 = vector.broadcast %215 : vector<8x1xf32> to vector<8x3xf32>
    %217 = arith.subf %211, %216 : vector<8x3xf32>
    %218 = math.exp %217 : vector<8x3xf32>
    %cst_59 = arith.constant dense<0.000000e+00> : vector<8xf32>
    %219 = vector.multi_reduction <add>, %218, %cst_59 [1] : vector<8x3xf32> to vector<8xf32>
    %220 = vector.shape_cast %219 : vector<8xf32> to vector<8x1xf32>
    %221 = vector.broadcast %220 : vector<8x1xf32> to vector<8x3xf32>
    %222 = arith.divf %218, %221 : vector<8x3xf32>
    %223 = vector.extract_strided_slice %188 {offsets = [0, 13], sizes = [8, 1], strides = [1, 1]} : vector<8x14xf32> to vector<8x1xf32>
    %cst_60 = arith.constant 0.000000e+00 : f32
    %224 = vector.broadcast %cst_60 : f32 to vector<8x1xf32>
    %225 = arith.maximumf %223, %224 : vector<8x1xf32>
    %226 = vector.broadcast %cst_60 : f32 to vector<8x1xf32>
    %227 = arith.subf %223, %226 : vector<8x1xf32>
    %228 = arith.cmpf one, %227, %227 : vector<8x1xf32>
    %229 = vector.broadcast %cst_60 : f32 to vector<8x1xf32>
    %230 = arith.addf %223, %229 : vector<8x1xf32>
    %231 = math.absf %227 : vector<8x1xf32>
    %cst_61 = arith.constant 0.000000e+00 : f32
    %232 = vector.broadcast %cst_61 : f32 to vector<8x1xf32>
    %233 = arith.subf %232, %231 : vector<8x1xf32>
    %234 = math.exp %233 : vector<8x1xf32>
    %235 = math.log1p %234 : vector<8x1xf32>
    %236 = arith.addf %225, %235 : vector<8x1xf32>
    %237 = arith.select %228, %230, %236 : vector<8x1xi1>, vector<8x1xf32>
    %cst_62 = arith.constant 1.000000e+00 : f32
    %238 = vector.broadcast %cst_62 : f32 to vector<8x1xf32>
    %239 = arith.addf %238, %237 : vector<8x1xf32>
    %240 = vector.extract_strided_slice %8 {offsets = [0, 0, 0], sizes = [1, 8, 16], strides = [1, 1, 1]} : vector<2x8x16xf32> to vector<1x8x16xf32>
    %241 = vector.shape_cast %240 : vector<1x8x16xf32> to vector<8x16xf32>
    %242 = vector.shape_cast %189 : vector<8x8xf32> to vector<8x1x8xf32>
    %243 = vector.broadcast %242 : vector<8x1x8xf32> to vector<8x16x8xf32>
    %244 = arith.mulf %187, %243 : vector<8x16x8xf32>
    %cst_63 = arith.constant dense<0.000000e+00> : vector<8x16xf32>
    %245 = vector.multi_reduction <add>, %244, %cst_63 [2] : vector<8x16x8xf32> to vector<8x16xf32>
    %246 = arith.mulf %187, %187 : vector<8x16x8xf32>
    %cst_64 = arith.constant dense<0.000000e+00> : vector<8x16xf32>
    %247 = vector.multi_reduction <add>, %246, %cst_64 [2] : vector<8x16x8xf32> to vector<8x16xf32>
    %248 = arith.mulf %189, %189 : vector<8x8xf32>
    %cst_65 = arith.constant dense<0.000000e+00> : vector<8xf32>
    %249 = vector.multi_reduction <add>, %248, %cst_65 [1] : vector<8x8xf32> to vector<8xf32>
    %250 = vector.shape_cast %249 : vector<8xf32> to vector<8x1xf32>
    %251 = vector.broadcast %250 : vector<8x1xf32> to vector<8x16xf32>
    %252 = arith.mulf %247, %251 : vector<8x16xf32>
    %cst_66 = arith.constant 1.000000e-16 : f32
    %253 = vector.broadcast %cst_66 : f32 to vector<8x16xf32>
    %254 = arith.maximumf %252, %253 : vector<8x16xf32>
    %255 = math.rsqrt %254 : vector<8x16xf32>
    %256 = arith.mulf %245, %255 : vector<8x16xf32>
    %257 = vector.broadcast %204 : vector<8x1xf32> to vector<8x16xf32>
    %258 = arith.mulf %257, %256 : vector<8x16xf32>
    %cst_67 = arith.constant dense<0xFF800000> : vector<8xf32>
    %259 = vector.multi_reduction <maximumf>, %258, %cst_67 [1] : vector<8x16xf32> to vector<8xf32>
    %cst_68 = arith.constant 0xFF800000 : f32
    %260 = vector.broadcast %cst_68 : f32 to vector<8xf32>
    %261 = arith.maximumf %260, %259 : vector<8xf32>
    %262 = vector.shape_cast %261 : vector<8xf32> to vector<8x1xf32>
    %263 = vector.broadcast %262 : vector<8x1xf32> to vector<8x16xf32>
    %264 = arith.subf %258, %263 : vector<8x16xf32>
    %265 = math.exp %264 : vector<8x16xf32>
    %cst_69 = arith.constant dense<0.000000e+00> : vector<8xf32>
    %266 = vector.multi_reduction <add>, %265, %cst_69 [1] : vector<8x16xf32> to vector<8xf32>
    %267 = vector.shape_cast %266 : vector<8xf32> to vector<8x1xf32>
    %268 = vector.broadcast %267 : vector<8x1xf32> to vector<8x16xf32>
    %269 = arith.divf %265, %268 : vector<8x16xf32>
    %cst_70 = arith.constant 1.000000e+00 : f32
    %270 = vector.broadcast %cst_70 : f32 to vector<8x1xf32>
    %271 = arith.subf %270, %210 : vector<8x1xf32>
    %272 = vector.broadcast %271 : vector<8x1xf32> to vector<8x16xf32>
    %273 = arith.mulf %272, %241 : vector<8x16xf32>
    %274 = arith.addf %269, %273 : vector<8x16xf32>
    %275 = vector.extract_strided_slice %274 {offsets = [0, 15], sizes = [8, 1], strides = [1, 1]} : vector<8x16xf32> to vector<8x1xf32>
    %276 = vector.extract_strided_slice %274 {offsets = [0, 0], sizes = [8, 1], strides = [1, 1]} : vector<8x16xf32> to vector<8x1xf32>
    %277 = tpu.concatenate %275, %274, %276 in 1 : vector<8x1xf32>, vector<8x16xf32>, vector<8x1xf32> -> vector<8x18xf32>
    %278 = vector.extract_strided_slice %222 {offsets = [0, 0], sizes = [8, 1], strides = [1, 1]} : vector<8x3xf32> to vector<8x1xf32>
    %279 = vector.extract_strided_slice %277 {offsets = [0, 0], sizes = [8, 16], strides = [1, 1]} : vector<8x18xf32> to vector<8x16xf32>
    %280 = vector.broadcast %278 : vector<8x1xf32> to vector<8x16xf32>
    %281 = arith.mulf %280, %279 : vector<8x16xf32>
    %282 = vector.extract_strided_slice %222 {offsets = [0, 1], sizes = [8, 1], strides = [1, 1]} : vector<8x3xf32> to vector<8x1xf32>
    %283 = vector.extract_strided_slice %277 {offsets = [0, 1], sizes = [8, 16], strides = [1, 1]} : vector<8x18xf32> to vector<8x16xf32>
    %284 = vector.broadcast %282 : vector<8x1xf32> to vector<8x16xf32>
    %285 = arith.mulf %284, %283 : vector<8x16xf32>
    %286 = arith.addf %281, %285 : vector<8x16xf32>
    %287 = vector.extract_strided_slice %222 {offsets = [0, 2], sizes = [8, 1], strides = [1, 1]} : vector<8x3xf32> to vector<8x1xf32>
    %288 = vector.extract_strided_slice %277 {offsets = [0, 2], sizes = [8, 16], strides = [1, 1]} : vector<8x18xf32> to vector<8x16xf32>
    %289 = vector.broadcast %287 : vector<8x1xf32> to vector<8x16xf32>
    %290 = arith.mulf %289, %288 : vector<8x16xf32>
    %291 = arith.addf %286, %290 : vector<8x16xf32>
    %cst_71 = arith.constant 1.000000e-30 : f32
    %292 = vector.broadcast %cst_71 : f32 to vector<8x16xf32>
    %293 = arith.maximumf %291, %292 : vector<8x16xf32>
    %294 = math.log %293 : vector<8x16xf32>
    %295 = vector.broadcast %239 : vector<8x1xf32> to vector<8x16xf32>
    %296 = arith.mulf %295, %294 : vector<8x16xf32>
    %297 = math.exp %296 : vector<8x16xf32>
    %cst_72 = arith.constant dense<0.000000e+00> : vector<8xf32>
    %298 = vector.multi_reduction <add>, %297, %cst_72 [1] : vector<8x16xf32> to vector<8xf32>
    %299 = vector.shape_cast %298 : vector<8xf32> to vector<8x1xf32>
    %cst_73 = arith.constant 1.000000e-16 : f32
    %300 = vector.broadcast %cst_73 : f32 to vector<8x1xf32>
    %301 = arith.addf %299, %300 : vector<8x1xf32>
    %302 = tpu.reciprocal %301 {approx = true} : vector<8x1xf32> -> vector<8x1xf32>
    %303 = vector.broadcast %302 : vector<8x1xf32> to vector<8x16xf32>
    %304 = arith.mulf %297, %303 : vector<8x16xf32>
    %305 = vector.shape_cast %304 : vector<8x16xf32> to vector<8x16x1xf32>
    %306 = vector.broadcast %305 : vector<8x16x1xf32> to vector<8x16x8xf32>
    %307 = arith.mulf %306, %187 : vector<8x16x8xf32>
    %cst_74 = arith.constant dense<0.000000e+00> : vector<8x8xf32>
    %308 = vector.multi_reduction <add>, %307, %cst_74 [1] : vector<8x16x8xf32> to vector<8x8xf32>
    %309 = vector.extract_strided_slice %49 {offsets = [0, 30], sizes = [8, 30], strides = [1, 1]} : vector<8x60xf32> to vector<8x30xf32>
    %310 = vector.extract_strided_slice %309 {offsets = [0, 0], sizes = [8, 8], strides = [1, 1]} : vector<8x30xf32> to vector<8x8xf32>
    %311 = vector.extract_strided_slice %309 {offsets = [0, 8], sizes = [8, 1], strides = [1, 1]} : vector<8x30xf32> to vector<8x1xf32>
    %cst_75 = arith.constant 0.000000e+00 : f32
    %312 = vector.broadcast %cst_75 : f32 to vector<8x1xf32>
    %313 = arith.maximumf %311, %312 : vector<8x1xf32>
    %314 = vector.broadcast %cst_75 : f32 to vector<8x1xf32>
    %315 = arith.subf %311, %314 : vector<8x1xf32>
    %316 = arith.cmpf one, %315, %315 : vector<8x1xf32>
    %317 = vector.broadcast %cst_75 : f32 to vector<8x1xf32>
    %318 = arith.addf %311, %317 : vector<8x1xf32>
    %319 = math.absf %315 : vector<8x1xf32>
    %cst_76 = arith.constant 0.000000e+00 : f32
    %320 = vector.broadcast %cst_76 : f32 to vector<8x1xf32>
    %321 = arith.subf %320, %319 : vector<8x1xf32>
    %322 = math.exp %321 : vector<8x1xf32>
    %323 = math.log1p %322 : vector<8x1xf32>
    %324 = arith.addf %313, %323 : vector<8x1xf32>
    %325 = arith.select %316, %318, %324 : vector<8x1xi1>, vector<8x1xf32>
    %326 = vector.extract_strided_slice %309 {offsets = [0, 9], sizes = [8, 1], strides = [1, 1]} : vector<8x30xf32> to vector<8x1xf32>
    %327 = arith.negf %326 : vector<8x1xf32>
    %328 = math.exp %327 : vector<8x1xf32>
    %cst_77 = arith.constant 1.000000e+00 : f32
    %329 = vector.broadcast %cst_77 : f32 to vector<8x1xf32>
    %330 = arith.addf %329, %328 : vector<8x1xf32>
    %331 = arith.divf %329, %330 : vector<8x1xf32>
    %332 = vector.extract_strided_slice %309 {offsets = [0, 10], sizes = [8, 3], strides = [1, 1]} : vector<8x30xf32> to vector<8x3xf32>
    %cst_78 = arith.constant dense<0xFF800000> : vector<8xf32>
    %333 = vector.multi_reduction <maximumf>, %332, %cst_78 [1] : vector<8x3xf32> to vector<8xf32>
    %cst_79 = arith.constant 0xFF800000 : f32
    %334 = vector.broadcast %cst_79 : f32 to vector<8xf32>
    %335 = arith.maximumf %334, %333 : vector<8xf32>
    %336 = vector.shape_cast %335 : vector<8xf32> to vector<8x1xf32>
    %337 = vector.broadcast %336 : vector<8x1xf32> to vector<8x3xf32>
    %338 = arith.subf %332, %337 : vector<8x3xf32>
    %339 = math.exp %338 : vector<8x3xf32>
    %cst_80 = arith.constant dense<0.000000e+00> : vector<8xf32>
    %340 = vector.multi_reduction <add>, %339, %cst_80 [1] : vector<8x3xf32> to vector<8xf32>
    %341 = vector.shape_cast %340 : vector<8xf32> to vector<8x1xf32>
    %342 = vector.broadcast %341 : vector<8x1xf32> to vector<8x3xf32>
    %343 = arith.divf %339, %342 : vector<8x3xf32>
    %344 = vector.extract_strided_slice %309 {offsets = [0, 13], sizes = [8, 1], strides = [1, 1]} : vector<8x30xf32> to vector<8x1xf32>
    %cst_81 = arith.constant 0.000000e+00 : f32
    %345 = vector.broadcast %cst_81 : f32 to vector<8x1xf32>
    %346 = arith.maximumf %344, %345 : vector<8x1xf32>
    %347 = vector.broadcast %cst_81 : f32 to vector<8x1xf32>
    %348 = arith.subf %344, %347 : vector<8x1xf32>
    %349 = arith.cmpf one, %348, %348 : vector<8x1xf32>
    %350 = vector.broadcast %cst_81 : f32 to vector<8x1xf32>
    %351 = arith.addf %344, %350 : vector<8x1xf32>
    %352 = math.absf %348 : vector<8x1xf32>
    %cst_82 = arith.constant 0.000000e+00 : f32
    %353 = vector.broadcast %cst_82 : f32 to vector<8x1xf32>
    %354 = arith.subf %353, %352 : vector<8x1xf32>
    %355 = math.exp %354 : vector<8x1xf32>
    %356 = math.log1p %355 : vector<8x1xf32>
    %357 = arith.addf %346, %356 : vector<8x1xf32>
    %358 = arith.select %349, %351, %357 : vector<8x1xi1>, vector<8x1xf32>
    %cst_83 = arith.constant 1.000000e+00 : f32
    %359 = vector.broadcast %cst_83 : f32 to vector<8x1xf32>
    %360 = arith.addf %359, %358 : vector<8x1xf32>
    %361 = vector.extract_strided_slice %309 {offsets = [0, 14], sizes = [8, 8], strides = [1, 1]} : vector<8x30xf32> to vector<8x8xf32>
    %362 = arith.negf %361 : vector<8x8xf32>
    %363 = math.exp %362 : vector<8x8xf32>
    %cst_84 = arith.constant 1.000000e+00 : f32
    %364 = vector.broadcast %cst_84 : f32 to vector<8x8xf32>
    %365 = arith.addf %364, %363 : vector<8x8xf32>
    %366 = arith.divf %364, %365 : vector<8x8xf32>
    %367 = vector.extract_strided_slice %309 {offsets = [0, 22], sizes = [8, 8], strides = [1, 1]} : vector<8x30xf32> to vector<8x8xf32>
    %368 = vector.extract_strided_slice %9 {offsets = [1, 0, 0], sizes = [1, 8, 16], strides = [1, 1, 1]} : vector<2x8x16xf32> to vector<1x8x16xf32>
    %369 = vector.shape_cast %368 : vector<1x8x16xf32> to vector<8x16xf32>
    %370 = vector.shape_cast %310 : vector<8x8xf32> to vector<8x1x8xf32>
    %371 = vector.broadcast %370 : vector<8x1x8xf32> to vector<8x16x8xf32>
    %372 = arith.mulf %187, %371 : vector<8x16x8xf32>
    %cst_85 = arith.constant dense<0.000000e+00> : vector<8x16xf32>
    %373 = vector.multi_reduction <add>, %372, %cst_85 [2] : vector<8x16x8xf32> to vector<8x16xf32>
    %374 = arith.mulf %187, %187 : vector<8x16x8xf32>
    %cst_86 = arith.constant dense<0.000000e+00> : vector<8x16xf32>
    %375 = vector.multi_reduction <add>, %374, %cst_86 [2] : vector<8x16x8xf32> to vector<8x16xf32>
    %376 = arith.mulf %310, %310 : vector<8x8xf32>
    %cst_87 = arith.constant dense<0.000000e+00> : vector<8xf32>
    %377 = vector.multi_reduction <add>, %376, %cst_87 [1] : vector<8x8xf32> to vector<8xf32>
    %378 = vector.shape_cast %377 : vector<8xf32> to vector<8x1xf32>
    %379 = vector.broadcast %378 : vector<8x1xf32> to vector<8x16xf32>
    %380 = arith.mulf %375, %379 : vector<8x16xf32>
    %cst_88 = arith.constant 1.000000e-16 : f32
    %381 = vector.broadcast %cst_88 : f32 to vector<8x16xf32>
    %382 = arith.maximumf %380, %381 : vector<8x16xf32>
    %383 = math.rsqrt %382 : vector<8x16xf32>
    %384 = arith.mulf %373, %383 : vector<8x16xf32>
    %385 = vector.broadcast %325 : vector<8x1xf32> to vector<8x16xf32>
    %386 = arith.mulf %385, %384 : vector<8x16xf32>
    %cst_89 = arith.constant dense<0xFF800000> : vector<8xf32>
    %387 = vector.multi_reduction <maximumf>, %386, %cst_89 [1] : vector<8x16xf32> to vector<8xf32>
    %cst_90 = arith.constant 0xFF800000 : f32
    %388 = vector.broadcast %cst_90 : f32 to vector<8xf32>
    %389 = arith.maximumf %388, %387 : vector<8xf32>
    %390 = vector.shape_cast %389 : vector<8xf32> to vector<8x1xf32>
    %391 = vector.broadcast %390 : vector<8x1xf32> to vector<8x16xf32>
    %392 = arith.subf %386, %391 : vector<8x16xf32>
    %393 = math.exp %392 : vector<8x16xf32>
    %cst_91 = arith.constant dense<0.000000e+00> : vector<8xf32>
    %394 = vector.multi_reduction <add>, %393, %cst_91 [1] : vector<8x16xf32> to vector<8xf32>
    %395 = vector.shape_cast %394 : vector<8xf32> to vector<8x1xf32>
    %396 = vector.broadcast %395 : vector<8x1xf32> to vector<8x16xf32>
    %397 = arith.divf %393, %396 : vector<8x16xf32>
    %cst_92 = arith.constant 1.000000e+00 : f32
    %398 = vector.broadcast %cst_92 : f32 to vector<8x1xf32>
    %399 = arith.subf %398, %331 : vector<8x1xf32>
    %400 = vector.broadcast %399 : vector<8x1xf32> to vector<8x16xf32>
    %401 = arith.mulf %400, %369 : vector<8x16xf32>
    %402 = arith.addf %397, %401 : vector<8x16xf32>
    %403 = vector.extract_strided_slice %402 {offsets = [0, 15], sizes = [8, 1], strides = [1, 1]} : vector<8x16xf32> to vector<8x1xf32>
    %404 = vector.extract_strided_slice %402 {offsets = [0, 0], sizes = [8, 1], strides = [1, 1]} : vector<8x16xf32> to vector<8x1xf32>
    %405 = tpu.concatenate %403, %402, %404 in 1 : vector<8x1xf32>, vector<8x16xf32>, vector<8x1xf32> -> vector<8x18xf32>
    %406 = vector.extract_strided_slice %343 {offsets = [0, 0], sizes = [8, 1], strides = [1, 1]} : vector<8x3xf32> to vector<8x1xf32>
    %407 = vector.extract_strided_slice %405 {offsets = [0, 0], sizes = [8, 16], strides = [1, 1]} : vector<8x18xf32> to vector<8x16xf32>
    %408 = vector.broadcast %406 : vector<8x1xf32> to vector<8x16xf32>
    %409 = arith.mulf %408, %407 : vector<8x16xf32>
    %410 = vector.extract_strided_slice %343 {offsets = [0, 1], sizes = [8, 1], strides = [1, 1]} : vector<8x3xf32> to vector<8x1xf32>
    %411 = vector.extract_strided_slice %405 {offsets = [0, 1], sizes = [8, 16], strides = [1, 1]} : vector<8x18xf32> to vector<8x16xf32>
    %412 = vector.broadcast %410 : vector<8x1xf32> to vector<8x16xf32>
    %413 = arith.mulf %412, %411 : vector<8x16xf32>
    %414 = arith.addf %409, %413 : vector<8x16xf32>
    %415 = vector.extract_strided_slice %343 {offsets = [0, 2], sizes = [8, 1], strides = [1, 1]} : vector<8x3xf32> to vector<8x1xf32>
    %416 = vector.extract_strided_slice %405 {offsets = [0, 2], sizes = [8, 16], strides = [1, 1]} : vector<8x18xf32> to vector<8x16xf32>
    %417 = vector.broadcast %415 : vector<8x1xf32> to vector<8x16xf32>
    %418 = arith.mulf %417, %416 : vector<8x16xf32>
    %419 = arith.addf %414, %418 : vector<8x16xf32>
    %cst_93 = arith.constant 1.000000e-30 : f32
    %420 = vector.broadcast %cst_93 : f32 to vector<8x16xf32>
    %421 = arith.maximumf %419, %420 : vector<8x16xf32>
    %422 = math.log %421 : vector<8x16xf32>
    %423 = vector.broadcast %360 : vector<8x1xf32> to vector<8x16xf32>
    %424 = arith.mulf %423, %422 : vector<8x16xf32>
    %425 = math.exp %424 : vector<8x16xf32>
    %cst_94 = arith.constant dense<0.000000e+00> : vector<8xf32>
    %426 = vector.multi_reduction <add>, %425, %cst_94 [1] : vector<8x16xf32> to vector<8xf32>
    %427 = vector.shape_cast %426 : vector<8xf32> to vector<8x1xf32>
    %cst_95 = arith.constant 1.000000e-16 : f32
    %428 = vector.broadcast %cst_95 : f32 to vector<8x1xf32>
    %429 = arith.addf %427, %428 : vector<8x1xf32>
    %430 = tpu.reciprocal %429 {approx = true} : vector<8x1xf32> -> vector<8x1xf32>
    %431 = vector.broadcast %430 : vector<8x1xf32> to vector<8x16xf32>
    %432 = arith.mulf %425, %431 : vector<8x16xf32>
    %433 = vector.shape_cast %432 : vector<8x16xf32> to vector<8x16x1xf32>
    %434 = vector.shape_cast %366 : vector<8x8xf32> to vector<8x1x8xf32>
    %435 = vector.broadcast %433 : vector<8x16x1xf32> to vector<8x16x8xf32>
    %436 = vector.broadcast %434 : vector<8x1x8xf32> to vector<8x16x8xf32>
    %437 = arith.mulf %435, %436 : vector<8x16x8xf32>
    %cst_96 = arith.constant 1.000000e+00 : f32
    %438 = vector.broadcast %cst_96 : f32 to vector<8x16x8xf32>
    %439 = arith.subf %438, %437 : vector<8x16x8xf32>
    %440 = arith.mulf %187, %439 : vector<8x16x8xf32>
    %441 = vector.shape_cast %432 : vector<8x16xf32> to vector<8x16x1xf32>
    %442 = vector.shape_cast %367 : vector<8x8xf32> to vector<8x1x8xf32>
    %443 = vector.broadcast %441 : vector<8x16x1xf32> to vector<8x16x8xf32>
    %444 = vector.broadcast %442 : vector<8x1x8xf32> to vector<8x16x8xf32>
    %445 = arith.mulf %443, %444 : vector<8x16x8xf32>
    %446 = arith.addf %440, %445 : vector<8x16x8xf32>
    %447 = vector.extract_strided_slice %48 {offsets = [0, 14], sizes = [8, 14], strides = [1, 1]} : vector<8x28xf32> to vector<8x14xf32>
    %448 = vector.extract_strided_slice %447 {offsets = [0, 0], sizes = [8, 8], strides = [1, 1]} : vector<8x14xf32> to vector<8x8xf32>
    %449 = vector.extract_strided_slice %447 {offsets = [0, 8], sizes = [8, 1], strides = [1, 1]} : vector<8x14xf32> to vector<8x1xf32>
    %cst_97 = arith.constant 0.000000e+00 : f32
    %450 = vector.broadcast %cst_97 : f32 to vector<8x1xf32>
    %451 = arith.maximumf %449, %450 : vector<8x1xf32>
    %452 = vector.broadcast %cst_97 : f32 to vector<8x1xf32>
    %453 = arith.subf %449, %452 : vector<8x1xf32>
    %454 = arith.cmpf one, %453, %453 : vector<8x1xf32>
    %455 = vector.broadcast %cst_97 : f32 to vector<8x1xf32>
    %456 = arith.addf %449, %455 : vector<8x1xf32>
    %457 = math.absf %453 : vector<8x1xf32>
    %cst_98 = arith.constant 0.000000e+00 : f32
    %458 = vector.broadcast %cst_98 : f32 to vector<8x1xf32>
    %459 = arith.subf %458, %457 : vector<8x1xf32>
    %460 = math.exp %459 : vector<8x1xf32>
    %461 = math.log1p %460 : vector<8x1xf32>
    %462 = arith.addf %451, %461 : vector<8x1xf32>
    %463 = arith.select %454, %456, %462 : vector<8x1xi1>, vector<8x1xf32>
    %464 = vector.extract_strided_slice %447 {offsets = [0, 9], sizes = [8, 1], strides = [1, 1]} : vector<8x14xf32> to vector<8x1xf32>
    %465 = arith.negf %464 : vector<8x1xf32>
    %466 = math.exp %465 : vector<8x1xf32>
    %cst_99 = arith.constant 1.000000e+00 : f32
    %467 = vector.broadcast %cst_99 : f32 to vector<8x1xf32>
    %468 = arith.addf %467, %466 : vector<8x1xf32>
    %469 = arith.divf %467, %468 : vector<8x1xf32>
    %470 = vector.extract_strided_slice %447 {offsets = [0, 10], sizes = [8, 3], strides = [1, 1]} : vector<8x14xf32> to vector<8x3xf32>
    %cst_100 = arith.constant dense<0xFF800000> : vector<8xf32>
    %471 = vector.multi_reduction <maximumf>, %470, %cst_100 [1] : vector<8x3xf32> to vector<8xf32>
    %cst_101 = arith.constant 0xFF800000 : f32
    %472 = vector.broadcast %cst_101 : f32 to vector<8xf32>
    %473 = arith.maximumf %472, %471 : vector<8xf32>
    %474 = vector.shape_cast %473 : vector<8xf32> to vector<8x1xf32>
    %475 = vector.broadcast %474 : vector<8x1xf32> to vector<8x3xf32>
    %476 = arith.subf %470, %475 : vector<8x3xf32>
    %477 = math.exp %476 : vector<8x3xf32>
    %cst_102 = arith.constant dense<0.000000e+00> : vector<8xf32>
    %478 = vector.multi_reduction <add>, %477, %cst_102 [1] : vector<8x3xf32> to vector<8xf32>
    %479 = vector.shape_cast %478 : vector<8xf32> to vector<8x1xf32>
    %480 = vector.broadcast %479 : vector<8x1xf32> to vector<8x3xf32>
    %481 = arith.divf %477, %480 : vector<8x3xf32>
    %482 = vector.extract_strided_slice %447 {offsets = [0, 13], sizes = [8, 1], strides = [1, 1]} : vector<8x14xf32> to vector<8x1xf32>
    %cst_103 = arith.constant 0.000000e+00 : f32
    %483 = vector.broadcast %cst_103 : f32 to vector<8x1xf32>
    %484 = arith.maximumf %482, %483 : vector<8x1xf32>
    %485 = vector.broadcast %cst_103 : f32 to vector<8x1xf32>
    %486 = arith.subf %482, %485 : vector<8x1xf32>
    %487 = arith.cmpf one, %486, %486 : vector<8x1xf32>
    %488 = vector.broadcast %cst_103 : f32 to vector<8x1xf32>
    %489 = arith.addf %482, %488 : vector<8x1xf32>
    %490 = math.absf %486 : vector<8x1xf32>
    %cst_104 = arith.constant 0.000000e+00 : f32
    %491 = vector.broadcast %cst_104 : f32 to vector<8x1xf32>
    %492 = arith.subf %491, %490 : vector<8x1xf32>
    %493 = math.exp %492 : vector<8x1xf32>
    %494 = math.log1p %493 : vector<8x1xf32>
    %495 = arith.addf %484, %494 : vector<8x1xf32>
    %496 = arith.select %487, %489, %495 : vector<8x1xi1>, vector<8x1xf32>
    %cst_105 = arith.constant 1.000000e+00 : f32
    %497 = vector.broadcast %cst_105 : f32 to vector<8x1xf32>
    %498 = arith.addf %497, %496 : vector<8x1xf32>
    %499 = vector.extract_strided_slice %8 {offsets = [1, 0, 0], sizes = [1, 8, 16], strides = [1, 1, 1]} : vector<2x8x16xf32> to vector<1x8x16xf32>
    %500 = vector.shape_cast %499 : vector<1x8x16xf32> to vector<8x16xf32>
    %501 = vector.shape_cast %448 : vector<8x8xf32> to vector<8x1x8xf32>
    %502 = vector.broadcast %501 : vector<8x1x8xf32> to vector<8x16x8xf32>
    %503 = arith.mulf %446, %502 : vector<8x16x8xf32>
    %cst_106 = arith.constant dense<0.000000e+00> : vector<8x16xf32>
    %504 = vector.multi_reduction <add>, %503, %cst_106 [2] : vector<8x16x8xf32> to vector<8x16xf32>
    %505 = arith.mulf %446, %446 : vector<8x16x8xf32>
    %cst_107 = arith.constant dense<0.000000e+00> : vector<8x16xf32>
    %506 = vector.multi_reduction <add>, %505, %cst_107 [2] : vector<8x16x8xf32> to vector<8x16xf32>
    %507 = arith.mulf %448, %448 : vector<8x8xf32>
    %cst_108 = arith.constant dense<0.000000e+00> : vector<8xf32>
    %508 = vector.multi_reduction <add>, %507, %cst_108 [1] : vector<8x8xf32> to vector<8xf32>
    %509 = vector.shape_cast %508 : vector<8xf32> to vector<8x1xf32>
    %510 = vector.broadcast %509 : vector<8x1xf32> to vector<8x16xf32>
    %511 = arith.mulf %506, %510 : vector<8x16xf32>
    %cst_109 = arith.constant 1.000000e-16 : f32
    %512 = vector.broadcast %cst_109 : f32 to vector<8x16xf32>
    %513 = arith.maximumf %511, %512 : vector<8x16xf32>
    %514 = math.rsqrt %513 : vector<8x16xf32>
    %515 = arith.mulf %504, %514 : vector<8x16xf32>
    %516 = vector.broadcast %463 : vector<8x1xf32> to vector<8x16xf32>
    %517 = arith.mulf %516, %515 : vector<8x16xf32>
    %cst_110 = arith.constant dense<0xFF800000> : vector<8xf32>
    %518 = vector.multi_reduction <maximumf>, %517, %cst_110 [1] : vector<8x16xf32> to vector<8xf32>
    %cst_111 = arith.constant 0xFF800000 : f32
    %519 = vector.broadcast %cst_111 : f32 to vector<8xf32>
    %520 = arith.maximumf %519, %518 : vector<8xf32>
    %521 = vector.shape_cast %520 : vector<8xf32> to vector<8x1xf32>
    %522 = vector.broadcast %521 : vector<8x1xf32> to vector<8x16xf32>
    %523 = arith.subf %517, %522 : vector<8x16xf32>
    %524 = math.exp %523 : vector<8x16xf32>
    %cst_112 = arith.constant dense<0.000000e+00> : vector<8xf32>
    %525 = vector.multi_reduction <add>, %524, %cst_112 [1] : vector<8x16xf32> to vector<8xf32>
    %526 = vector.shape_cast %525 : vector<8xf32> to vector<8x1xf32>
    %527 = vector.broadcast %526 : vector<8x1xf32> to vector<8x16xf32>
    %528 = arith.divf %524, %527 : vector<8x16xf32>
    %cst_113 = arith.constant 1.000000e+00 : f32
    %529 = vector.broadcast %cst_113 : f32 to vector<8x1xf32>
    %530 = arith.subf %529, %469 : vector<8x1xf32>
    %531 = vector.broadcast %530 : vector<8x1xf32> to vector<8x16xf32>
    %532 = arith.mulf %531, %500 : vector<8x16xf32>
    %533 = arith.addf %528, %532 : vector<8x16xf32>
    %534 = vector.extract_strided_slice %533 {offsets = [0, 15], sizes = [8, 1], strides = [1, 1]} : vector<8x16xf32> to vector<8x1xf32>
    %535 = vector.extract_strided_slice %533 {offsets = [0, 0], sizes = [8, 1], strides = [1, 1]} : vector<8x16xf32> to vector<8x1xf32>
    %536 = tpu.concatenate %534, %533, %535 in 1 : vector<8x1xf32>, vector<8x16xf32>, vector<8x1xf32> -> vector<8x18xf32>
    %537 = vector.extract_strided_slice %481 {offsets = [0, 0], sizes = [8, 1], strides = [1, 1]} : vector<8x3xf32> to vector<8x1xf32>
    %538 = vector.extract_strided_slice %536 {offsets = [0, 0], sizes = [8, 16], strides = [1, 1]} : vector<8x18xf32> to vector<8x16xf32>
    %539 = vector.broadcast %537 : vector<8x1xf32> to vector<8x16xf32>
    %540 = arith.mulf %539, %538 : vector<8x16xf32>
    %541 = vector.extract_strided_slice %481 {offsets = [0, 1], sizes = [8, 1], strides = [1, 1]} : vector<8x3xf32> to vector<8x1xf32>
    %542 = vector.extract_strided_slice %536 {offsets = [0, 1], sizes = [8, 16], strides = [1, 1]} : vector<8x18xf32> to vector<8x16xf32>
    %543 = vector.broadcast %541 : vector<8x1xf32> to vector<8x16xf32>
    %544 = arith.mulf %543, %542 : vector<8x16xf32>
    %545 = arith.addf %540, %544 : vector<8x16xf32>
    %546 = vector.extract_strided_slice %481 {offsets = [0, 2], sizes = [8, 1], strides = [1, 1]} : vector<8x3xf32> to vector<8x1xf32>
    %547 = vector.extract_strided_slice %536 {offsets = [0, 2], sizes = [8, 16], strides = [1, 1]} : vector<8x18xf32> to vector<8x16xf32>
    %548 = vector.broadcast %546 : vector<8x1xf32> to vector<8x16xf32>
    %549 = arith.mulf %548, %547 : vector<8x16xf32>
    %550 = arith.addf %545, %549 : vector<8x16xf32>
    %cst_114 = arith.constant 1.000000e-30 : f32
    %551 = vector.broadcast %cst_114 : f32 to vector<8x16xf32>
    %552 = arith.maximumf %550, %551 : vector<8x16xf32>
    %553 = math.log %552 : vector<8x16xf32>
    %554 = vector.broadcast %498 : vector<8x1xf32> to vector<8x16xf32>
    %555 = arith.mulf %554, %553 : vector<8x16xf32>
    %556 = math.exp %555 : vector<8x16xf32>
    %cst_115 = arith.constant dense<0.000000e+00> : vector<8xf32>
    %557 = vector.multi_reduction <add>, %556, %cst_115 [1] : vector<8x16xf32> to vector<8xf32>
    %558 = vector.shape_cast %557 : vector<8xf32> to vector<8x1xf32>
    %cst_116 = arith.constant 1.000000e-16 : f32
    %559 = vector.broadcast %cst_116 : f32 to vector<8x1xf32>
    %560 = arith.addf %558, %559 : vector<8x1xf32>
    %561 = tpu.reciprocal %560 {approx = true} : vector<8x1xf32> -> vector<8x1xf32>
    %562 = vector.broadcast %561 : vector<8x1xf32> to vector<8x16xf32>
    %563 = arith.mulf %556, %562 : vector<8x16xf32>
    %564 = vector.shape_cast %563 : vector<8x16xf32> to vector<8x16x1xf32>
    %565 = vector.broadcast %564 : vector<8x16x1xf32> to vector<8x16x8xf32>
    %566 = arith.mulf %565, %446 : vector<8x16x8xf32>
    %cst_117 = arith.constant dense<0.000000e+00> : vector<8x8xf32>
    %567 = vector.multi_reduction <add>, %566, %cst_117 [1] : vector<8x16x8xf32> to vector<8x8xf32>
    %568 = tpu.concatenate %308, %567, %44 in 1 : vector<8x8xf32>, vector<8x8xf32>, vector<8x32xf32> -> vector<8x48xf32>
    %cst_118 = arith.constant dense<0.000000e+00> : vector<8x128xf32>
    %569 = tpu.matmul %568, %14, %cst_118 {dimension_numbers = #tpu.dot_dimension_numbers<[1], [0], [0], [1], [0, 0, 1, 1], [], []>} : vector<8x48xf32>, vector<48x128xf32>, vector<8x128xf32> -> vector<8x128xf32>
    %570 = vector.broadcast %15 : vector<1x128xf32> to vector<8x128xf32>
    %571 = arith.addf %569, %570 : vector<8x128xf32>
    %572 = vector.shape_cast %304 : vector<8x16xf32> to vector<1x8x16xf32>
    %573 = vector.shape_cast %563 : vector<8x16xf32> to vector<1x8x16xf32>
    %574 = tpu.concatenate %572, %573 in 0 : vector<1x8x16xf32>, vector<1x8x16xf32> -> vector<2x8x16xf32>
    %575 = vector.shape_cast %173 : vector<8x16xf32> to vector<1x8x16xf32>
    %576 = vector.shape_cast %432 : vector<8x16xf32> to vector<1x8x16xf32>
    %577 = tpu.concatenate %575, %576 in 0 : vector<1x8x16xf32>, vector<1x8x16xf32> -> vector<2x8x16xf32>
    %c0_119 = arith.constant 0 : index
    %c0_120 = arith.constant 0 : index
    %c0_121 = arith.constant 0 : index
    %578 = vector.load %arg11[%c0_119, %c0_120, %c0_121] : memref<1x8x128xf32, #tpu.memory_space<vmem>>, vector<1x8x128xf32>
    %579 = vector.shape_cast %578 : vector<1x8x128xf32> to vector<8x128xf32>
    %580 = vector.shape_cast %571 : vector<8x128xf32> to vector<1x8x128xf32>
    tpu.vector_store %arg11[%c0_119, %c0_120, %c0_121], %580 {strides = array<i32>} : memref<1x8x128xf32, #tpu.memory_space<vmem>>, vector<1x8x128xf32>,
    %c0_122 = arith.constant 0 : index
    %c0_123 = arith.constant 0 : index
    %581 = vector.load %arg13[%c0_122, %c0_123] : memref<8x32xf32, #tpu.memory_space<vmem>>, vector<8x32xf32>
    tpu.vector_store %arg13[%c0_122, %c0_123], %44 {strides = array<i32>} : memref<8x32xf32, #tpu.memory_space<vmem>>, vector<8x32xf32>,
    %c0_124 = arith.constant 0 : index
    %c0_125 = arith.constant 0 : index
    %582 = vector.load %arg14[%c0_124, %c0_125] : memref<8x32xf32, #tpu.memory_space<vmem>>, vector<8x32xf32>
    tpu.vector_store %arg14[%c0_124, %c0_125], %42 {strides = array<i32>} : memref<8x32xf32, #tpu.memory_space<vmem>>, vector<8x32xf32>,
    %c0_126 = arith.constant 0 : index
    %c0_127 = arith.constant 0 : index
    %c0_128 = arith.constant 0 : index
    %583 = vector.load %arg12[%c0_126, %c0_127, %c0_128] : memref<8x16x8xf32, #tpu.memory_space<vmem>>, vector<8x16x8xf32>
    tpu.vector_store %arg12[%c0_126, %c0_127, %c0_128], %446 {strides = array<i32>} : memref<8x16x8xf32, #tpu.memory_space<vmem>>, vector<8x16x8xf32>,
    %c0_129 = arith.constant 0 : index
    %c0_130 = arith.constant 0 : index
    %c0_131 = arith.constant 0 : index
    %584 = vector.load %arg15[%c0_129, %c0_130, %c0_131] : memref<2x8x16xf32, #tpu.memory_space<vmem>>, vector<2x8x16xf32>
    tpu.vector_store %arg15[%c0_129, %c0_130, %c0_131], %574 {strides = array<i32>} : memref<2x8x16xf32, #tpu.memory_space<vmem>>, vector<2x8x16xf32>,
    %c0_132 = arith.constant 0 : index
    %c0_133 = arith.constant 0 : index
    %c0_134 = arith.constant 0 : index
    %585 = vector.load %arg16[%c0_132, %c0_133, %c0_134] : memref<2x8x16xf32, #tpu.memory_space<vmem>>, vector<2x8x16xf32>
    tpu.vector_store %arg16[%c0_132, %c0_133, %c0_134], %577 {strides = array<i32>} : memref<2x8x16xf32, #tpu.memory_space<vmem>>, vector<2x8x16xf32>,
    return
  }
  func.func @transform_0(%arg0: i32) -> (i32, i32, i32) {
    %c0_i32 = arith.constant 0 : i32
    %c0_i32_0 = arith.constant 0 : i32
    %c0_i32_1 = arith.constant 0 : i32
    return %arg0, %c0_i32, %c0_i32_0 : i32, i32, i32
  }
  func.func @transform_1(%arg0: i32) -> (i32, i32) {
    %c0_i32 = arith.constant 0 : i32
    %c0_i32_0 = arith.constant 0 : i32
    %c0_i32_1 = arith.constant 0 : i32
    return %c0_i32, %c0_i32_0 : i32, i32
  }
  func.func @transform_2(%arg0: i32) -> (i32, i32) {
    %c0_i32 = arith.constant 0 : i32
    %c0_i32_0 = arith.constant 0 : i32
    %c0_i32_1 = arith.constant 0 : i32
    return %c0_i32, %c0_i32_0 : i32, i32
  }
  func.func @transform_3(%arg0: i32) -> (i32, i32) {
    %c0_i32 = arith.constant 0 : i32
    %c0_i32_0 = arith.constant 0 : i32
    %c0_i32_1 = arith.constant 0 : i32
    return %c0_i32, %c0_i32_0 : i32, i32
  }
  func.func @transform_4(%arg0: i32) -> (i32, i32) {
    %c0_i32 = arith.constant 0 : i32
    %c0_i32_0 = arith.constant 0 : i32
    %c0_i32_1 = arith.constant 0 : i32
    return %c0_i32, %c0_i32_0 : i32, i32
  }
  func.func @transform_5(%arg0: i32) -> (i32, i32, i32) {
    %c0_i32 = arith.constant 0 : i32
    %c0_i32_0 = arith.constant 0 : i32
    %c0_i32_1 = arith.constant 0 : i32
    %c0_i32_2 = arith.constant 0 : i32
    return %c0_i32, %c0_i32_0, %c0_i32_1 : i32, i32, i32
  }
  func.func @transform_6(%arg0: i32) -> (i32, i32) {
    %c0_i32 = arith.constant 0 : i32
    %c0_i32_0 = arith.constant 0 : i32
    %c0_i32_1 = arith.constant 0 : i32
    return %c0_i32, %c0_i32_0 : i32, i32
  }
  func.func @transform_7(%arg0: i32) -> (i32, i32) {
    %c0_i32 = arith.constant 0 : i32
    %c0_i32_0 = arith.constant 0 : i32
    %c0_i32_1 = arith.constant 0 : i32
    return %c0_i32, %c0_i32_0 : i32, i32
  }
  func.func @transform_8(%arg0: i32) -> (i32, i32) {
    %c0_i32 = arith.constant 0 : i32
    %c0_i32_0 = arith.constant 0 : i32
    %c0_i32_1 = arith.constant 0 : i32
    return %c0_i32, %c0_i32_0 : i32, i32
  }
  func.func @transform_9(%arg0: i32) -> (i32, i32) {
    %c0_i32 = arith.constant 0 : i32
    %c0_i32_0 = arith.constant 0 : i32
    %c0_i32_1 = arith.constant 0 : i32
    return %c0_i32, %c0_i32_0 : i32, i32
  }
  func.func @transform_10(%arg0: i32) -> (i32, i32, i32) {
    %c0_i32 = arith.constant 0 : i32
    %c0_i32_0 = arith.constant 0 : i32
    %c0_i32_1 = arith.constant 0 : i32
    return %arg0, %c0_i32, %c0_i32_0 : i32, i32, i32
  }
  func.func @transform_11(%arg0: i32) -> (i32, i32, i32) {
    %c0_i32 = arith.constant 0 : i32
    %c0_i32_0 = arith.constant 0 : i32
    %c0_i32_1 = arith.constant 0 : i32
    %c0_i32_2 = arith.constant 0 : i32
    return %c0_i32, %c0_i32_0, %c0_i32_1 : i32, i32, i32
  }
  func.func @transform_12(%arg0: i32) -> (i32, i32) {
    %c0_i32 = arith.constant 0 : i32
    %c0_i32_0 = arith.constant 0 : i32
    %c0_i32_1 = arith.constant 0 : i32
    return %c0_i32, %c0_i32_0 : i32, i32
  }
  func.func @transform_13(%arg0: i32) -> (i32, i32) {
    %c0_i32 = arith.constant 0 : i32
    %c0_i32_0 = arith.constant 0 : i32
    %c0_i32_1 = arith.constant 0 : i32
    return %c0_i32, %c0_i32_0 : i32, i32
  }
}

</mosaic_0001>

<bundles_post_ra>
// kernel: tpu_custom_call.1
= control target key start
LH: loop header
LB: loop body
LE: loop exit
PB: predicated region body
PF: predicated region fallthrough
CT: control target
= control target key end

     0   :  { %s6774_s0 = inlined_call_operand.vmem [shape: f32[8,8,8], index: 0, kind: input, shape index: {}]   ;;  %s6775_s1 = inlined_call_operand.vmem [shape: f32[8,32], index: 1, kind: input, shape index: {}]   ;;  %s6776_s2 = inlined_call_operand.hbm [shape: f32[8,32], index: 2, kind: input, shape index: {}]   ;;  %s6777_s3 = inlined_call_operand.vmem [shape: f32[40,128], index: 3, kind: input, shape index: {}]   ;;  %s6778_s4 = inlined_call_operand.vmem [shape: f32[1,128], index: 4, kind: input, shape index: {}]   ;;  %s6779_s5 = inlined_call_operand.vmem [shape: f32[8,16,8], index: 5, kind: input, shape index: {}]   ;;  %s6780_s6 = inlined_call_operand.vmem [shape: f32[32,88], index: 6, kind: input, shape index: {}]   ;;  %s6781_s7 = inlined_call_operand.vmem [shape: f32[1,88], index: 7, kind: input, shape index: {}]   ;;  %s6782_s8 = inlined_call_operand.vmem [shape: f32[48,128], index: 8, kind: input, shape index: {}]   ;;  %s6783_s9 = inlined_call_operand.vmem [shape: f32[1,128], index: 9, kind: input, shape index: {}]   ;;  %s6784_s10 = inlined_call_operand.hbm [shape: f32[8,8,128], index: 10, kind: output, shape index: {0}]   ;;  %s6785_s11 = inlined_call_operand.vmem [shape: f32[8,16,8], index: 11, kind: output, shape index: {1}]   ;;  %s6786_s12 = inlined_call_operand.hbm [shape: f32[8,32], index: 12, kind: output, shape index: {2}]   ;;  %s6787_s13 = inlined_call_operand.hbm [shape: f32[8,32], index: 13, kind: output, shape index: {3}]  }
   0x1   :  { %6869 = sst [smem:[#allocation75_spill]] %s6774_s0 }
   0x2   :  { %19 = vsyncpa [#allocation5], 0 }
   0x3   :  { %20 = vsyncpa [#allocation6], 0 }
   0x4   :  { %22 = vsyncpa [#allocation6 + $0x1], 0 }
   0x5   :  { %23 = vsyncpa [#allocation9], 0  ;;  %s4821_s25 = smov 0   ;;  %s4823_s26 = smov 0  }
   0x6   :  { %s4825_s27 = smov 0   ;;  %s4827_s28 = smov 0  }
   0x7 LB: > { %6870 = sst [smem:[#allocation14_spill]] %s4691_s27  ;;  %s4842_s29 = sadd.s32 4294967295, %s4695_s28   ;;  %s4695_s28 = sphi %s4827_s28, %s7025_s28   ;;  %s4691_s27 = sphi %s4825_s27, %s7027_s27   ;;  %s4687_s26 = sphi %s4823_s26, %s7029_s26   ;;  %s4683_s25 = sphi %s4821_s25, %s7028_s25  }
   0x8   : > { %s4082_s30 = sadd.s32 4294967294, %s4695_s28   ;;  %s4846_s14 = sadd.s32 1, %s4695_s28  }
   0x9   : > { %6871 = sst [smem:[#allocation15_spill]] %s4846_s14  ;;  %s251_s15 = sadd.s32 1, %s4691_s27 }
   0xa   : > { %s248_s16 = ssub.s32 %s4695_s28, %s4846_s14  ;;  %p261_p0 = scmp.ne.s32.totalorder %s4691_s27, %s4687_s26 }
   0xb   : > { %p249_p1 = scmp.eq.s32.totalorder %s248_s16, 0  ;;  %p6791_p2 = scmp.eq.s32.totalorder %s4842_s29, 7 }
   0xc   : > { %p267_p3 = scmp.ne.s32.totalorder %s4687_s26, %s4683_s25  ;;  %p268_p4 = scmp.eq.s32.totalorder %s4082_s30, 7 }
   0xd   : > { %s4857_s17 = scalar_select %p249_p1, %s4691_s27, %s251_s15  }
   0xe   : > { %p4861_p5 = por %p6791_p2, %p261_p0  ;;  %p4865_p6 = por %p268_p4, %p267_p3 }
   0xf   : > { %6872 = sst [smem:[#allocation16_spill]] %s4857_s17  ;;  %p4083_p7 = scmp.ge.s32.totalorder %s4695_s28, 1 }
  0x10   : > { %s6873_s18 = scalar_select %p4861_p5, 1, 0 }
  0x11   : > { %s6874_s19 = scalar_select %p4865_p6, 1, 0 }
  0x12   : > { %p338_p8 = scmp.lt.s32.totalorder %s4695_s28, 9  ;;  %p6792_p10 = scmp.eq.s32.totalorder %s4842_s29, 0 }
  0x13   : > { %s4697_s21 = smov [#allocation4]   ;;  %s4545_s15 = scalar_lea.hbm %s6776_s2, 128 }
  0x14   : > { %p4873_p11 = pnand %p4083_p7, %p338_p8  ;;  %s354_s22 = sshll.u32 %s4697_s21, 4  ;;  %s355_s22 = int_to_ptr.vmem [resolvable:$true] %s354_s22 }
  0x15   : > { %p4546_p0 = scmp.ne.s32.totalorder %s6776_s2, %s4545_s15  ;;  %p4552_p7 = scmp.lt.u32.totalorder %s4545_s15, %s6776_s2 }
  0x16   : > { %s6875_s20 = scalar_select %p4873_p11, 1, 0 }
  0x17   : > { %p4199_p12 = pneg %p4873_p11 }
  0x19   : > { %p4881_p13 = pnand %p6792_p10, %p4199_p12 }
  0x1b   : > { %p4547_p1 = pneg %p4881_p13 }
  0x1d   : > { %p4548_p3 = pnand %p4547_p1, %p4546_p0 }
  0x1f   : > { %p4549_p4 = pneg %p4548_p3 }
  0x21   : > { %p4554_p8 = pnand %p4552_p7, %p4549_p4 }
  0x23   : > { %4557 = shalt.err (!%p4554_p8)
}
  0x24   : > { %s4558_s14 = scalar_lea.vmem %s355_s22, 128  ;;  %p4566_p10 = scmp.lt.s32.totalorder %s355_s22, %s355_s22 }
  0x25   : > { %p4559_p12 = scmp.ne.s32.totalorder %s355_s22, %s4558_s14  ;;  %p4567_p6 = scmp.lt.s32.totalorder %s4558_s14, %s4558_s14 }
  0x27   : > { %p4561_p2 = pnand %p4559_p12, %p4547_p1  ;;  %p4568_p5 = por %p4567_p6, %p4566_p10 }
  0x29   : > { %p4562_p9 = pneg %p4561_p2 }
  0x2b   : > { %p4569_p11 = pnand %p4568_p5, %p4562_p9 }
  0x2d   : > { %4572 = shalt.err (!%p4569_p11)
}
  0x2e   : > { %4202 = dma.hbm_to_vmem [thread:$0]  (!%p4881_p13), %s6776_s2, 128, %s355_s22, [#allocation5]  }
  0x2f   : > { %p6877_p0 = scmp.ne.s32.totalorder %s6875_s20, 0 }
  0x31   : > { %395 = sbr.rel (%p6877_p0) target bundleno = 5766 (0x1686), region = 60 }
  0x38   : > { %p6878_p3 = scmp.eq.s32.totalorder %s4842_s29, 0 }
  0x3a   : > { %4670 = dma.done.wait (%p6878_p3), [#allocation5], 128   ;;  %p6879_p1 = pmov %p6878_p3 }
  0x3b   : > { %s6795_s27 = sand.u32 1, %s4687_s26   ;;  %p438_p2 = scmp.lt.s32.totalorder %s4842_s29, 7 }
  0x3c   : > { %4672 = vsyncadd (%p6879_p1), [#allocation5], 4294967168  ;;  %s4911_s14 = sshll.u32 %s6795_s27, 3  ;;  %s6880_s0 = sld [smem:[#allocation75_spill]] }
  0x3d   : > { %s439_s22 = scalar_select %p438_p2, %s4842_s29, 7 }
  0x3e   : > { %p6881_p5 = scmp.ne.s32.totalorder %s4842_s29, 0 }
  0x3f   : > { %s4089_s23 = sshll.u32 %s439_s22, 3  ;;  %v446_v0 = vld [vmem:[%s6775_s1] sm:$0xff] (!%p6881_p5)  ;;  %vm447_vm0 = vcmask (!%p6881_p5), 261120   ;;  %vm467_vm1 = vcmask (!%p6881_p5), 64512   ;;  %vm484_vm2 = vcmask (!%p6881_p5), 130048   ;;  %v452_v3 = vld [vmem:[%s6779_s5 + $0x8] sm:$0xff] (!%p6881_p5) }
  0x40   : > { %445 = sbr.rel (%p6881_p5) target bundleno = 76 (0x4c), region = 68  ;;  %v449_v1 = vld [vmem:[#allocation4] sm:$0xff] (!%p6881_p5)  ;;  %448 = vst.msk [vmem:[#allocation8] sm:$0xff] (!%p6881_p5), %vm447_vm0, %v446_v0  ;;  %v453_v4 = vld [vmem:[%s6779_s5 + $0x10] sm:$0xff] (!%p6881_p5)  ;;  %v454_v5 = vld [vmem:[%s6779_s5 + $0x18] sm:$0xff] (!%p6881_p5)  ;;  %v4698_v9 = vmov (!%p6881_p5), 0.0  }
  0x41   : > { %v451_v2 = vld [vmem:[%s6779_s5] sm:$0xff] (!%p6881_p5)  ;;  %450 = vst.msk [vmem:[#allocation10] sm:$0xff] (!%p6881_p5), %vm447_vm0, %v449_v1  ;;  %v456_v7 = vld [vmem:[%s6779_s5 + $0x28] sm:$0xff] (!%p6881_p5)  ;;  %v457_v8 = vld [vmem:[%s6779_s5 + $0x30] sm:$0xff] (!%p6881_p5) }
  0x42   : > { %s4917_s15 = scalar_lea.vmem %s6880_s0, %s4089_s23  ;;  %468 = vst.msk [vmem:[%s6785_s11] sm:$0xff] (!%p6881_p5), %vm467_vm1, %v451_v2  ;;  %469 = vst.msk [vmem:[%s6785_s11 + $0x8] sm:$0xff] (!%p6881_p5), %vm467_vm1, %v452_v3  ;;  %v455_v6 = vld [vmem:[%s6779_s5 + $0x20] sm:$0xff] (!%p6881_p5)  ;;  %v458_v10 = vld [vmem:[%s6779_s5 + $0x38] sm:$0xff] (!%p6881_p5) }
  0x43   : > { %470 = vst.msk [vmem:[%s6785_s11 + $0x10] sm:$0xff] (!%p6881_p5), %vm467_vm1, %v453_v4  ;;  %471 = vst.msk [vmem:[%s6785_s11 + $0x18] sm:$0xff] (!%p6881_p5), %vm467_vm1, %v454_v5  ;;  %v459_v11 = vld [vmem:[%s6779_s5 + $0x40] sm:$0xff] (!%p6881_p5)  ;;  %v460_v12 = vld [vmem:[%s6779_s5 + $0x48] sm:$0xff] (!%p6881_p5) }
  0x44   : > { %485 = vst.msk [vmem:[#allocation2] sm:$0xff] (!%p6881_p5), %vm484_vm2, %v4698_v9  ;;  %486 = vst.msk [vmem:[#allocation2 + $0x8] sm:$0xff] (!%p6881_p5), %vm484_vm2, %v4698_v9  ;;  %v461_v13 = vld [vmem:[%s6779_s5 + $0x50] sm:$0xff] (!%p6881_p5)  ;;  %v462_v14 = vld [vmem:[%s6779_s5 + $0x58] sm:$0xff] (!%p6881_p5) }
  0x45   : > { %487 = vst.msk [vmem:[#allocation3] sm:$0xff] (!%p6881_p5), %vm484_vm2, %v4698_v9  ;;  %488 = vst.msk [vmem:[#allocation3 + $0x8] sm:$0xff] (!%p6881_p5), %vm484_vm2, %v4698_v9  ;;  %v463_v15 = vld [vmem:[%s6779_s5 + $0x60] sm:$0xff] (!%p6881_p5)  ;;  %v464_v16 = vld [vmem:[%s6779_s5 + $0x68] sm:$0xff] (!%p6881_p5) }
  0x46   : > { %472 = vst.msk [vmem:[%s6785_s11 + $0x20] sm:$0xff] (!%p6881_p5), %vm467_vm1, %v455_v6  ;;  %473 = vst.msk [vmem:[%s6785_s11 + $0x28] sm:$0xff] (!%p6881_p5), %vm467_vm1, %v456_v7  ;;  %v465_v17 = vld [vmem:[%s6779_s5 + $0x70] sm:$0xff] (!%p6881_p5)  ;;  %v466_v18 = vld [vmem:[%s6779_s5 + $0x78] sm:$0xff] (!%p6881_p5) }
  0x47   : > { %474 = vst.msk [vmem:[%s6785_s11 + $0x30] sm:$0xff] %vm467_vm1, %v457_v8  ;;  %475 = vst.msk [vmem:[%s6785_s11 + $0x38] sm:$0xff] %vm467_vm1, %v458_v10 }
  0x48   : > { %476 = vst.msk [vmem:[%s6785_s11 + $0x40] sm:$0xff] %vm467_vm1, %v459_v11  ;;  %477 = vst.msk [vmem:[%s6785_s11 + $0x48] sm:$0xff] %vm467_vm1, %v460_v12 }
  0x49   : > { %478 = vst.msk [vmem:[%s6785_s11 + $0x50] sm:$0xff] %vm467_vm1, %v461_v13  ;;  %479 = vst.msk [vmem:[%s6785_s11 + $0x58] sm:$0xff] %vm467_vm1, %v462_v14 }
  0x4a   : > { %480 = vst.msk [vmem:[%s6785_s11 + $0x60] sm:$0xff] %vm467_vm1, %v463_v15  ;;  %481 = vst.msk [vmem:[%s6785_s11 + $0x68] sm:$0xff] %vm467_vm1, %v464_v16 }
  0x4b   : > { %482 = vst.msk [vmem:[%s6785_s11 + $0x70] sm:$0xff] %vm467_vm1, %v465_v17  ;;  %483 = vst.msk [vmem:[%s6785_s11 + $0x78] sm:$0xff] %vm467_vm1, %v466_v18 }
  0x4c PF: > { %v490_v19 = vld [vmem:[#allocation8] sm:$0xff]  ;;  %v512_v20 = vld [vmem:[%s6777_s3] sm:$0xff]  ;;  %v513_v21 = vld [vmem:[%s6777_s3 + $0x8] sm:$0xff]  ;;  %s6806_s16 = smov 8   ;;  %v6796_v22 = vmov 0.0|0.0   ;;  %vm4701_vm3 = vmmov 0  }
  0x4d   : > { %531 = vrot.lane.b32.xlu0 %v490_v19, %s6806_s16  ;;  %4164 = vmatprep.subr.bf16.mxu0 %v6796_v22  ;;  %v4165_v23 = vpack.c.bf16 %v513_v21, %v512_v20  ;;  %v514_v24 = vld [vmem:[%s6777_s3 + $0x10] sm:$0xff]  ;;  %v515_v25 = vld [vmem:[%s6777_s3 + $0x18] sm:$0xff]  ;;  %v4702_v26 = vmov 0.0   ;;  %v491_v27 = vld [vmem:[#allocation10] sm:$0xff]  ;;  %s4703_s23 = smov 32   ;;  %vm534_vm4 = vcmask 64512  }
  0x4e   : > { %4135 = vmatprep.mubr.msk.f32.mxu0 %vm4701_vm3, %v4702_v26  ;;  %4176 = vmatprep.subr.bf16.mxu1 %v6796_v22  ;;  %v4168_v28 = vpack.c.bf16 %v515_v25, %v514_v24  ;;  %v516_v29 = vld [vmem:[%s6777_s3 + $0x20] sm:$0xff]  ;;  %vm542_vm5 = vcmask 326656   ;;  %s4704_s27 = smov 64   ;;  %v519_v49 = vld [vmem:[%s6780_s6 + $0x8] sm:$0xff]  ;;  %v520_v50 = vld [vmem:[%s6780_s6 + $0x10] sm:$0xff]  ;;  %vm653_vm6 = vcmask 261120  }
  0x4f   : > { %4166 = vmatpush3.bf16.msra.mxu0 %v4165_v23  ;;  %624 = vrot.lane.b32.xlu1 %v491_v27, %s4703_s23  ;;  %v489_v30 = vld [vmem:[%s4917_s15] sm:$0xff]  ;;  %v521_v52 = vld [vmem:[%s6780_s6 + $0x18] sm:$0xff]  ;;  %v5095_v56 = vld [vmem:[%s6785_s11 + $0x8] sm:$0xff]  ;;  %v4705_v25 = vmov 1966171168   ;;  %v773_v27 = vlaneseq  ;;  %s4706_s22 = smov 100  }
  0x50   : > { %4167 = vmatprep.subr.bf16.mxu0 %v6796_v22  ;;  %4161 = vmatprep.mubr.msk.f32.mxu1 %vm4701_vm3, %v4702_v26  ;;  %v4091_v33 = vld [vmem:[%s6778_s4] ss:$0 sm:$0xff]  ;;  %v4174_v53 = vpack.c.bf16 %v521_v52, %v520_v50  ;;  %v939_v58 = vmul.f32 %v5095_v56, %v5095_v56  ;;  %v5104_v59 = vld [vmem:[%s6785_s11 + $0x18] sm:$0xff]  ;;  %v5134_v8 = vld [vmem:[%s6785_s11 + $0x10] sm:$0xff]  ;;  %vm750_vm9 = vcmask 335152   ;;  %vm1195_vm10 = vcmask 130112  }
  0x51   : > { %v518_v48 = vld [vmem:[%s6780_s6] sm:$0xff]  ;;  %v941_v62 = vmul.f32 %v5104_v59, %v5104_v59  ;;  %v940_v9 = vmul.f32 %v5134_v8, %v5134_v8  ;;  %v5165_v19 = vld [vmem:[%s6785_s11 + $0x50] sm:$0xff]  ;;  %v5218_v52 = vld [vmem:[%s6785_s11 + $0x48] sm:$0xff]  ;;  %vm1260_vm11 = vcmask 1041409   ;;  %vm1262_vm12 = vcmask 1042434   ;;  %s4710_s30 = smov 90  }
  0x52   : > { %v4171_v51 = vpack.c.bf16 %v519_v49, %v518_v48  ;;  %v5090_v55 = vld [vmem:[%s6785_s11] sm:$0xff]  ;;  %v957_v61 = vsel %vm534_vm4, %v939_v58, 0.0  ;;  %v5113_v63 = vld [vmem:[%s6785_s11 + $0x28] sm:$0xff]  ;;  %v948_v21 = vmul.f32 %v5165_v19, %v5165_v19  ;;  %vm1264_vm13 = vcmask 1043459   ;;  %s4714_s21 = smov 113   ;;  %s4716_s17 = smov 1  }
  0x53   : > { %4169 = vmatpush3.bf16.msra.mxu0 %v4168_v28  ;;  %v938_v57 = vmul.f32 %v5090_v55, %v5090_v55  ;;  %v963_v0 = vsel %vm534_vm4, %v941_v62, 0.0  ;;  %v943_v1 = vmul.f32 %v5113_v63, %v5113_v63  ;;  %v5121_v3 = vld [vmem:[%s6785_s11 + $0x38] sm:$0xff]  ;;  %v5141_v10 = vld [vmem:[%s6785_s11 + $0x20] sm:$0xff]  ;;  %v960_v11 = vsel %vm534_vm4, %v940_v9, 0.0  ;;  %v5149_v13 = vld [vmem:[%s6785_s11 + $0x30] sm:$0xff]  ;;  %s4717_s15 = smov 17  }
  0x54   : > { %4133 = vmatprep.subr.mxu0 %v4702_v26  ;;  %v945_v6 = vmul.f32 %v5121_v3, %v5121_v3  ;;  %v942_v12 = vmul.f32 %v5141_v10, %v5141_v10  ;;  %v944_v15 = vmul.f32 %v5149_v13, %v5149_v13  ;;  %v5157_v16 = vld [vmem:[%s6785_s11 + $0x40] sm:$0xff]  ;;  %v984_v23 = vsel %vm534_vm4, %v948_v21, 0.0  ;;  %s4719_s0 = smov 127   ;;  %s6811_s24 = smov 126  }
  0x55   : > { %v954_v60 = vsel %vm534_vm4, %v938_v57, 0.0  ;;  %v969_v5 = vsel %vm534_vm4, %v943_v1, 0.0  ;;  %v946_v18 = vmul.f32 %v5157_v16, %v5157_v16  ;;  %vm1266_vm14 = vcmask 1044484   ;;  %s4721_s20 = smov 78   ;;  %s4733_s16 = smov 56  }
  0x56   : > { %v975_v7 = vsel %vm534_vm4, %v945_v6, 0.0  ;;  %v966_v14 = vsel %vm534_vm4, %v942_v12, 0.0  ;;  %v972_v17 = vsel %vm534_vm4, %v944_v15, 0.0  ;;  %v5246_v12 = vld [vmem:[%s6785_s11 + $0x70] sm:$0xff]  ;;  %vm1268_vm15 = vcmask 1045509   ;;  %p7012_p9 = scmp.eq.s32.totalorder %s4842_s29, 7 }
  0x57   : > { %4134 = vmatpush3.msra.mxu0 %v516_v29  ;;  %v978_v20 = vsel %vm534_vm4, %v946_v18, 0.0  ;;  %v5174_v29 = vshrl.u32 %v773_v27, 7  ;;  %vm1270_vm0 = vcmask 1046534   ;;  %vm1272_vm1 = vcmask 1047559  }
  0x58   : > { %4170 = vmatprep.subr.bf16.mxu0 %v6796_v22  ;;  %vm1276_vm2 = vcmask 130048  }
  0xbf   : > { %v532_v31 = vpop.permute.xlu0 %531 }
  0xc0   : > { %v535_v32 = vsel %vm534_vm4, %v489_v30, %v532_v31  ;;  %v4094_v30 = vld [vmem:[%s6781_s7] ss:$0 sm:$0xff] }
  0xc1   : > { %4136 = vmatmul.mubr.msk.f32.vlgmr.msra.gmra.mrb[0].mxu0 %vm542_vm5, %v535_v32  ;;  %v625_v44 = vpop.permute.xlu1 %624  ;;  %vm1306_vm5 = vcmask 7168  }
  0xc2   : > { %4146 = vmatprep.mubr.msk.f32.mxu0 %vm4701_vm3, %v4702_v26  ;;  %4172 = vmatpush3.bf16.msra.mxu0 %v4171_v51  ;;  %v771_v26 = vunpack.c.l.s4 %v4705_v25  ;;  %vm761_vm3 = vcmask 23552  }
  0xc3   : > { %4173 = vmatprep.subr.bf16.mxu0 %v6796_v22 }
  0xc4   : > { %v772_v28 = vunpack.c.0.s8 %v771_v26 }
  0xc6   : > { %4175 = vmatpush3.bf16.msra.mxu0 %v4174_v53  ;;  %v775_v31 = vsub.s32 %v772_v28, %v5174_v29 }
 0x194   : > { %v612_v34 = vpop.f32.mrb[0].mxu0 }
 0x195   : > { %v613_v35 = vadd.f32 %v4091_v33, %v612_v34  ;;  %v4137_v36 = vpop.f32.mrb[1].mxu0 }
 0x197   : > { %4329 = vtanh.f32 %v613_v35  ;;  %v4093_v38 = vmul.f32 -1.442695, %v613_v35 }
 0x199   : > { %4331 = vpow2.f32 %v4093_v38 }
 0x1a1   : > { %v4330_v37 = vpop.eup %4329 }
 0x1a2   : > { %629 = vrot.lane.b32.xlu0 %v4330_v37, %s4704_s27  ;;  %v5188_v37 = vsub.s32 0, %v5174_v29 }
 0x1a3   : > { %v4332_v39 = vpop.eup %4331 }
 0x1a4   : > { %v619_v40 = vadd.f32 1.0, %v4332_v39  ;;  %6885 = vst [vmem:[#allocation20_spill] sm:$0xff] %v5188_v37 }
 0x1a6   : > { %4333 = vrcp.f32 %v619_v40 }
 0x1b0   : > { %v4334_v41 = vpop.eup %4333 }
 0x1b1   : > { %v627_v45 = vmul.f32 %v4334_v41, %v625_v44 }
 0x214   : > { %v630_v42 = vpop.permute.xlu0 %629 }
 0x215   : > { %v632_v43 = vmul.f32 %v4334_v41, %v630_v42 }
 0x217   : > { %634 = vrot.lane.b32.xlu1 %v632_v43, %s4703_s23 }
 0x289   : > { %v635_v46 = vpop.permute.xlu1 %634 }
 0x28a   : > { %v5071_v47 = vadd.f32 %v635_v46, %v627_v45 }
 0x28c   : > { %6882 = vst [vmem:[#allocation17_spill] sm:$0xff] %v5071_v47  ;;  %4335 = vtanh.f32 %v5071_v47 }
 0x296   : > { %v4336_v54 = vpop.eup %4335 }
 0x297   : > { %640 = vrot.lane.b32.xlu0 %v4336_v54, %s4704_s27  ;;  %v947_v54 = vmul.f32 %v5218_v52, %v5218_v52  ;;  %s4711_s27 = smov 70  }
 0x2b6   : > { %955 = vadd.xlane.f32.xlu0 %v954_v60 }
 0x2ba   : > { %958 = vadd.xlane.f32.xlu0 %v957_v61 }
 0x2be   : > { %964 = vadd.xlane.f32.xlu0 %v963_v0  ;;  %v981_v0 = vsel %vm534_vm4, %v947_v54, 0.0 }
 0x2c2   : > { %970 = vadd.xlane.f32.xlu0 %v969_v5 }
 0x2c6   : > { %976 = vadd.xlane.f32.xlu0 %v975_v7  ;;  %v5239_v7 = vld [vmem:[%s6785_s11 + $0x60] sm:$0xff] }
 0x309   : > { %v641_v2 = vpop.permute.xlu0 %640 }
 0x30a   : > { %v5123_v4 = vmul.f32 %v4334_v41, %v641_v2 }
 0x30c   : > { %6883 = vst [vmem:[#allocation18_spill] sm:$0xff] %v5123_v4  ;;  %651 = vrot.lane.b32.xlu1 %v5123_v4, %s4703_s23  ;;  %s4732_s23 = smov 48  }
 0x330   : > { %961 = vadd.xlane.f32.xlu1 %v960_v11  ;;  %v950_v11 = vmul.f32 %v5239_v7, %v5239_v7 }
 0x332   : > { %v990_v15 = vsel %vm534_vm4, %v950_v11, 0.0 }
 0x334   : > { %967 = vadd.xlane.f32.xlu1 %v966_v14 }
 0x338   : > { %973 = vadd.xlane.f32.xlu1 %v972_v17  ;;  %v952_v17 = vmul.f32 %v5246_v12, %v5246_v12 }
 0x33c   : > { %979 = vadd.xlane.f32.xlu1 %v978_v20 }
 0x340   : > { %985 = vadd.xlane.f32.xlu1 %v984_v23  ;;  %v996_v23 = vsel %vm534_vm4, %v952_v17, 0.0 }
 0x37e   : > { %v652_v24 = vpop.permute.xlu1 %651 }
 0x37f   : > { %4147 = vmatmul.mubr.msk.f32.vlgmr.msra.gmra.mrb[2].mxu0 %vm653_vm6, %v652_v24  ;;  %3922 = vst.msk [vmem:[#allocation8] sm:$0xff] %vm653_vm6, %v652_v24 }
 0x452   : > { %v722_v32 = vpop.f32.mrb[2].mxu0 }
 0x453   : > { %v5180_v33 = vadd.f32 %v4094_v30, %v722_v32  ;;  %v4148_v34 = vpop.f32.mrb[3].mxu0  ;;  %v5272_v32 = vpop.xlane.xlu0 %955 }
 0x454   : > { %v5279_v34 = vpop.xlane.xlu1 %961 }
 0x455   : > { %6884 = vst [vmem:[#allocation19_spill] sm:$0xff] %v5180_v33  ;;  %v5184_v35 = vmul.f32 %v5180_v33, %v5180_v33  ;;  %v776_v36 = vrot.slane %v5180_v33, %v775_v31  ;;  %v769_v38 = vcombine.high %v5180_v33, %v5180_v33  ;;  %v4096_v39 = vmul.f32 -1.442695, %v5180_v33 }
 0x456   : > { %vm727_vm8 = vcmp.ne.f32.partialorder %v5180_v33, %v5180_v33 }
 0x457   : > { %1004 = vrot.lane.b32.xlu0 %v5184_v35, %s4706_s22  ;;  %v792_v40 = vrot.slane %v776_v36, %v775_v31  ;;  %4337 = vpow2.f32 %v4096_v39  ;;  %v783_v43 = vrot.slane %v769_v38, %v775_v31  ;;  %v784_v9 = vcombine.high %v776_v36, %v776_v36  ;;  %v5283_v38 = vpop.xlane.xlu0 %958  ;;  %v5288_v39 = vld [vmem:[%s6785_s11 + $0x68] sm:$0xff] }
 0x459   : > { %v5196_v41 = vrot.slane %v792_v40, %v5188_v37  ;;  %v814_v42 = vcombine.high %v792_v40, %v792_v40  ;;  %v799_v45 = vrot.slane %v783_v43, %v775_v31  ;;  %v806_v14 = vrot.slane %v784_v9, %v775_v31 }
 0x45a   : > { %v785_v21 = vcombine.high %v783_v43, %v783_v43  ;;  %v5293_v43 = vpop.xlane.xlu1 %967 }
 0x45b   : > { %850 = vrot.lane.b32.xlu1 %v5196_v41, %s4706_s22  ;;  %v5201_v44 = vrot.slane %v814_v42, %v5188_v37  ;;  %v5206_v46 = vrot.slane %v799_v45, %v5188_v37  ;;  %v815_v48 = vcombine.high %v799_v45, %v799_v45  ;;  %v5252_v18 = vrot.slane %v806_v14, %v5188_v37  ;;  %v5298_v45 = vld [vmem:[%s6785_s11 + $0x78] sm:$0xff] }
 0x45c   : > { %v816_v20 = vcombine.high %v806_v14, %v806_v14  ;;  %v813_v25 = vrot.slane %v785_v21, %v775_v31  ;;  %v951_v42 = vmul.f32 %v5288_v39, %v5288_v39  ;;  %v6798_v21 = vmov 0  }
 0x45d   : > { %v5211_v51 = vrot.slane %v815_v48, %v5188_v37  ;;  %v5300_v48 = vpop.xlane.xlu0 %964  ;;  %4300 = vset.pattern.permute.xlu0 %v6798_v21  ;;  %4299 = vset.pattern.permute.xlu1 %v6798_v21 }
 0x45e   : > { %v5258_v24 = vrot.slane %v816_v20, %v5188_v37  ;;  %v5263_v26 = vrot.slane %v813_v25, %v5188_v37  ;;  %v817_v28 = vcombine.high %v813_v25, %v813_v25  ;;  %v5305_v54 = vpop.xlane.xlu1 %973 }
 0x45f   : > { %854 = vrot.lane.b32.xlu1 %v5201_v44, %s4706_s22 }
 0x460   : > { %v5268_v30 = vrot.slane %v817_v28, %v5188_v37 }
 0x461   : > { %v4338_v49 = vpop.eup %4337 }
 0x462   : > { %v747_v50 = vadd.f32 1.0, %v4338_v49  ;;  %v993_v49 = vsel %vm534_vm4, %v951_v42, 0.0 }
 0x463   : > { %858 = vrot.lane.b32.xlu1 %v5206_v46, %s4706_s22 }
 0x464   : > { %4339 = vrcp.f32 %v747_v50  ;;  %v953_v50 = vmul.f32 %v5298_v45, %v5298_v45 }
 0x467   : > { %862 = vrot.lane.b32.xlu1 %v5211_v51, %s4706_s22 }
 0x46e   : > { %v5220_v53 = vpop.eup %4339 }
 0x46f   : > { %v1442_v57 = vcombine.high %v5220_v53, %v5220_v53  ;;  %v1449_v58 = vrot.slane %v5220_v53, %v775_v31 }
 0x471   : > { %v1456_v60 = vrot.slane %v1442_v57, %v775_v31  ;;  %v5227_v61 = vrot.slane %v1449_v58, %v775_v31  ;;  %v1457_v62 = vcombine.high %v1449_v58, %v1449_v58  ;;  %v999_v57 = vsel %vm534_vm4, %v953_v50, 0.0  ;;  %v5308_v58 = vpop.xlane.xlu0 %970 }
 0x473   : > { %v5230_v1 = vrot.slane %v1456_v60, %v775_v31  ;;  %v1458_v2 = vcombine.high %v1456_v60, %v1456_v60  ;;  %v5232_v5 = vrot.slane %v1457_v62, %v775_v31  ;;  %v5310_v60 = vpop.xlane.xlu1 %979 }
 0x475   : > { %v5234_v6 = vrot.slane %v1458_v2, %v775_v31  ;;  %v5277_v31 = vld [vmem:[%s6785_s11 + $0x58] sm:$0xff]  ;;  %v5312_v62 = vpop.xlane.xlu0 %976  ;;  %v1489_v47 = vcombine.high %v5232_v5, %v5232_v5 }
 0x476   : > { %982 = vadd.xlane.f32.xlu0 %v981_v0  ;;  %v949_v36 = vmul.f32 %v5277_v31, %v5277_v31 }
 0x477   : > { %v5314_v0 = vpop.xlane.xlu1 %985 }
 0x478   : > { %v987_v40 = vsel %vm534_vm4, %v949_v36, 0.0 }
 0x48b   : > { %991 = vadd.xlane.f32.xlu1 %v990_v15 }
 0x48c   : > { %852 = vrot.lane.b32.xlu0 %v5252_v18, %s4706_s22 }
 0x48f   : > { %997 = vadd.xlane.f32.xlu1 %v996_v23 }
 0x490   : > { %856 = vrot.lane.b32.xlu0 %v5258_v24, %s4706_s22 }
 0x494   : > { %860 = vrot.lane.b32.xlu0 %v5263_v26, %s4706_s22 }
 0x498   : > { %864 = vrot.lane.b32.xlu0 %v5268_v30, %s4706_s22  ;;  %s4722_s22 = smov 86  }
 0x4b7   : > { %988 = vadd.xlane.f32.xlu0 %v987_v40 }
 0x4bb   : > { %994 = vadd.xlane.f32.xlu0 %v993_v49 }
 0x4bf   : > { %1000 = vadd.xlane.f32.xlu0 %v999_v57 }
 0x4c9   : > { %v1005_v2 = vpop.permute.xlu0 %1004 }
 0x4ca   : > { %v1007_v9 = vsel %vm534_vm4, %v1005_v2, 0.0 }
 0x4cb   : > { %1008 = vadd.xlane.f32.xlu1 %v1007_v9 }
 0x4cd   : > { %v851_v11 = vpop.permute.xlu1 %850 }
 0x4ce   : > { %v874_v14 = vmul.f32 %v851_v11, %v5090_v55  ;;  %v875_v15 = vmul.f32 %v851_v11, %v5095_v56 }
 0x4d0   : > { %v890_v17 = vsel %vm534_vm4, %v874_v14, 0.0  ;;  %v893_v20 = vsel %vm534_vm4, %v875_v15, 0.0 }
 0x4d1   : > { %891 = vadd.xlane.f32.xlu1 %v890_v17  ;;  %894 = vadd.xlane.f32.xlu0 %v893_v20  ;;  %v855_v25 = vpop.permute.xlu1 %854 }
 0x4d2   : > { %v878_v42 = vmul.f32 %v855_v25, %v5141_v10  ;;  %v879_v49 = vmul.f32 %v855_v25, %v5113_v63 }
 0x4d4   : > { %v902_v2 = vsel %vm534_vm4, %v878_v42, 0.0  ;;  %v905_v9 = vsel %vm534_vm4, %v879_v49, 0.0 }
 0x4d5   : > { %v859_v50 = vpop.permute.xlu1 %858 }
 0x4d9   : > { %v863_v25 = vpop.permute.xlu1 %862 }
 0x503   : > { %v5323_v23 = vpop.xlane.xlu0 %982 }
 0x507   : > { %v853_v28 = vpop.permute.xlu0 %852 }
 0x508   : > { %v876_v36 = vmul.f32 %v853_v28, %v5134_v8  ;;  %v877_v55 = vmul.f32 %v853_v28, %v5104_v59  ;;  %v882_v8 = vmul.f32 %v859_v50, %v5157_v16  ;;  %v883_v59 = vmul.f32 %v859_v50, %v5218_v52 }
 0x50a   : > { %v896_v56 = vsel %vm534_vm4, %v876_v36, 0.0  ;;  %v899_v40 = vsel %vm534_vm4, %v877_v55, 0.0  ;;  %v914_v11 = vsel %vm534_vm4, %v882_v8, 0.0  ;;  %v917_v10 = vsel %vm534_vm4, %v883_v59, 0.0 }
 0x50b   : > { %897 = vadd.xlane.f32.xlu1 %v896_v56  ;;  %900 = vadd.xlane.f32.xlu0 %v899_v40  ;;  %v857_v57 = vpop.permute.xlu0 %856  ;;  %v887_v36 = vmul.f32 %v863_v25, %v5288_v39 }
 0x50c   : > { %v880_v63 = vmul.f32 %v857_v57, %v5149_v13  ;;  %v881_v14 = vmul.f32 %v857_v57, %v5121_v3  ;;  %v886_v3 = vmul.f32 %v863_v25, %v5239_v7 }
 0x50e   : > { %v908_v17 = vsel %vm534_vm4, %v880_v63, 0.0  ;;  %v911_v20 = vsel %vm534_vm4, %v881_v14, 0.0  ;;  %v926_v56 = vsel %vm534_vm4, %v886_v3, 0.0 }
 0x50f   : > { %903 = vadd.xlane.f32.xlu1 %v902_v2  ;;  %906 = vadd.xlane.f32.xlu0 %v905_v9  ;;  %v861_v15 = vpop.permute.xlu0 %860 }
 0x510   : > { %v884_v16 = vmul.f32 %v861_v15, %v5165_v19  ;;  %v885_v52 = vmul.f32 %v861_v15, %v5277_v31  ;;  %v929_v19 = vsel %vm534_vm4, %v887_v36, 0.0 }
 0x512   : > { %v920_v28 = vsel %vm534_vm4, %v884_v16, 0.0  ;;  %v923_v13 = vsel %vm534_vm4, %v885_v52, 0.0 }
 0x513   : > { %915 = vadd.xlane.f32.xlu1 %v914_v11  ;;  %918 = vadd.xlane.f32.xlu0 %v917_v10  ;;  %v865_v55 = vpop.permute.xlu0 %864 }
 0x514   : > { %v889_v31 = vmul.f32 %v865_v55, %v5298_v45  ;;  %v888_v40 = vmul.f32 %v865_v55, %v5246_v12 }
 0x516   : > { %v935_v42 = vsel %vm534_vm4, %v889_v31, 0.0  ;;  %v932_v49 = vsel %vm534_vm4, %v888_v40, 0.0  ;;  %v5380_v40 = vsub.s32 5, %v5174_v29 }
 0x517   : > { %909 = vadd.xlane.f32.xlu1 %v908_v17  ;;  %912 = vadd.xlane.f32.xlu0 %v911_v20 }
 0x518   : > { %v992_v7 = vpop.xlane.xlu1 %991  ;;  %6889 = vst [vmem:[#allocation24_spill] sm:$0xff] %v5380_v40 }
 0x51b   : > { %921 = vadd.xlane.f32.xlu1 %v920_v28  ;;  %924 = vadd.xlane.f32.xlu0 %v923_v13  ;;  %v5371_v28 = vsub.s32 2, %v5174_v29 }
 0x51c   : > { %v5353_v39 = vpop.xlane.xlu1 %997 }
 0x51d   : > { %6887 = vst [vmem:[#allocation22_spill] sm:$0xff] %v5371_v28 }
 0x51f   : > { %927 = vadd.xlane.f32.xlu1 %v926_v56  ;;  %930 = vadd.xlane.f32.xlu0 %v929_v19  ;;  %v5376_v56 = vsub.s32 3, %v5174_v29 }
 0x521   : > { %6888 = vst [vmem:[#allocation23_spill] sm:$0xff] %v5376_v56 }
 0x523   : > { %936 = vadd.xlane.f32.xlu0 %v935_v42  ;;  %933 = vadd.xlane.f32.xlu1 %v932_v49  ;;  %v5384_v42 = vsub.s32 6, %v5174_v29 }
 0x544   : > { %v5356_v2 = vpop.xlane.xlu0 %988 }
 0x548   : > { %v5360_v59 = vpop.xlane.xlu0 %994 }
 0x54c   : > { %v5362_v11 = vpop.xlane.xlu0 %1000 }
 0x558   : > { %v1009_v50 = vpop.xlane.xlu1 %1008 }
 0x559   : > { %v1014_v57 = vrot.slane %v1009_v50, %v5188_v37  ;;  %v1022_v55 = vrot.slane %v1009_v50, %v5371_v28 }
 0x55b   : > { %v1051_v45 = vmul.f32 %v1014_v57, %v5272_v32  ;;  %v1052_v12 = vmul.f32 %v1014_v57, %v5283_v38  ;;  %v5365_v32 = vsub.s32 1, %v5174_v29  ;;  %v729_v38 = vand.u32 2147483647, %v5180_v33 }
 0x55c   : > { %v1055_v31 = vmul.f32 %v1022_v55, %v5293_v43  ;;  %v1056_v49 = vmul.f32 %v1022_v55, %v5308_v58  ;;  %v1034_v57 = vrot.slane %v1009_v50, %v5380_v40 }
 0x55d   : > { %v1067_v9 = vmax.f32 %v1051_v45, 1e-16  ;;  %v1068_v8 = vmax.f32 %v1052_v12, 1e-16  ;;  %6886 = vst [vmem:[#allocation21_spill] sm:$0xff] %v5365_v32  ;;  %v1018_v16 = vrot.slane %v1009_v50, %v5365_v32  ;;  %v730_v52 = vsub.f32 0.0, %v729_v38 }
 0x55e   : > { %v892_v63 = vpop.xlane.xlu1 %891  ;;  %v895_v17 = vpop.xlane.xlu0 %894  ;;  %v5389_v45 = vsub.s32 7, %v5174_v29  ;;  %v5392_v12 = vsub.s32 4, %v5174_v29 }
 0x55f   : > { %4341 = vrsqrt.f32 %v1067_v9  ;;  %v1053_v25 = vmul.f32 %v1018_v16, %v5279_v34  ;;  %v731_v13 = vmul.f32 1.442695, %v730_v52  ;;  %v1054_v36 = vmul.f32 %v1018_v16, %v5300_v48 }
 0x560   : > { %4343 = vrsqrt.f32 %v1068_v8  ;;  %v1026_v34 = vrot.slane %v1009_v50, %v5376_v56  ;;  %v1071_v48 = vmax.f32 %v1055_v31, 1e-16  ;;  %v1072_v9 = vmax.f32 %v1056_v49, 1e-16 }
 0x561   : > { %v1069_v3 = vmax.f32 %v1053_v25, 1e-16  ;;  %4345 = vpow2.f32 %v731_v13  ;;  %v1070_v19 = vmax.f32 %v1054_v36, 1e-16  ;;  %v1061_v8 = vmul.f32 %v1034_v57, %v5314_v0 }
 0x562   : > { %v1057_v43 = vmul.f32 %v1026_v34, %v5305_v54  ;;  %v1058_v16 = vmul.f32 %v1026_v34, %v5312_v62  ;;  %v1030_v54 = vrot.slane %v1009_v50, %v5392_v12 }
 0x563   : > { %4347 = vrsqrt.f32 %v1069_v3  ;;  %v1077_v52 = vmax.f32 %v1061_v8, 1e-16 }
 0x564   : > { %4349 = vrsqrt.f32 %v1070_v19  ;;  %v1073_v38 = vmax.f32 %v1057_v43, 1e-16  ;;  %v1074_v19 = vmax.f32 %v1058_v16, 1e-16 }
 0x565   : > { %4351 = vrsqrt.f32 %v1071_v48  ;;  %v1059_v48 = vmul.f32 %v1030_v54, %v5310_v60 }
 0x566   : > { %4353 = vrsqrt.f32 %v1072_v9  ;;  %v1060_v9 = vmul.f32 %v1030_v54, %v5323_v23 }
 0x567   : > { %4355 = vrsqrt.f32 %v1073_v38  ;;  %v1075_v43 = vmax.f32 %v1059_v48, 1e-16 }
 0x568   : > { %4357 = vrsqrt.f32 %v1077_v52  ;;  %v1076_v60 = vmax.f32 %v1060_v9, 1e-16 }
 0x569   : > { %v4342_v10 = vpop.eup %4341 }
 0x56a   : > { %v4344_v14 = vpop.eup %4343  ;;  %v1099_v15 = vmul.f32 %v4342_v10, %v892_v63  ;;  %v1038_v10 = vrot.slane %v1009_v50, %v5384_v42 }
 0x56b   : > { %v1100_v20 = vmul.f32 %v4344_v14, %v895_v17  ;;  %v5397_v63 = vpop.eup %4345  ;;  %v1042_v17 = vrot.slane %v1009_v50, %v5389_v45 }
 0x56c   : > { %1137 = vperm.xlu1 %4299, %v1099_v15   ;;  %v1063_v25 = vmul.f32 %v1038_v10, %v992_v7  ;;  %v733_v0 = vadd.f32 1.0, %v5397_v63 }
 0x56d   : > { %1140 = vperm.xlu0 %4300, %v1100_v20   ;;  %v4348_v14 = vpop.eup %4347  ;;  %v1065_v36 = vmul.f32 %v1042_v17, %v5353_v39 }
 0x56e   : > { %v4350_v13 = vpop.eup %4349  ;;  %v1079_v62 = vmax.f32 %v1063_v25, 1e-16  ;;  %4359 = vlog2.f32 %v733_v0 }
 0x56f   : > { %v4352_v50 = vpop.eup %4351  ;;  %v1081_v7 = vmax.f32 %v1065_v36, 1e-16  ;;  %4361 = vrsqrt.f32 %v1074_v19 }
 0x570   : > { %4363 = vrsqrt.f32 %v1079_v62  ;;  %v4354_v39 = vpop.eup %4353 }
 0x571   : > { %4365 = vrsqrt.f32 %v1081_v7  ;;  %v4356_v38 = vpop.eup %4355 }
 0x572   : > { %4367 = vrsqrt.f32 %v1075_v43  ;;  %v4358_v16 = vpop.eup %4357 }
 0x573   : > { %4369 = vrsqrt.f32 %v1076_v60 }
 0x578   : > { %v4360_v25 = vpop.eup %4359 }
 0x598   : > { %v898_v58 = vpop.xlane.xlu1 %897  ;;  %v901_v15 = vpop.xlane.xlu0 %900 }
 0x599   : > { %v1101_v20 = vmul.f32 %v4348_v14, %v898_v58  ;;  %v1102_v55 = vmul.f32 %v4350_v13, %v901_v15  ;;  %v1062_v15 = vmul.f32 %v1034_v57, %v5356_v2  ;;  %v739_v2 = vand.u32 2147483647, %v5397_v63 }
 0x59b   : > { %1143 = vperm.xlu1 %4299, %v1101_v20   ;;  %v736_v20 = vmul.f32 -0.5, %v5397_v63  ;;  %v1078_v13 = vmax.f32 %v1062_v15, 1e-16  ;;  %vm740_vm7 = vcmp.lt.f32.partialorder %v739_v2, 0.0004427343 }
 0x59c   : > { %v904_v3 = vpop.xlane.xlu1 %903  ;;  %v907_v31 = vpop.xlane.xlu0 %906 }
 0x59d   : > { %v1103_v49 = vmul.f32 %v4352_v50, %v904_v3  ;;  %v1104_v58 = vmul.f32 %v4354_v39, %v907_v31  ;;  %v1064_v3 = vmul.f32 %v1038_v10, %v5360_v59  ;;  %v737_v36 = vadd.f32 1.0, %v736_v20 }
 0x59e   : > { %v735_v31 = vmul.f32 0.6931472, %v4360_v25  ;;  %v1066_v50 = vmul.f32 %v1042_v17, %v5362_v11  ;;  %4371 = vrsqrt.f32 %v1078_v13  ;;  %v751_v13 = vsel %vm750_vm9, %v5180_v33, -inf }
 0x59f   : > { %1146 = vperm.xlu1 %4299, %v1102_v55   ;;  %v4362_v55 = vpop.eup %4361  ;;  %v1080_v7 = vmax.f32 %v1064_v3, 1e-16  ;;  %vm3126_vm9 = vcmask 220352  }
 0x5a0   : > { %v916_v34 = vpop.xlane.xlu1 %915  ;;  %v919_v8 = vpop.xlane.xlu0 %918  ;;  %v1082_v60 = vmax.f32 %v1066_v50, 1e-16 }
 0x5a1   : > { %v4364_v57 = vpop.eup %4363  ;;  %4373 = vrsqrt.f32 %v1080_v7 }
 0x5a2   : > { %v4366_v43 = vpop.eup %4365  ;;  %4375 = vrsqrt.f32 %v1082_v60 }
 0x5a3   : > { %1149 = vperm.xlu1 %4299, %v1103_v49   ;;  %v738_v49 = vmul.f32 %v5397_v63, %v737_v36  ;;  %v4368_v59 = vpop.eup %4367  ;;  %v4708_v63 = vmov 36  }
 0x5a4   : > { %v910_v14 = vpop.xlane.xlu1 %909  ;;  %v913_v54 = vpop.xlane.xlu0 %912  ;;  %v1107_v39 = vmul.f32 %v4368_v59, %v916_v34 }
 0x5a5   : > { %v1105_v0 = vmul.f32 %v4356_v38, %v910_v14  ;;  %v1106_v48 = vmul.f32 %v4362_v55, %v913_v54  ;;  %v741_v9 = vsel %vm740_vm7, %v738_v49, %v735_v31  ;;  %v4370_v17 = vpop.eup %4369  ;;  %vm1308_vm7 = vcmask 138240  }
 0x5a6   : > { %v1108_v20 = vmul.f32 %v4370_v17, %v919_v8 }
 0x5a7   : > { %1152 = vperm.xlu1 %4299, %v1104_v58   ;;  %v726_v58 = vmax.f32 %v5180_v33, 0.0 }
 0x5a8   : > { %v922_v52 = vpop.xlane.xlu1 %921  ;;  %v925_v15 = vpop.xlane.xlu0 %924 }
 0x5a9   : > { %v1109_v23 = vmul.f32 %v4358_v16, %v922_v52  ;;  %v742_v11 = vadd.f32 %v741_v9, %v726_v58  ;;  %v4372_v38 = vpop.eup %4371 }
 0x5aa   : > { %v1110_v52 = vmul.f32 %v4372_v38, %v925_v15 }
 0x5ab   : > { %1167 = vperm.xlu0 %4300, %v1109_v23   ;;  %1155 = vperm.xlu1 %4299, %v1105_v0   ;;  %v5416_v34 = vsel %vm727_vm8, %v5180_v33, %v742_v11  ;;  %v4374_v25 = vpop.eup %4373  ;;  %vm2395_vm8 = vcmask 581152  }
 0x5ac   : > { %v928_v19 = vpop.xlane.xlu1 %927  ;;  %6890 = vst [vmem:[#allocation25_spill] sm:$0xff] %v5416_v34  ;;  %v931_v16 = vpop.xlane.xlu0 %930 }
 0x5ad   : > { %v1111_v62 = vmul.f32 %v4364_v57, %v928_v19  ;;  %v1112_v0 = vmul.f32 %v4374_v25, %v931_v16  ;;  %v4376_v8 = vpop.eup %4375 }
 0x5af   : > { %1173 = vperm.xlu0 %4300, %v1111_v62   ;;  %1158 = vperm.xlu1 %4299, %v1106_v48   ;;  %v1185_v48 = vand.u32 127, %v773_v27 }
 0x5b0   : > { %v934_v10 = vpop.xlane.xlu1 %933  ;;  %v937_v23 = vpop.xlane.xlu0 %936 }
 0x5b1   : > { %v1113_v14 = vmul.f32 %v4366_v43, %v934_v10  ;;  %v1114_v54 = vmul.f32 %v4376_v8, %v937_v23  ;;  %v1190_v7 = vadd.s32 4294967288, %v1185_v48  ;;  %v5422_v59 = vsub.s32 %v1185_v48, %v5174_v29 }
 0x5b3   : > { %1179 = vperm.xlu0 %4300, %v1113_v14   ;;  %1161 = vperm.xlu1 %4299, %v1107_v39   ;;  %6891 = vst [vmem:[#allocation26_spill] sm:$0xff] %v5422_v59  ;;  %v5425_v10 = vsub.s32 %v1190_v7, %v5174_v29 }
 0x5b5   : > { %6892 = vst [vmem:[#allocation27_spill] sm:$0xff] %v5425_v10 }
 0x5b7   : > { %4301 = vset.pattern.permute.xlu0 %v4708_v63  ;;  %1164 = vperm.xlu1 %4299, %v1108_v20  }
 0x5b8   : > { %1117 = vperm.xlu0 %4301, %v5416_v34  }
 0x5bb   : > { %1170 = vperm.xlu1 %4299, %v1110_v52  }
 0x5bf   : > { %1176 = vperm.xlu1 %4299, %v1112_v0  }
 0x5c3   : > { %1182 = vperm.xlu1 %4299, %v1114_v54  }
 0x5e7   : > { %752 = vmax.xlane.f32.xlu1 %v751_v13 }
 0x5eb   : > { %v1138_v3 = vpop.permute.xlu1 %1137 }
 0x5ec   : > { %v1141_v62 = vpop.permute.xlu0 %1140  ;;  %v1189_v60 = vrot.slane %v1138_v3, %v5422_v59 }
 0x5ed   : > { %v1194_v27 = vrot.slane %v1141_v62, %v5425_v10 }
 0x5ef   : > { %v1196_v0 = vsel %vm1195_vm10, %v1194_v27, %v1189_v60 }
 0x61a   : > { %v1144_v36 = vpop.permute.xlu1 %1143 }
 0x61b   : > { %v1200_v15 = vrot.slane %v1144_v36, %v5422_v59 }
 0x61e   : > { %v1147_v55 = vpop.permute.xlu1 %1146 }
 0x61f   : > { %v1204_v9 = vrot.slane %v1147_v55, %v5425_v10 }
 0x621   : > { %v1205_v20 = vsel %vm1195_vm10, %v1204_v9, %v1200_v15 }
 0x622   : > { %v1150_v2 = vpop.permute.xlu1 %1149  ;;  %v1261_v13 = vsel %vm1260_vm11, %v1205_v20, %v1196_v0 }
 0x623   : > { %v1209_v17 = vrot.slane %v1150_v2, %v5422_v59 }
 0x626   : > { %v1153_v57 = vpop.permute.xlu1 %1152 }
 0x627   : > { %v1213_v39 = vrot.slane %v1153_v57, %v5425_v10 }
 0x629   : > { %v1214_v16 = vsel %vm1195_vm10, %v1213_v39, %v1209_v17  ;;  %v4709_v17 = vmov 37  }
 0x62a   : > { %v1156_v19 = vpop.permute.xlu1 %1155  ;;  %v1168_v49 = vpop.permute.xlu0 %1167  ;;  %v1263_v2 = vsel %vm1262_vm12, %v1214_v16, %v1261_v13  ;;  %4302 = vset.pattern.permute.xlu0 %v4709_v17 }
 0x62b   : > { %v1218_v63 = vrot.slane %v1156_v19, %v5422_v59  ;;  %v1236_v23 = vrot.slane %v1168_v49, %v5422_v59 }
 0x62e   : > { %v1159_v31 = vpop.permute.xlu1 %1158  ;;  %v1174_v14 = vpop.permute.xlu0 %1173 }
 0x62f   : > { %v1222_v11 = vrot.slane %v1159_v31, %v5425_v10  ;;  %v1245_v3 = vrot.slane %v1174_v14, %v5422_v59 }
 0x631   : > { %v1223_v8 = vsel %vm1195_vm10, %v1222_v11, %v1218_v63 }
 0x632   : > { %v1162_v50 = vpop.permute.xlu1 %1161  ;;  %v1180_v36 = vpop.permute.xlu0 %1179  ;;  %v1265_v19 = vsel %vm1264_vm13, %v1223_v8, %v1263_v2  ;;  %v4712_v8 = vmov 39  }
 0x633   : > { %v1227_v52 = vrot.slane %v1162_v50, %v5422_v59  ;;  %v1254_v62 = vrot.slane %v1180_v36, %v5422_v59  ;;  %4303 = vset.pattern.permute.xlu1 %v4712_v8 }
 0x636   : > { %v1165_v43 = vpop.permute.xlu1 %1164 }
 0x637   : > { %v1231_v29 = vrot.slane %v1165_v43, %v5425_v10  ;;  %v1118_v39 = vpop.permute.xlu0 %1117 }
 0x639   : > { %v1232_v55 = vsel %vm1195_vm10, %v1231_v29, %v1227_v52 }
 0x63a   : > { %v1171_v58 = vpop.permute.xlu1 %1170  ;;  %v1267_v50 = vsel %vm1266_vm14, %v1232_v55, %v1265_v19  ;;  %v510_v55 = vld [vmem:[#allocation3] sm:$0xff]  ;;  %v4713_v19 = vmov 40  }
 0x63b   : > { %v1240_v38 = vrot.slane %v1171_v58, %v5425_v10 }
 0x63d   : > { %v1241_v57 = vsel %vm1195_vm10, %v1240_v38, %v1236_v23  ;;  %v5463_v23 = vsub.f32 1.0, %v5220_v53 }
 0x63e   : > { %v1177_v25 = vpop.permute.xlu1 %1176  ;;  %v1269_v49 = vsel %vm1268_vm15, %v1241_v57, %v1267_v50  ;;  %v4718_v50 = vmov 41  }
 0x63f   : > { %v1249_v54 = vrot.slane %v1177_v25, %v5425_v10  ;;  %6893 = vst [vmem:[#allocation28_spill] sm:$0xff] %v5463_v23 }
 0x641   : > { %v1250_v31 = vsel %vm1195_vm10, %v1249_v54, %v1245_v3 }
 0x642   : > { %v1183_v48 = vpop.permute.xlu1 %1182  ;;  %v1271_v9 = vsel %vm1270_vm0, %v1250_v31, %v1269_v49 }
 0x643   : > { %v1258_v7 = vrot.slane %v1183_v48, %v5425_v10 }
 0x645   : > { %v1259_v43 = vsel %vm1195_vm10, %v1258_v7, %v1254_v62  ;;  %v4715_v62 = vmov 38  }
 0x646   : > { %v1273_v14 = vsel %vm1272_vm1, %v1259_v43, %v1271_v9 }
 0x647   : > { %v1275_v58 = vmul.f32 %v1273_v14, %v1118_v39 }
 0x649   : > { %v1277_v60 = vsel %vm1276_vm2, %v1275_v58, -inf }
 0x64a   : > { %1278 = vmax.xlane.f32.xlu0 %v1277_v60 }
 0x674   : > { %v753_v27 = vpop.xlane.xlu1 %752 }
 0x675   : > { %v754_v15 = vsub.f32 %v5180_v33, %v753_v27 }
 0x677   : > { %v755_v11 = vmul.f32 1.442695, %v754_v15  ;;  %v5481_v15 = vadd.f32 1.0, %v5416_v34 }
 0x679   : > { %4377 = vpow2.f32 %v755_v11  ;;  %6894 = vst [vmem:[#allocation29_spill] sm:$0xff] %v5481_v15 }
 0x683   : > { %v4378_v29 = vpop.eup %4377 }
 0x684   : > { %758 = vrot.lane.b32.xlu1 %v4378_v29, %s4710_s30 }
 0x6d7   : > { %v1279_v20 = vpop.xlane.xlu0 %1278 }
 0x6d8   : > { %v1280_v63 = vsub.f32 %v1275_v58, %v1279_v20 }
 0x6da   : > { %v1281_v38 = vmul.f32 1.442695, %v1280_v63 }
 0x6dc   : > { %4379 = vpow2.f32 %v1281_v38 }
 0x6e6   : > { %v4380_v25 = vpop.eup %4379 }
 0x6e7   : > { %v1283_v0 = vsel %vm1276_vm2, %v4380_v25, 0.0 }
 0x6f6   : > { %v759_v16 = vpop.permute.xlu1 %758 }
 0x6f7   : > { %v762_v52 = vsel %vm761_vm3, %v759_v16, 0.0 }
 0x6f8   : > { %763 = vadd.xlane.f32.xlu0 %v762_v52 }
 0x6fc   : > { %1284 = vadd.xlane.f32.xlu0 %v1283_v0 }
 0x712   : > { %1291 = vperm.xlu0 %4302, %v5463_v23  }
 0x716   : > { %2411 = vrot.lane.b32.xlu0 %v5196_v41, %s4711_s27 }
 0x717   : > { %4308 = vset.pattern.permute.xlu0 %v6798_v21 }
 0x71a   : > { %2415 = vrot.lane.b32.xlu0 %v5201_v44, %s4711_s27 }
 0x71e   : > { %2419 = vrot.lane.b32.xlu0 %v5206_v46, %s4711_s27 }
 0x785   : > { %v764_v54 = vpop.xlane.xlu0 %763 }
 0x786   : > { %4381 = vrcp.f32 %v764_v54 }
 0x789   : > { %v1285_v53 = vpop.xlane.xlu0 %1284 }
 0x78a   : > { %4383 = vrcp.f32 %v1285_v53 }
 0x790   : > { %v4382_v13 = vpop.eup %4381 }
 0x791   : > { %v766_v3 = vmul.f32 %v4382_v13, %v4378_v29  ;;  %v1292_v2 = vpop.permute.xlu0 %1291 }
 0x792   : > { %v1294_v31 = vmul.f32 %v1292_v2, %v510_v55 }
 0x793   : > { %1317 = vperm.xlu1 %4303, %v766_v3  }
 0x794   : > { %v4384_v36 = vpop.eup %4383 }
 0x795   : > { %v1287_v57 = vmul.f32 %v4384_v36, %v4380_v25  ;;  %v5499_v55 = vpop.permute.xlu0 %2411 }
 0x797   : > { %4304 = vset.pattern.permute.xlu1 %v4713_v19  ;;  %v1295_v48 = vadd.f32 %v1294_v31, %v1287_v57 }
 0x798   : > { %1327 = vperm.xlu1 %4304, %v766_v3  }
 0x799   : > { %v5501_v2 = vpop.permute.xlu0 %2415 }
 0x79c   : > { %1297 = vrot.lane.b32.xlu1 %v1295_v48, %s4714_s21 }
 0x79d   : > { %4305 = vset.pattern.permute.xlu1 %v4715_v62  ;;  %v5503_v57 = vpop.permute.xlu0 %2419 }
 0x7a0   : > { %1300 = vrot.lane.b32.xlu1 %v1295_v48, %s4716_s17 }
 0x7a4   : > { %1303 = vrot.lane.b32.xlu1 %v1295_v48, %s4717_s15 }
 0x7a8   : > { %1312 = vperm.xlu1 %4305, %v766_v3  }
 0x7ac   : > { %4306 = vset.pattern.permute.xlu1 %v4718_v50 }
 0x812   : > { %v1318_v7 = vpop.permute.xlu1 %1317 }
 0x817   : > { %v1328_v49 = vpop.permute.xlu1 %1327 }
 0x81b   : > { %v1298_v43 = vpop.permute.xlu1 %1297 }
 0x81f   : > { %v1301_v9 = vpop.permute.xlu1 %1300 }
 0x820   : > { %v1307_v39 = vsel %vm1306_vm5, %v1298_v43, %v1301_v9 }
 0x823   : > { %v1304_v14 = vpop.permute.xlu1 %1303 }
 0x824   : > { %v1309_v58 = vsel %vm1308_vm7, %v1307_v39, %v1304_v14 }
 0x825   : > { %v1320_v60 = vmul.f32 %v1318_v7, %v1309_v58  ;;  %v1330_v27 = vmul.f32 %v1328_v49, %v1309_v58 }
 0x827   : > { %1322 = vrot.lane.b32.xlu1 %v1320_v60, %s4719_s0  ;;  %v1313_v11 = vpop.permute.xlu1 %1312 }
 0x828   : > { %v1315_v29 = vmul.f32 %v1313_v11, %v1309_v58 }
 0x82b   : > { %1332 = vrot.lane.b32.xlu1 %v1330_v27, %s6811_s24 }
 0x82f   : > { %1341 = vperm.xlu1 %4306, %v5481_v15  }
 0x833   : > { %2499 = vrot.lane.b32.xlu1 %v5184_v35, %s4711_s27 }
 0x834   : > { %4307 = vset.pattern.permute.xlu1 %v6798_v21 }
 0x837   : > { %2413 = vrot.lane.b32.xlu1 %v5252_v18, %s4711_s27 }
 0x83b   : > { %2417 = vrot.lane.b32.xlu1 %v5258_v24, %s4711_s27 }
 0x83f   : > { %2421 = vrot.lane.b32.xlu1 %v5263_v26, %s4711_s27 }
 0x843   : > { %2425 = vrot.lane.b32.xlu1 %v5268_v30, %s4711_s27 }
 0x899   : > { %v1323_v17 = vpop.permute.xlu1 %1322 }
 0x89a   : > { %v1325_v20 = vadd.f32 %v1323_v17, %v1315_v29 }
 0x89d   : > { %v1333_v63 = vpop.permute.xlu1 %1332 }
 0x89e   : > { %v1335_v38 = vadd.f32 %v1333_v63, %v1325_v20 }
 0x8a0   : > { %v1336_v16 = vmax.f32 %v1335_v38, 1e-30 }
 0x8a2   : > { %4385 = vlog2.f32 %v1336_v16 }
 0x8ac   : > { %v4386_v52 = vpop.eup %4385 }
 0x8ad   : > { %v1338_v25 = vmul.f32 0.6931472, %v4386_v52 }
 0x8ae   : > { %v1342_v0 = vpop.permute.xlu1 %1341 }
 0x8af   : > { %v1344_v8 = vmul.f32 %v1342_v0, %v1338_v25 }
 0x8b1   : > { %v1345_v54 = vmul.f32 1.442695, %v1344_v8 }
 0x8b2   : > { %v2500_v3 = vpop.permute.xlu1 %2499 }
 0x8b3   : > { %4387 = vpow2.f32 %v1345_v54  ;;  %v2502_v36 = vsel %vm534_vm4, %v2500_v3, 0.0 }
 0x8b6   : > { %v5514_v60 = vpop.permute.xlu1 %2413 }
 0x8ba   : > { %v5516_v27 = vpop.permute.xlu1 %2417 }
 0x8bd   : > { %v4388_v53 = vpop.eup %4387 }
 0x8be   : > { %v1347_v13 = vsel %vm1276_vm2, %v4388_v53, 0.0  ;;  %v5518_v11 = vpop.permute.xlu1 %2421 }
 0x8bf   : > { %1348 = vadd.xlane.f32.xlu0 %v1347_v13 }
 0x8c2   : > { %v5520_v17 = vpop.permute.xlu1 %2425 }
 0x8d5   : > { %2423 = vrot.lane.b32.xlu0 %v5211_v51, %s4711_s27  ;;  %s4725_s27 = smov 60  }
 0x8f4   : > { %2503 = vadd.xlane.f32.xlu0 %v2502_v36 }
 0x94c   : > { %v1349_v19 = vpop.xlane.xlu0 %1348 }
 0x94d   : > { %v1350_v31 = vadd.f32 1e-16, %v1349_v19 }
 0x94f   : > { %4389 = vrcp.f32 %v1350_v31 }
 0x950   : > { %v5533_v3 = vpop.permute.xlu0 %2423 }
 0x959   : > { %v4390_v48 = vpop.eup %4389 }
 0x95a   : > { %v1352_v62 = vmul.f32 %v4390_v48, %v4388_v53 }
 0x95c   : > { %3946 = vst.msk [vmem:[#allocation3] sm:$0xff] %vm1276_vm2, %v1352_v62  ;;  %v1356_v50 = vrot.slane %v1352_v62, %v5188_v37  ;;  %v1400_v7 = vrot.slane %v1352_v62, %v5392_v12  ;;  %v1433_v49 = vrot.slane %v1352_v62, %v5389_v45  ;;  %v1367_v43 = vrot.slane %v1352_v62, %v5365_v32 }
 0x95d   : > { %v1378_v9 = vrot.slane %v1352_v62, %v5371_v28  ;;  %v1389_v39 = vrot.slane %v1352_v62, %v5376_v56  ;;  %v1411_v14 = vrot.slane %v1352_v62, %v5380_v40  ;;  %v1422_v58 = vrot.slane %v1352_v62, %v5384_v42 }
 0x95e   : > { %1358 = vbcast.lane.b32.xlu1 %v1356_v50, 256  ;;  %1402 = vbcast.lane.b32.xlu0 %v1400_v7, 256 }
 0x962   : > { %1362 = vbcast.lane.b32.xlu1 %v1356_v50, 264  ;;  %1439 = vbcast.lane.b32.xlu0 %v1433_v49, 264 }
 0x966   : > { %1369 = vbcast.lane.b32.xlu1 %v1367_v43, 256 }
 0x96a   : > { %1373 = vbcast.lane.b32.xlu1 %v1367_v43, 264 }
 0x96e   : > { %1380 = vbcast.lane.b32.xlu1 %v1378_v9, 256 }
 0x972   : > { %1384 = vbcast.lane.b32.xlu1 %v1378_v9, 264 }
 0x976   : > { %1391 = vbcast.lane.b32.xlu1 %v1389_v39, 256 }
 0x97a   : > { %1395 = vbcast.lane.b32.xlu1 %v1389_v39, 264 }
 0x97e   : > { %1406 = vbcast.lane.b32.xlu1 %v1400_v7, 264 }
 0x981   : > { %v5537_v31 = vpop.xlane.xlu0 %2503 }
 0x982   : > { %1413 = vbcast.lane.b32.xlu1 %v1411_v14, 256 }
 0x986   : > { %1417 = vbcast.lane.b32.xlu1 %v1411_v14, 264 }
 0x98a   : > { %1424 = vbcast.lane.b32.xlu1 %v1422_v58, 256 }
 0x98e   : > { %1428 = vbcast.lane.b32.xlu1 %v1422_v58, 264 }
 0x992   : > { %1435 = vbcast.lane.b32.xlu1 %v1433_v49, 256 }
 0x9d0   : > { %v1359_v29 = vpop.permute.xlu1 %1358  ;;  %v1403_v50 = vpop.permute.xlu0 %1402 }
 0x9d1   : > { %v1651_v20 = vmul.f32 %v1359_v29, %v5196_v41  ;;  %v1659_v49 = vmul.f32 %v1403_v50, %v5206_v46 }
 0x9d3   : > { %1683 = vrot.lane.b32.xlu1 %v1651_v20, %s4721_s20 }
 0x9d4   : > { %v1363_v63 = vpop.permute.xlu1 %1362 }
 0x9d5   : > { %v1652_v38 = vmul.f32 %v1363_v63, %v5196_v41 }
 0x9d7   : > { %1685 = vrot.lane.b32.xlu0 %v1652_v38, %s4721_s20 }
 0x9d8   : > { %v1370_v16 = vpop.permute.xlu1 %1369 }
 0x9d9   : > { %v1653_v52 = vmul.f32 %v1370_v16, %v5252_v18 }
 0x9db   : > { %1687 = vrot.lane.b32.xlu1 %v1653_v52, %s4721_s20 }
 0x9dc   : > { %v1374_v25 = vpop.permute.xlu1 %1373 }
 0x9dd   : > { %v1654_v0 = vmul.f32 %v1374_v25, %v5252_v18 }
 0x9df   : > { %1689 = vrot.lane.b32.xlu0 %v1654_v0, %s4721_s20 }
 0x9e0   : > { %v1381_v8 = vpop.permute.xlu1 %1380 }
 0x9e1   : > { %v1655_v54 = vmul.f32 %v1381_v8, %v5201_v44 }
 0x9e3   : > { %1691 = vrot.lane.b32.xlu1 %v1655_v54, %s4721_s20  ;;  %v1440_v54 = vpop.permute.xlu0 %1439 }
 0x9e4   : > { %v1385_v53 = vpop.permute.xlu1 %1384 }
 0x9e5   : > { %v1656_v13 = vmul.f32 %v1385_v53, %v5201_v44 }
 0x9e7   : > { %1693 = vrot.lane.b32.xlu0 %v1656_v13, %s4721_s20  ;;  %v5555_v13 = vrot.slane %v5227_v61, %v5188_v37 }
 0x9e8   : > { %v1392_v36 = vpop.permute.xlu1 %1391 }
 0x9e9   : > { %v1657_v19 = vmul.f32 %v1392_v36, %v5258_v24  ;;  %6895 = vst [vmem:[#allocation30_spill] sm:$0xff] %v5555_v13 }
 0x9eb   : > { %1695 = vrot.lane.b32.xlu1 %v1657_v19, %s4721_s20 }
 0x9ec   : > { %v1396_v48 = vpop.permute.xlu1 %1395 }
 0x9ed   : > { %v1658_v62 = vmul.f32 %v1396_v48, %v5258_v24 }
 0x9ef   : > { %1697 = vrot.lane.b32.xlu0 %v1658_v62, %s4721_s20  ;;  %v1531_v62 = vmul.f32 %v5555_v13, %v1359_v29 }
 0x9f0   : > { %v1407_v7 = vpop.permute.xlu1 %1406 }
 0x9f1   : > { %v1660_v43 = vmul.f32 %v1407_v7, %v5206_v46 }
 0x9f3   : > { %1699 = vrot.lane.b32.xlu0 %v1659_v49, %s4721_s20  ;;  %1701 = vrot.lane.b32.xlu1 %v1660_v43, %s4721_s20  ;;  %v1666_v49 = vmul.f32 %v1440_v54, %v5268_v30  ;;  %v1532_v43 = vmul.f32 %v5555_v13, %v1363_v63 }
 0x9f4   : > { %v1414_v9 = vpop.permute.xlu1 %1413 }
 0x9f5   : > { %v1661_v39 = vmul.f32 %v1414_v9, %v5263_v26  ;;  %v1548_v22 = vsub.f32 1.0, %v1532_v43 }
 0x9f7   : > { %1703 = vrot.lane.b32.xlu0 %v1661_v39, %s4721_s20 }
 0x9f8   : > { %v1418_v14 = vpop.permute.xlu1 %1417 }
 0x9f9   : > { %v1662_v58 = vmul.f32 %v1418_v14, %v5263_v26 }
 0x9fb   : > { %1705 = vrot.lane.b32.xlu1 %v1662_v58, %s4721_s20  ;;  %v5564_v58 = vrot.slane %v5232_v5, %v5188_v37 }
 0x9fc   : > { %v1425_v20 = vpop.permute.xlu1 %1424 }
 0x9fd   : > { %v1663_v38 = vmul.f32 %v1425_v20, %v5211_v51  ;;  %6896 = vst [vmem:[#allocation31_spill] sm:$0xff] %v5564_v58  ;;  %v1533_v29 = vmul.f32 %v5564_v58, %v1370_v16  ;;  %v1534_v21 = vmul.f32 %v5564_v58, %v1374_v25  ;;  %v5582_v16 = vrot.slane %v1489_v47, %v5188_v37 }
 0x9ff   : > { %1707 = vrot.lane.b32.xlu0 %v1663_v38, %s4721_s20  ;;  %v1487_v38 = vcombine.high %v5227_v61, %v5227_v61  ;;  %v1549_v61 = vsub.f32 1.0, %v1533_v29  ;;  %6898 = vst [vmem:[#allocation33_spill] sm:$0xff] %v5582_v16 }
 0xa00   : > { %v1429_v52 = vpop.permute.xlu1 %1428 }
 0xa01   : > { %v1664_v0 = vmul.f32 %v1429_v52, %v5211_v51  ;;  %v5573_v63 = vrot.slane %v1487_v38, %v5188_v37  ;;  %v1538_v38 = vmul.f32 %v5582_v16, %v1396_v48 }
 0xa03   : > { %1709 = vrot.lane.b32.xlu1 %v1664_v0, %s4721_s20  ;;  %v1547_v0 = vsub.f32 1.0, %v1531_v62  ;;  %6897 = vst [vmem:[#allocation32_spill] sm:$0xff] %v5573_v63  ;;  %v1535_v62 = vmul.f32 %v5573_v63, %v1381_v8  ;;  %v1536_v43 = vmul.f32 %v5573_v63, %v1385_v53  ;;  %v1554_v8 = vsub.f32 1.0, %v1538_v38 }
 0xa04   : > { %v1436_v19 = vpop.permute.xlu1 %1435 }
 0xa05   : > { %v1665_v39 = vmul.f32 %v1436_v19, %v5268_v30  ;;  %v1551_v25 = vsub.f32 1.0, %v1535_v62  ;;  %v1552_v5 = vsub.f32 1.0, %v1536_v43 }
 0xa07   : > { %1713 = vrot.lane.b32.xlu1 %v1666_v49, %s4721_s20  ;;  %1711 = vrot.lane.b32.xlu0 %v1665_v39, %s4721_s20  ;;  %v1550_v49 = vsub.f32 1.0, %v1534_v21  ;;  %v1537_v39 = vmul.f32 %v5582_v16, %v1392_v36  ;;  %v1488_v36 = vcombine.high %v5230_v1, %v5230_v1  ;;  %s4726_s20 = smov 114  }
 0xa09   : > { %v1553_v21 = vsub.f32 1.0, %v1537_v39 }
 0xa0b   : > { %1579 = vrot.lane.b32.xlu1 %v1547_v0, %s4722_s22  ;;  %1581 = vrot.lane.b32.xlu0 %v1548_v22, %s4722_s22  ;;  %v5590_v22 = vrot.slane %v5230_v1, %v5188_v37  ;;  %v5598_v0 = vrot.slane %v5234_v6, %v5188_v37 }
 0xa0d   : > { %6899 = vst [vmem:[#allocation34_spill] sm:$0xff] %v5590_v22  ;;  %v1539_v47 = vmul.f32 %v5590_v22, %v1403_v50  ;;  %v1540_v53 = vmul.f32 %v5590_v22, %v1407_v7  ;;  %6900 = vst [vmem:[#allocation35_spill] sm:$0xff] %v5598_v0  ;;  %v1542_v50 = vmul.f32 %v5598_v0, %v1418_v14 }
 0xa0e   : > { %v1490_v7 = vcombine.high %v5234_v6, %v5234_v6 }
 0xa0f   : > { %1583 = vrot.lane.b32.xlu1 %v1549_v61, %s4722_s22  ;;  %1585 = vrot.lane.b32.xlu0 %v1550_v49, %s4722_s22  ;;  %v1555_v48 = vsub.f32 1.0, %v1539_v47  ;;  %v1556_v29 = vsub.f32 1.0, %v1540_v53  ;;  %v1541_v61 = vmul.f32 %v5598_v0, %v1414_v9  ;;  %v5609_v49 = vrot.slane %v1488_v36, %v5188_v37  ;;  %v4531_v0 = vld [vmem:[%s6785_s11 + $0x18] sm:$0xff] }
 0xa10   : > { %v1558_v62 = vsub.f32 1.0, %v1542_v50  ;;  %v5616_v9 = vrot.slane %v1490_v7, %v5188_v37 }
 0xa11   : > { %6901 = vst [vmem:[#allocation36_spill] sm:$0xff] %v5609_v49  ;;  %v1557_v1 = vsub.f32 1.0, %v1541_v61  ;;  %v1543_v43 = vmul.f32 %v5609_v49, %v1425_v20 }
 0xa12   : > { %6902 = vst [vmem:[#allocation37_spill] sm:$0xff] %v5616_v9  ;;  %v1546_v6 = vmul.f32 %v5616_v9, %v1440_v54  ;;  %v1545_v39 = vmul.f32 %v5616_v9, %v1436_v19 }
 0xa13   : > { %1587 = vrot.lane.b32.xlu1 %v1551_v25, %s4722_s22  ;;  %1589 = vrot.lane.b32.xlu0 %v1552_v5, %s4722_s22  ;;  %v1544_v25 = vmul.f32 %v5609_v49, %v1429_v52  ;;  %v1559_v14 = vsub.f32 1.0, %v1543_v43 }
 0xa14   : > { %v1562_v20 = vsub.f32 1.0, %v1546_v6  ;;  %v1561_v38 = vsub.f32 1.0, %v1545_v39  ;;  %v4530_v39 = vld [vmem:[%s6785_s11] sm:$0xff] }
 0xa15   : > { %v1560_v5 = vsub.f32 1.0, %v1544_v25 }
 0xa17   : > { %1591 = vrot.lane.b32.xlu1 %v1553_v21, %s4722_s22  ;;  %1593 = vrot.lane.b32.xlu0 %v1554_v8, %s4722_s22 }
 0xa1b   : > { %1595 = vrot.lane.b32.xlu1 %v1555_v48, %s4722_s22  ;;  %1597 = vrot.lane.b32.xlu0 %v1556_v29, %s4722_s22 }
 0xa1f   : > { %1599 = vrot.lane.b32.xlu1 %v1557_v1, %s4722_s22  ;;  %1601 = vrot.lane.b32.xlu0 %v1558_v62, %s4722_s22 }
 0xa23   : > { %1605 = vrot.lane.b32.xlu1 %v1560_v5, %s4722_s22  ;;  %1603 = vrot.lane.b32.xlu0 %v1559_v14, %s4722_s22  ;;  %v4529_v14 = vld [vmem:[%s6785_s11 + $0x8] sm:$0xff] }
 0xa27   : > { %1609 = vrot.lane.b32.xlu1 %v1562_v20, %s4722_s22  ;;  %1607 = vrot.lane.b32.xlu0 %v1561_v38, %s4722_s22  ;;  %s6931_s22 = smov 126  }
 0xa45   : > { %v1684_v47 = vpop.permute.xlu1 %1683 }
 0xa49   : > { %v1686_v52 = vpop.permute.xlu0 %1685 }
 0xa4d   : > { %v1688_v8 = vpop.permute.xlu1 %1687 }
 0xa51   : > { %v1690_v21 = vpop.permute.xlu0 %1689 }
 0xa55   : > { %v1692_v54 = vpop.permute.xlu1 %1691 }
 0xa59   : > { %v1694_v53 = vpop.permute.xlu0 %1693 }
 0xa5d   : > { %v1696_v48 = vpop.permute.xlu1 %1695 }
 0xa61   : > { %v1698_v36 = vpop.permute.xlu0 %1697 }
 0xa65   : > { %v5626_v29 = vpop.permute.xlu0 %1699  ;;  %v5628_v19 = vpop.permute.xlu1 %1701 }
 0xa69   : > { %v5630_v61 = vpop.permute.xlu0 %1703 }
 0xa6d   : > { %v5632_v50 = vpop.permute.xlu1 %1705 }
 0xa71   : > { %v5634_v7 = vpop.permute.xlu0 %1707 }
 0xa75   : > { %v5636_v1 = vpop.permute.xlu1 %1709 }
 0xa79   : > { %v5638_v62 = vpop.permute.xlu0 %1711  ;;  %v5640_v43 = vpop.permute.xlu1 %1713 }
 0xa7d   : > { %v1582_v25 = vpop.permute.xlu0 %1581  ;;  %v1580_v6 = vpop.permute.xlu1 %1579 }
 0xa7e   : > { %v1628_v5 = vmul.f32 %v4529_v14, %v1582_v25  ;;  %v1627_v20 = vmul.f32 %v4530_v39, %v1580_v6  ;;  %v4532_v25 = vld [vmem:[%s6785_s11 + $0x10] sm:$0xff] }
 0xa80   : > { %v5648_v38 = vadd.f32 %v1686_v52, %v1628_v5  ;;  %v5650_v4 = vadd.f32 %v1684_v47, %v1627_v20 }
 0xa81   : > { %v1586_v9 = vpop.permute.xlu0 %1585  ;;  %v1584_v49 = vpop.permute.xlu1 %1583 }
 0xa82   : > { %v1630_v22 = vmul.f32 %v4531_v0, %v1586_v9  ;;  %v1629_v14 = vmul.f32 %v4532_v25, %v1584_v49  ;;  %v1828_v16 = vmul.f32 %v5648_v38, %v5648_v38  ;;  %v1827_v52 = vmul.f32 %v5650_v4, %v5650_v4  ;;  %v4533_v49 = vld [vmem:[%s6785_s11 + $0x28] sm:$0xff] }
 0xa84   : > { %v5662_v47 = vadd.f32 %v1690_v21, %v1630_v22  ;;  %v5664_v6 = vadd.f32 %v1688_v8, %v1629_v14  ;;  %v1846_v5 = vsel %vm534_vm4, %v1828_v16, 0.0  ;;  %v1843_v39 = vsel %vm534_vm4, %v1827_v52, 0.0  ;;  %v4534_v22 = vld [vmem:[%s6785_s11 + $0x20] sm:$0xff] }
 0xa85   : > { %1847 = vadd.xlane.f32.xlu0 %v1846_v5  ;;  %v1590_v0 = vpop.permute.xlu0 %1589  ;;  %1844 = vadd.xlane.f32.xlu1 %v1843_v39  ;;  %v1588_v9 = vpop.permute.xlu1 %1587 }
 0xa86   : > { %v1632_v20 = vmul.f32 %v4533_v49, %v1590_v0  ;;  %v1631_v21 = vmul.f32 %v4534_v22, %v1588_v9  ;;  %v1829_v8 = vmul.f32 %v5664_v6, %v5664_v6  ;;  %v1830_v16 = vmul.f32 %v5662_v47, %v5662_v47  ;;  %v4535_v0 = vld [vmem:[%s6785_s11 + $0x38] sm:$0xff]  ;;  %v4536_v49 = vld [vmem:[%s6785_s11 + $0x30] sm:$0xff] }
 0xa88   : > { %v5678_v25 = vadd.f32 %v1694_v53, %v1632_v20  ;;  %v5680_v14 = vadd.f32 %v1692_v54, %v1631_v21  ;;  %v1849_v52 = vsel %vm534_vm4, %v1829_v8, 0.0  ;;  %v1852_v54 = vsel %vm534_vm4, %v1830_v16, 0.0 }
 0xa89   : > { %v1594_v5 = vpop.permute.xlu0 %1593  ;;  %1850 = vadd.xlane.f32.xlu0 %v1849_v52  ;;  %v1592_v39 = vpop.permute.xlu1 %1591 }
 0xa8a   : > { %6903 = vst [vmem:[#allocation38_spill] sm:$0xff] %v5680_v14  ;;  %v1634_v9 = vmul.f32 %v4535_v0, %v1594_v5  ;;  %v1633_v22 = vmul.f32 %v4536_v49, %v1592_v39  ;;  %v1831_v53 = vmul.f32 %v5680_v14, %v5680_v14  ;;  %v1832_v52 = vmul.f32 %v5678_v25, %v5678_v25  ;;  %v4537_v39 = vld [vmem:[%s6785_s11 + $0x48] sm:$0xff] }
 0xa8c   : > { %v5692_v20 = vadd.f32 %v1698_v36, %v1634_v9  ;;  %v5694_v21 = vadd.f32 %v1696_v48, %v1633_v22  ;;  %v1855_v8 = vsel %vm534_vm4, %v1831_v53, 0.0  ;;  %v4538_v36 = vld [vmem:[%s6785_s11 + $0x40] sm:$0xff] }
 0xa8d   : > { %v1598_v5 = vpop.permute.xlu0 %1597  ;;  %1853 = vadd.xlane.f32.xlu0 %v1852_v54  ;;  %1856 = vadd.xlane.f32.xlu1 %v1855_v8  ;;  %v1596_v0 = vpop.permute.xlu1 %1595  ;;  %v1858_v54 = vsel %vm534_vm4, %v1832_v52, 0.0 }
 0xa8e   : > { %6904 = vst [vmem:[#allocation39_spill] sm:$0xff] %v5692_v20  ;;  %6905 = vst [vmem:[#allocation40_spill] sm:$0xff] %v5694_v21  ;;  %v1636_v49 = vmul.f32 %v4537_v39, %v1598_v5  ;;  %v1635_v48 = vmul.f32 %v4538_v36, %v1596_v0  ;;  %v1833_v16 = vmul.f32 %v5694_v21, %v5694_v21  ;;  %v4539_v39 = vld [vmem:[%s6785_s11 + $0x58] sm:$0xff] }
 0xa8f   : > { %v1834_v9 = vmul.f32 %v5692_v20, %v5692_v20 }
 0xa90   : > { %v5710_v22 = vadd.f32 %v5628_v19, %v1636_v49  ;;  %v5713_v53 = vadd.f32 %v5626_v29, %v1635_v48  ;;  %v1861_v8 = vsel %vm534_vm4, %v1833_v16, 0.0  ;;  %v4540_v19 = vld [vmem:[%s6785_s11 + $0x50] sm:$0xff] }
 0xa91   : > { %v1602_v5 = vpop.permute.xlu0 %1601  ;;  %1859 = vadd.xlane.f32.xlu0 %v1858_v54  ;;  %1862 = vadd.xlane.f32.xlu1 %v1861_v8  ;;  %v1600_v0 = vpop.permute.xlu1 %1599  ;;  %v1864_v52 = vsel %vm534_vm4, %v1834_v9, 0.0 }
 0xa92   : > { %6906 = vst [vmem:[#allocation41_spill] sm:$0xff] %v5710_v22  ;;  %6907 = vst [vmem:[#allocation42_spill] sm:$0xff] %v5713_v53  ;;  %v1638_v36 = vmul.f32 %v4539_v39, %v1602_v5  ;;  %v1637_v49 = vmul.f32 %v4540_v19, %v1600_v0  ;;  %v1835_v29 = vmul.f32 %v5713_v53, %v5713_v53  ;;  %v4541_v39 = vld [vmem:[%s6785_s11 + $0x60] sm:$0xff] }
 0xa93   : > { %v1836_v8 = vmul.f32 %v5710_v22, %v5710_v22 }
 0xa94   : > { %v5727_v48 = vadd.f32 %v5632_v50, %v1638_v36  ;;  %v5730_v16 = vadd.f32 %v5630_v61, %v1637_v49  ;;  %v1867_v54 = vsel %vm534_vm4, %v1835_v29, 0.0  ;;  %v4542_v50 = vld [vmem:[%s6785_s11 + $0x68] sm:$0xff] }
 0xa95   : > { %v1604_v5 = vpop.permute.xlu0 %1603  ;;  %1865 = vadd.xlane.f32.xlu0 %v1864_v52  ;;  %1868 = vadd.xlane.f32.xlu1 %v1867_v54  ;;  %v1606_v0 = vpop.permute.xlu1 %1605  ;;  %v1870_v52 = vsel %vm534_vm4, %v1836_v8, 0.0 }
 0xa96   : > { %6908 = vst [vmem:[#allocation43_spill] sm:$0xff] %v5727_v48  ;;  %6909 = vst [vmem:[#allocation44_spill] sm:$0xff] %v5730_v16  ;;  %v1639_v9 = vmul.f32 %v4541_v39, %v1604_v5  ;;  %v1640_v61 = vmul.f32 %v4542_v50, %v1606_v0  ;;  %v1837_v36 = vmul.f32 %v5730_v16, %v5730_v16  ;;  %v4543_v39 = vld [vmem:[%s6785_s11 + $0x70] sm:$0xff] }
 0xa97   : > { %v1838_v19 = vmul.f32 %v5727_v48, %v5727_v48 }
 0xa98   : > { %v5746_v49 = vadd.f32 %v5634_v7, %v1639_v9  ;;  %v5749_v29 = vadd.f32 %v5636_v1, %v1640_v61  ;;  %v1873_v54 = vsel %vm534_vm4, %v1837_v36, 0.0  ;;  %v4544_v7 = vld [vmem:[%s6785_s11 + $0x78] sm:$0xff] }
 0xa99   : > { %v1608_v5 = vpop.permute.xlu0 %1607  ;;  %1871 = vadd.xlane.f32.xlu0 %v1870_v52  ;;  %1874 = vadd.xlane.f32.xlu1 %v1873_v54  ;;  %v1610_v0 = vpop.permute.xlu1 %1609  ;;  %v1876_v8 = vsel %vm534_vm4, %v1838_v19, 0.0 }
 0xa9a   : > { %6910 = vst [vmem:[#allocation45_spill] sm:$0xff] %v5746_v49  ;;  %6911 = vst [vmem:[#allocation46_spill] sm:$0xff] %v5749_v29  ;;  %v1641_v50 = vmul.f32 %v4543_v39, %v1608_v5  ;;  %v1642_v9 = vmul.f32 %v4544_v7, %v1610_v0  ;;  %v1839_v1 = vmul.f32 %v5746_v49, %v5746_v49 }
 0xa9b   : > { %v1840_v54 = vmul.f32 %v5749_v29, %v5749_v29  ;;  %v2437_v7 = vmul.f32 %v5514_v60, %v5664_v6 }
 0xa9c   : > { %v5763_v61 = vadd.f32 %v5638_v62, %v1641_v50  ;;  %v5766_v36 = vadd.f32 %v5640_v43, %v1642_v9  ;;  %v1879_v52 = vsel %vm534_vm4, %v1839_v1, 0.0  ;;  %v2435_v62 = vmul.f32 %v5499_v55, %v5650_v4 }
 0xa9d   : > { %1877 = vadd.xlane.f32.xlu0 %v1876_v8  ;;  %1880 = vadd.xlane.f32.xlu1 %v1879_v52  ;;  %v1882_v19 = vsel %vm534_vm4, %v1840_v54, 0.0  ;;  %v2436_v9 = vmul.f32 %v5499_v55, %v5648_v38  ;;  %v2457_v1 = vsel %vm534_vm4, %v2437_v7, 0.0  ;;  %v2439_v52 = vmul.f32 %v5501_v2, %v5680_v14 }
 0xa9e   : > { %6912 = vst [vmem:[#allocation47_spill] sm:$0xff] %v5763_v61  ;;  %6913 = vst [vmem:[#allocation48_spill] sm:$0xff] %v5766_v36  ;;  %v1841_v5 = vmul.f32 %v5763_v61, %v5763_v61  ;;  %v1842_v43 = vmul.f32 %v5766_v36, %v5766_v36  ;;  %v2451_v39 = vsel %vm534_vm4, %v2435_v62, 0.0  ;;  %v2438_v54 = vmul.f32 %v5514_v60, %v5662_v47 }
 0xa9f   : > { %v2454_v8 = vsel %vm534_vm4, %v2436_v9, 0.0  ;;  %v2441_v55 = vmul.f32 %v5516_v27, %v5694_v21  ;;  %v2443_v60 = vmul.f32 %v5503_v57, %v5713_v53  ;;  %v2444_v9 = vmul.f32 %v5503_v57, %v5710_v22 }
 0xaa0   : > { %v1885_v0 = vsel %vm534_vm4, %v1841_v5, 0.0  ;;  %v1888_v50 = vsel %vm534_vm4, %v1842_v43, 0.0  ;;  %v2463_v5 = vsel %vm534_vm4, %v2439_v52, 0.0  ;;  %v2446_v52 = vmul.f32 %v5518_v11, %v5727_v48 }
 0xaa1   : > { %1886 = vadd.xlane.f32.xlu1 %v1885_v0  ;;  %1883 = vadd.xlane.f32.xlu0 %v1882_v19  ;;  %v2460_v0 = vsel %vm534_vm4, %v2438_v54, 0.0  ;;  %v2440_v19 = vmul.f32 %v5501_v2, %v5678_v25  ;;  %v2469_v62 = vsel %vm534_vm4, %v2441_v55, 0.0  ;;  %v2445_v2 = vmul.f32 %v5518_v11, %v5730_v16 }
 0xaa2   : > { %v2449_v57 = vmul.f32 %v5520_v17, %v5763_v61  ;;  %v2450_v11 = vmul.f32 %v5520_v17, %v5766_v36 }
 0xaa3   : > { %v2466_v43 = vsel %vm534_vm4, %v2440_v19, 0.0 }
 0xaa4   : > { %v2493_v55 = vsel %vm534_vm4, %v2449_v57, 0.0 }
 0xaa5   : > { %2452 = vadd.xlane.f32.xlu1 %v2451_v39  ;;  %1889 = vadd.xlane.f32.xlu0 %v1888_v50  ;;  %v2442_v39 = vmul.f32 %v5516_v27, %v5692_v20  ;;  %v2475_v50 = vsel %vm534_vm4, %v2443_v60, 0.0  ;;  %v2447_v27 = vmul.f32 %v5533_v3, %v5746_v49 }
 0xaa7   : > { %v2472_v7 = vsel %vm534_vm4, %v2442_v39, 0.0  ;;  %v2487_v54 = vsel %vm534_vm4, %v2447_v27, 0.0 }
 0xaa9   : > { %2458 = vadd.xlane.f32.xlu1 %v2457_v1  ;;  %2455 = vadd.xlane.f32.xlu0 %v2454_v8  ;;  %v2481_v1 = vsel %vm534_vm4, %v2445_v2, 0.0  ;;  %v2478_v8 = vsel %vm534_vm4, %v2444_v9, 0.0 }
 0xaad   : > { %2464 = vadd.xlane.f32.xlu1 %v2463_v5  ;;  %2461 = vadd.xlane.f32.xlu0 %v2460_v0  ;;  %v2484_v5 = vsel %vm534_vm4, %v2446_v52, 0.0  ;;  %v2448_v0 = vmul.f32 %v5533_v3, %v5749_v29 }
 0xaaf   : > { %v2490_v19 = vsel %vm534_vm4, %v2448_v0, 0.0 }
 0xab1   : > { %2470 = vadd.xlane.f32.xlu1 %v2469_v62  ;;  %2467 = vadd.xlane.f32.xlu0 %v2466_v43  ;;  %v2496_v62 = vsel %vm534_vm4, %v2450_v11, 0.0 }
 0xab5   : > { %2476 = vadd.xlane.f32.xlu1 %v2475_v50  ;;  %2473 = vadd.xlane.f32.xlu0 %v2472_v7  ;;  %v2509_v7 = vrot.slane %v5537_v31, %v5188_v37 }
 0xab9   : > { %2482 = vadd.xlane.f32.xlu1 %v2481_v1  ;;  %2479 = vadd.xlane.f32.xlu0 %v2478_v8  ;;  %v2513_v1 = vrot.slane %v5537_v31, %v5365_v32 }
 0xabd   : > { %2488 = vadd.xlane.f32.xlu1 %v2487_v54  ;;  %2485 = vadd.xlane.f32.xlu0 %v2484_v5 }
 0xac1   : > { %2494 = vadd.xlane.f32.xlu1 %v2493_v55  ;;  %2491 = vadd.xlane.f32.xlu0 %v2490_v19 }
 0xac5   : > { %2497 = vadd.xlane.f32.xlu0 %v2496_v62  ;;  %v2517_v62 = vrot.slane %v5537_v31, %v5371_v28 }
 0xb12   : > { %v5826_v43 = vpop.xlane.xlu0 %1847  ;;  %v5828_v60 = vpop.xlane.xlu1 %1844 }
 0xb13   : > { %6914 = vst [vmem:[#allocation49_spill] sm:$0xff] %v5826_v43  ;;  %6915 = vst [vmem:[#allocation50_spill] sm:$0xff] %v5828_v60  ;;  %v2546_v9 = vmul.f32 %v2509_v7, %v5828_v60  ;;  %v2547_v52 = vmul.f32 %v2509_v7, %v5826_v43 }
 0xb15   : > { %v2562_v54 = vmax.f32 %v2546_v9, 1e-16  ;;  %v2563_v55 = vmax.f32 %v2547_v52, 1e-16 }
 0xb16   : > { %v5830_v39 = vpop.xlane.xlu0 %1850 }
 0xb17   : > { %6916 = vst [vmem:[#allocation51_spill] sm:$0xff] %v5830_v39  ;;  %v2548_v5 = vmul.f32 %v2513_v1, %v5830_v39  ;;  %4391 = vrsqrt.f32 %v2562_v54  ;;  %v2521_v54 = vrot.slane %v5537_v31, %v5376_v56 }
 0xb18   : > { %4393 = vrsqrt.f32 %v2563_v55 }
 0xb19   : > { %v2564_v19 = vmax.f32 %v2548_v5, 1e-16 }
 0xb1a   : > { %v5832_v3 = vpop.xlane.xlu0 %1853  ;;  %v5834_v50 = vpop.xlane.xlu1 %1856 }
 0xb1b   : > { %6917 = vst [vmem:[#allocation52_spill] sm:$0xff] %v5832_v3  ;;  %6918 = vst [vmem:[#allocation53_spill] sm:$0xff] %v5834_v50  ;;  %v2549_v11 = vmul.f32 %v2513_v1, %v5832_v3  ;;  %4395 = vrsqrt.f32 %v2564_v19  ;;  %v2550_v9 = vmul.f32 %v2517_v62, %v5834_v50  ;;  %v2529_v3 = vrot.slane %v5537_v31, %v5380_v40 }
 0xb1d   : > { %v2565_v7 = vmax.f32 %v2549_v11, 1e-16  ;;  %v2566_v52 = vmax.f32 %v2550_v9, 1e-16 }
 0xb1e   : > { %v5838_v2 = vpop.xlane.xlu0 %1859  ;;  %v5840_v17 = vpop.xlane.xlu1 %1862 }
 0xb1f   : > { %6919 = vst [vmem:[#allocation54_spill] sm:$0xff] %v5838_v2  ;;  %6920 = vst [vmem:[#allocation55_spill] sm:$0xff] %v5840_v17  ;;  %4397 = vrsqrt.f32 %v2565_v7  ;;  %v2551_v1 = vmul.f32 %v2517_v62, %v5838_v2  ;;  %v2552_v11 = vmul.f32 %v2521_v54, %v5840_v17  ;;  %v2533_v2 = vrot.slane %v5537_v31, %v5384_v42 }
 0xb20   : > { %4399 = vrsqrt.f32 %v2566_v52 }
 0xb21   : > { %v4392_v5 = vpop.eup %4391  ;;  %v2567_v58 = vmax.f32 %v2551_v1, 1e-16  ;;  %v2568_v28 = vmax.f32 %v2552_v11, 1e-16  ;;  %v2525_v1 = vrot.slane %v5537_v31, %v5392_v12 }
 0xb22   : > { %v5845_v8 = vpop.xlane.xlu0 %1865  ;;  %v5847_v27 = vpop.xlane.xlu1 %1868 }
 0xb23   : > { %6921 = vst [vmem:[#allocation56_spill] sm:$0xff] %v5845_v8  ;;  %6922 = vst [vmem:[#allocation57_spill] sm:$0xff] %v5847_v27  ;;  %v4394_v9 = vpop.eup %4393  ;;  %v2553_v40 = vmul.f32 %v2521_v54, %v5845_v8  ;;  %4401 = vrsqrt.f32 %v2567_v58 }
 0xb24   : > { %4403 = vrsqrt.f32 %v2568_v28 }
 0xb25   : > { %v4396_v62 = vpop.eup %4395  ;;  %v2569_v11 = vmax.f32 %v2553_v40, 1e-16 }
 0xb26   : > { %v5851_v57 = vpop.xlane.xlu0 %1871  ;;  %v5853_v0 = vpop.xlane.xlu1 %1874 }
 0xb27   : > { %6923 = vst [vmem:[#allocation58_spill] sm:$0xff] %v5851_v57  ;;  %6924 = vst [vmem:[#allocation59_spill] sm:$0xff] %v5853_v0  ;;  %v2556_v7 = vmul.f32 %v2529_v3, %v5853_v0 }
 0xb29   : > { %v2572_v17 = vmax.f32 %v2556_v7, 1e-16 }
 0xb2a   : > { %v5858_v60 = vpop.xlane.xlu0 %1877  ;;  %v5860_v63 = vpop.xlane.xlu1 %1880 }
 0xb2b   : > { %6925 = vst [vmem:[#allocation60_spill] sm:$0xff] %v5858_v60  ;;  %6926 = vst [vmem:[#allocation61_spill] sm:$0xff] %v5860_v63  ;;  %v2558_v52 = vmul.f32 %v2533_v2, %v5860_v63  ;;  %4405 = vrsqrt.f32 %v2572_v17 }
 0xb2c   : > { %4407 = vrsqrt.f32 %v2569_v11 }
 0xb2d   : > { %v2574_v58 = vmax.f32 %v2558_v52, 1e-16  ;;  %v2557_v52 = vmul.f32 %v2529_v3, %v5858_v60 }
 0xb2e   : > { %v5863_v39 = vpop.xlane.xlu0 %1883  ;;  %v5865_v43 = vpop.xlane.xlu1 %1886 }
 0xb2f   : > { %6927 = vst [vmem:[#allocation62_spill] sm:$0xff] %v5863_v39  ;;  %6928 = vst [vmem:[#allocation63_spill] sm:$0xff] %v5865_v43  ;;  %4409 = vrsqrt.f32 %v2574_v58  ;;  %v2559_v58 = vmul.f32 %v2533_v2, %v5863_v39 }
 0xb32   : > { %v5872_v55 = vpop.xlane.xlu0 %1889  ;;  %v2453_v19 = vpop.xlane.xlu1 %2452 }
 0xb33   : > { %6929 = vst [vmem:[#allocation64_spill] sm:$0xff] %v5872_v55  ;;  %v2594_v50 = vmul.f32 %v4392_v5, %v2453_v19  ;;  %v2537_v5 = vrot.slane %v5537_v31, %v5389_v45  ;;  %v2555_v31 = vmul.f32 %v2525_v1, %v5851_v57 }
 0xb35   : > { %2631 = vperm.xlu1 %4307, %v2594_v50   ;;  %v4398_v50 = vpop.eup %4397  ;;  %v2560_v54 = vmul.f32 %v2537_v5, %v5865_v43  ;;  %v2571_v17 = vmax.f32 %v2555_v31, 1e-16  ;;  %v2561_v31 = vmul.f32 %v2537_v5, %v5872_v55 }
 0xb36   : > { %v2456_v13 = vpop.xlane.xlu0 %2455  ;;  %v2459_v56 = vpop.xlane.xlu1 %2458 }
 0xb37   : > { %v2595_v32 = vmul.f32 %v4394_v9, %v2456_v13  ;;  %v2596_v37 = vmul.f32 %v4396_v62, %v2459_v56  ;;  %v2554_v13 = vmul.f32 %v2525_v1, %v5847_v27  ;;  %v4400_v7 = vpop.eup %4399  ;;  %v2576_v63 = vmax.f32 %v2560_v54, 1e-16  ;;  %v6952_v27 = vld [vmem:[#allocation30_spill] sm:$0xff] }
 0xb38   : > { %v4402_v28 = vpop.eup %4401  ;;  %v2573_v1 = vmax.f32 %v2557_v52, 1e-16  ;;  %v2577_v2 = vmax.f32 %v2561_v31, 1e-16 }
 0xb39   : > { %2634 = vperm.xlu0 %4308, %v2595_v32   ;;  %2637 = vperm.xlu1 %4307, %v2596_v37   ;;  %v2570_v37 = vmax.f32 %v2554_v13, 1e-16 }
 0xb3a   : > { %v2462_v19 = vpop.xlane.xlu0 %2461  ;;  %v2465_v0 = vpop.xlane.xlu1 %2464 }
 0xb3b   : > { %v2597_v56 = vmul.f32 %v4398_v50, %v2462_v19  ;;  %v2598_v62 = vmul.f32 %v4400_v7, %v2465_v0  ;;  %4411 = vrsqrt.f32 %v2570_v37 }
 0xb3c   : > { %4413 = vrsqrt.f32 %v2576_v63  ;;  %v2575_v63 = vmax.f32 %v2559_v58, 1e-16 }
 0xb3d   : > { %2640 = vperm.xlu1 %4307, %v2597_v56   ;;  %v4404_v56 = vpop.eup %4403  ;;  %4415 = vrsqrt.f32 %v2571_v17 }
 0xb3e   : > { %v2468_v9 = vpop.xlane.xlu0 %2467  ;;  %v2471_v32 = vpop.xlane.xlu1 %2470  ;;  %4417 = vrsqrt.f32 %v2573_v1 }
 0xb3f   : > { %v2599_v50 = vmul.f32 %v4402_v28, %v2468_v9  ;;  %v4406_v43 = vpop.eup %4405  ;;  %v2600_v13 = vmul.f32 %v4404_v56, %v2471_v32  ;;  %4419 = vrsqrt.f32 %v2575_v63 }
 0xb40   : > { %v4408_v54 = vpop.eup %4407  ;;  %4421 = vrsqrt.f32 %v2577_v2 }
 0xb41   : > { %2643 = vperm.xlu1 %4307, %v2598_v62   ;;  %v4410_v7 = vpop.eup %4409 }
 0xb42   : > { %v2477_v40 = vpop.xlane.xlu1 %2476  ;;  %v2474_v19 = vpop.xlane.xlu0 %2473 }
 0xb43   : > { %v2601_v62 = vmul.f32 %v4408_v54, %v2474_v19  ;;  %v4723_v19 = vmov 66  }
 0xb45   : > { %2646 = vperm.xlu1 %4307, %v2599_v50   ;;  %v4412_v28 = vpop.eup %4411 }
 0xb46   : > { %v2483_v11 = vpop.xlane.xlu1 %2482  ;;  %v2480_v9 = vpop.xlane.xlu0 %2479  ;;  %v2602_v50 = vmul.f32 %v4412_v28, %v2477_v40 }
 0xb47   : > { %v2604_v0 = vmul.f32 %v4406_v43, %v2483_v11  ;;  %v4414_v43 = vpop.eup %4413 }
 0xb48   : > { %v4416_v56 = vpop.eup %4415 }
 0xb49   : > { %2649 = vperm.xlu1 %4307, %v2600_v13   ;;  %2661 = vperm.xlu0 %4308, %v2604_v0   ;;  %v2603_v11 = vmul.f32 %v4416_v56, %v2480_v9  ;;  %v4418_v13 = vpop.eup %4417  ;;  %v2396_v9 = vsel %vm2395_vm8, %v5180_v33, -inf  ;;  %vm1747_vm8 = vcmask 105552  }
 0xb4a   : > { %v2489_v37 = vpop.xlane.xlu1 %2488  ;;  %v2486_v52 = vpop.xlane.xlu0 %2485 }
 0xb4b   : > { %v2606_v3 = vmul.f32 %v4410_v7, %v2489_v37  ;;  %v2605_v0 = vmul.f32 %v4418_v13, %v2486_v52  ;;  %v4420_v1 = vpop.eup %4419 }
 0xb4c   : > { %v4422_v54 = vpop.eup %4421 }
 0xb4d   : > { %2652 = vperm.xlu1 %4307, %v2601_v62   ;;  %2667 = vperm.xlu0 %4308, %v2606_v3  }
 0xb4e   : > { %v2495_v32 = vpop.xlane.xlu1 %2494  ;;  %v2492_v5 = vpop.xlane.xlu0 %2491 }
 0xb4f   : > { %v2608_v17 = vmul.f32 %v4414_v43, %v2495_v32  ;;  %v2607_v40 = vmul.f32 %v4420_v1, %v2492_v5 }
 0xb51   : > { %2655 = vperm.xlu1 %4307, %v2602_v50   ;;  %2673 = vperm.xlu0 %4308, %v2608_v17  }
 0xb52   : > { %v2498_v58 = vpop.xlane.xlu0 %2497 }
 0xb53   : > { %v2609_v7 = vmul.f32 %v4422_v54, %v2498_v58 }
 0xb55   : > { %2658 = vperm.xlu1 %4307, %v2603_v11   ;;  %4309 = vset.pattern.permute.xlu0 %v4723_v19 }
 0xb56   : > { %2611 = vperm.xlu0 %4309, %v5416_v34  }
 0xb59   : > { %2664 = vperm.xlu1 %4307, %v2605_v0  }
 0xb5d   : > { %2670 = vperm.xlu1 %4307, %v2607_v40  }
 0xb61   : > { %2676 = vperm.xlu1 %4307, %v2609_v7  }
 0xb85   : > { %2397 = vmax.xlane.f32.xlu1 %v2396_v9 }
 0xbb4   : > { %v2632_v37 = vpop.permute.xlu1 %2631 }
 0xbb5   : > { %v2681_v58 = vrot.slane %v2632_v37, %v5422_v59 }
 0xbb8   : > { %v2638_v62 = vpop.permute.xlu1 %2637  ;;  %v2635_v32 = vpop.permute.xlu0 %2634 }
 0xbb9   : > { %v2685_v13 = vrot.slane %v2635_v32, %v5425_v10  ;;  %v2690_v5 = vrot.slane %v2638_v62, %v5422_v59 }
 0xbbb   : > { %v2686_v62 = vsel %vm1195_vm10, %v2685_v13, %v2681_v58 }
 0xbbc   : > { %v2641_v3 = vpop.permute.xlu1 %2640 }
 0xbbd   : > { %v2694_v52 = vrot.slane %v2641_v3, %v5425_v10 }
 0xbbf   : > { %v2695_v54 = vsel %vm1195_vm10, %v2694_v52, %v2690_v5 }
 0xbc0   : > { %v2644_v63 = vpop.permute.xlu1 %2643  ;;  %v2750_v37 = vsel %vm1260_vm11, %v2695_v54, %v2686_v62 }
 0xbc1   : > { %v2699_v1 = vrot.slane %v2644_v63, %v5422_v59 }
 0xbc4   : > { %v2647_v31 = vpop.permute.xlu1 %2646 }
 0xbc5   : > { %v2703_v56 = vrot.slane %v2647_v31, %v5425_v10 }
 0xbc7   : > { %v2704_v3 = vsel %vm1195_vm10, %v2703_v56, %v2699_v1 }
 0xbc8   : > { %v2650_v28 = vpop.permute.xlu1 %2649  ;;  %v2662_v17 = vpop.permute.xlu0 %2661  ;;  %v2751_v56 = vsel %vm1262_vm12, %v2704_v3, %v2750_v37 }
 0xbc9   : > { %v2708_v7 = vrot.slane %v2650_v28, %v5422_v59 }
 0xbcc   : > { %v2653_v43 = vpop.permute.xlu1 %2652  ;;  %v2668_v11 = vpop.permute.xlu0 %2667 }
 0xbcd   : > { %v2712_v0 = vrot.slane %v2653_v43, %v5425_v10  ;;  %v2726_v43 = vrot.slane %v2662_v17, %v5422_v59  ;;  %v2735_v52 = vrot.slane %v2668_v11, %v5422_v59 }
 0xbcf   : > { %v2713_v63 = vsel %vm1195_vm10, %v2712_v0, %v2708_v7 }
 0xbd0   : > { %v2656_v50 = vpop.permute.xlu1 %2655  ;;  %v2674_v28 = vpop.permute.xlu0 %2673  ;;  %v2752_v5 = vsel %vm1264_vm13, %v2713_v63, %v2751_v56  ;;  %v4724_v63 = vmov 67  }
 0xbd1   : > { %v2717_v31 = vrot.slane %v2656_v50, %v5422_v59  ;;  %v2744_v0 = vrot.slane %v2674_v28, %v5422_v59  ;;  %4310 = vset.pattern.permute.xlu0 %v4724_v63 }
 0xbd4   : > { %v2659_v2 = vpop.permute.xlu1 %2658 }
 0xbd5   : > { %v2721_v40 = vrot.slane %v2659_v2, %v5425_v10  ;;  %v2612_v7 = vpop.permute.xlu0 %2611 }
 0xbd8   : > { %v2665_v19 = vpop.permute.xlu1 %2664 }
 0xbd9   : > { %v2730_v9 = vrot.slane %v2665_v19, %v5425_v10  ;;  %v2722_v19 = vsel %vm1195_vm10, %v2721_v40, %v2717_v31 }
 0xbda   : > { %v2753_v1 = vsel %vm1266_vm14, %v2722_v19, %v2752_v5 }
 0xbdb   : > { %v2731_v50 = vsel %vm1195_vm10, %v2730_v9, %v2726_v43 }
 0xbdc   : > { %v2671_v32 = vpop.permute.xlu1 %2670  ;;  %v2754_v11 = vsel %vm1268_vm15, %v2731_v50, %v2753_v1 }
 0xbdd   : > { %v2739_v2 = vrot.slane %v2671_v32, %v5425_v10 }
 0xbdf   : > { %v2740_v13 = vsel %vm1195_vm10, %v2739_v2, %v2735_v52 }
 0xbe0   : > { %v2677_v17 = vpop.permute.xlu1 %2676  ;;  %v2755_v40 = vsel %vm1270_vm0, %v2740_v13, %v2754_v11  ;;  %v6930_v13 = vmov 0  }
 0xbe1   : > { %v2748_v58 = vrot.slane %v2677_v17, %v5425_v10  ;;  %v4727_v17 = vmov 69  }
 0xbe2   : > { %4311 = vset.pattern.permute.xlu1 %v4727_v17 }
 0xbe3   : > { %v2749_v54 = vsel %vm1195_vm10, %v2748_v58, %v2744_v0  ;;  %v1763_v0 = vmul.f32 %v5650_v4, %v5196_v41  ;;  %v1765_v58 = vmul.f32 %v5664_v6, %v5252_v18 }
 0xbe4   : > { %v2756_v9 = vsel %vm1272_vm1, %v2749_v54, %v2755_v40  ;;  %v1767_v54 = vmul.f32 %v5680_v14, %v5201_v44 }
 0xbe5   : > { %v2758_v3 = vmul.f32 %v2756_v9, %v2612_v7  ;;  %v1779_v1 = vsel %vm534_vm4, %v1763_v0, 0.0  ;;  %v1785_v11 = vsel %vm534_vm4, %v1765_v58, 0.0  ;;  %v1769_v7 = vmul.f32 %v5694_v21, %v5258_v24  ;;  %v511_v0 = vld [vmem:[#allocation3 + $0x8] sm:$0xff] }
 0xbe6   : > { %v1791_v40 = vsel %vm534_vm4, %v1767_v54, 0.0 }
 0xbe7   : > { %v2759_v31 = vsel %vm1276_vm2, %v2758_v3, -inf  ;;  %v1797_v9 = vsel %vm534_vm4, %v1769_v7, 0.0  ;;  %v4729_v7 = vmov 68  }
 0xbe8   : > { %2760 = vmax.xlane.f32.xlu0 %v2759_v31 }
 0xc12   : > { %v2398_v32 = vpop.xlane.xlu1 %2397 }
 0xc13   : > { %v2399_v62 = vsub.f32 %v5180_v33, %v2398_v32  ;;  %v1773_v32 = vmul.f32 %v5730_v16, %v5263_v26 }
 0xc15   : > { %v2400_v43 = vmul.f32 1.442695, %v2399_v62  ;;  %v1809_v62 = vsel %vm534_vm4, %v1773_v32, 0.0 }
 0xc17   : > { %4423 = vpow2.f32 %v2400_v43  ;;  %v1775_v43 = vmul.f32 %v5746_v49, %v5211_v51 }
 0xc19   : > { %v1815_v63 = vsel %vm534_vm4, %v1775_v43, 0.0 }
 0xc21   : > { %v4424_v2 = vpop.eup %4423 }
 0xc22   : > { %2403 = vrot.lane.b32.xlu1 %v4424_v2, %s4725_s27  ;;  %s4736_s27 = smov 104  }
 0xc75   : > { %v2761_v37 = vpop.xlane.xlu0 %2760 }
 0xc76   : > { %v2762_v52 = vsub.f32 %v2758_v3, %v2761_v37  ;;  %v1771_v3 = vmul.f32 %v5713_v53, %v5206_v46  ;;  %v1777_v37 = vmul.f32 %v5763_v61, %v5268_v30 }
 0xc78   : > { %v2763_v28 = vmul.f32 1.442695, %v2762_v52  ;;  %v1803_v31 = vsel %vm534_vm4, %v1771_v3, 0.0  ;;  %v1821_v52 = vsel %vm534_vm4, %v1777_v37, 0.0 }
 0xc7a   : > { %4425 = vpow2.f32 %v2763_v28 }
 0xc84   : > { %v4426_v50 = vpop.eup %4425 }
 0xc85   : > { %v2765_v5 = vsel %vm1276_vm2, %v4426_v50, 0.0 }
 0xc94   : > { %v2404_v19 = vpop.permute.xlu1 %2403 }
 0xc95   : > { %v2406_v56 = vsel %vm761_vm3, %v2404_v19, 0.0 }
 0xc96   : > { %2407 = vadd.xlane.f32.xlu0 %v2406_v56 }
 0xc9a   : > { %2766 = vadd.xlane.f32.xlu0 %v2765_v5 }
 0xcb0   : > { %2771 = vperm.xlu0 %4310, %v5463_v23  }
 0xcb4   : > { %3294 = vrot.lane.b32.xlu0 %v5184_v35, %s4726_s20 }
 0xcb5   : > { %4316 = vset.pattern.permute.xlu0 %v6930_v13 }
 0xcb8   : > { %3144 = vrot.lane.b32.xlu0 %v5252_v18, %s4726_s20 }
 0xcbc   : > { %3148 = vrot.lane.b32.xlu0 %v5258_v24, %s4726_s20 }
 0xcc0   : > { %3152 = vrot.lane.b32.xlu0 %v5263_v26, %s4726_s20 }
 0xcc4   : > { %3156 = vrot.lane.b32.xlu0 %v5268_v30, %s4726_s20 }
 0xce3   : > { %1780 = vadd.xlane.f32.xlu0 %v1779_v1 }
 0xce7   : > { %1786 = vadd.xlane.f32.xlu0 %v1785_v11  ;;  %v4728_v11 = vmov 70  }
 0xceb   : > { %1792 = vadd.xlane.f32.xlu0 %v1791_v40 }
 0xcef   : > { %1798 = vadd.xlane.f32.xlu0 %v1797_v9 }
 0xcf3   : > { %1804 = vadd.xlane.f32.xlu0 %v1803_v31 }
 0xcf7   : > { %1810 = vadd.xlane.f32.xlu0 %v1809_v62 }
 0xcfb   : > { %1816 = vadd.xlane.f32.xlu0 %v1815_v63 }
 0xcff   : > { %1822 = vadd.xlane.f32.xlu0 %v1821_v52 }
 0xd23   : > { %v2408_v28 = vpop.xlane.xlu0 %2407 }
 0xd24   : > { %4427 = vrcp.f32 %v2408_v28 }
 0xd27   : > { %v2767_v19 = vpop.xlane.xlu0 %2766 }
 0xd28   : > { %4429 = vrcp.f32 %v2767_v19  ;;  %v4731_v19 = vmov 22  }
 0xd2e   : > { %v4428_v56 = vpop.eup %4427 }
 0xd2f   : > { %v2410_v5 = vmul.f32 %v4428_v56, %v4424_v2  ;;  %v2772_v1 = vpop.permute.xlu0 %2771  ;;  %v4730_v2 = vmov 71  }
 0xd30   : > { %v2774_v54 = vmul.f32 %v2772_v1, %v511_v0 }
 0xd31   : > { %2795 = vperm.xlu1 %4311, %v2410_v5  }
 0xd32   : > { %v4430_v17 = vpop.eup %4429 }
 0xd33   : > { %v2769_v58 = vmul.f32 %v4430_v17, %v4426_v50 }
 0xd35   : > { %4312 = vset.pattern.permute.xlu1 %v4728_v11  ;;  %v2775_v40 = vadd.f32 %v2774_v54, %v2769_v58 }
 0xd36   : > { %2805 = vperm.xlu1 %4312, %v2410_v5  }
 0xd3a   : > { %2777 = vrot.lane.b32.xlu1 %v2775_v40, %s4714_s21 }
 0xd3b   : > { %4313 = vset.pattern.permute.xlu1 %v4729_v7 }
 0xd3e   : > { %2780 = vrot.lane.b32.xlu1 %v2775_v40, %s4716_s17 }
 0xd42   : > { %2783 = vrot.lane.b32.xlu1 %v2775_v40, %s4717_s15 }
 0xd46   : > { %2790 = vperm.xlu1 %4313, %v2410_v5  }
 0xd4a   : > { %4314 = vset.pattern.permute.xlu1 %v4730_v2 }
 0xdb0   : > { %v2796_v9 = vpop.permute.xlu1 %2795 }
 0xdb5   : > { %v2806_v3 = vpop.permute.xlu1 %2805 }
 0xdb9   : > { %v2778_v31 = vpop.permute.xlu1 %2777 }
 0xdbd   : > { %v2781_v50 = vpop.permute.xlu1 %2780 }
 0xdbe   : > { %v2786_v32 = vsel %vm1306_vm5, %v2778_v31, %v2781_v50  ;;  %v1891_v50 = vsel %vm534_vm4, %v5184_v35, 0.0  ;;  %v1770_v35 = vmul.f32 %v5692_v20, %v5258_v24 }
 0xdc1   : > { %v2784_v62 = vpop.permute.xlu1 %2783 }
 0xdc2   : > { %v2787_v43 = vsel %vm1308_vm7, %v2786_v32, %v2784_v62  ;;  %v1764_v32 = vmul.f32 %v5648_v38, %v5196_v41 }
 0xdc3   : > { %v2798_v63 = vmul.f32 %v2796_v9, %v2787_v43  ;;  %v2808_v37 = vmul.f32 %v2806_v3, %v2787_v43  ;;  %v3295_v3 = vpop.permute.xlu0 %3294 }
 0xdc4   : > { %v3297_v31 = vsel %vm534_vm4, %v3295_v3, 0.0  ;;  %v1782_v62 = vsel %vm534_vm4, %v1764_v32, 0.0  ;;  %v6932_v32 = vld [vmem:[#allocation20_spill] sm:$0xff] }
 0xdc5   : > { %2800 = vrot.lane.b32.xlu1 %v2798_v63, %s4719_s0  ;;  %v2791_v52 = vpop.permute.xlu1 %2790 }
 0xdc6   : > { %v2793_v56 = vmul.f32 %v2791_v52, %v2787_v43  ;;  %v1766_v43 = vmul.f32 %v5662_v47, %v5252_v18 }
 0xdc8   : > { %v1788_v63 = vsel %vm534_vm4, %v1766_v43, 0.0 }
 0xdc9   : > { %2810 = vrot.lane.b32.xlu1 %v2808_v37, %s6931_s22  ;;  %v1768_v37 = vmul.f32 %v5678_v25, %v5201_v44 }
 0xdcb   : > { %v1794_v52 = vsel %vm534_vm4, %v1768_v37, 0.0 }
 0xdcd   : > { %2818 = vperm.xlu1 %4314, %v5481_v15  }
 0xdd1   : > { %3142 = vrot.lane.b32.xlu1 %v5196_v41, %s4726_s20 }
 0xdd2   : > { %4315 = vset.pattern.permute.xlu1 %v4731_v19  ;;  %v1772_v19 = vmul.f32 %v5710_v22, %v5206_v46 }
 0xdd5   : > { %3146 = vrot.lane.b32.xlu1 %v5201_v44, %s4726_s20 }
 0xdd9   : > { %3150 = vrot.lane.b32.xlu1 %v5206_v46, %s4726_s20 }
 0xe37   : > { %v2801_v28 = vpop.permute.xlu1 %2800 }
 0xe38   : > { %v2803_v5 = vadd.f32 %v2801_v28, %v2793_v56  ;;  %v1800_v28 = vsel %vm534_vm4, %v1770_v35, 0.0  ;;  %v1806_v56 = vsel %vm534_vm4, %v1772_v19, 0.0  ;;  %v6936_v19 = vld [vmem:[#allocation24_spill] sm:$0xff] }
 0xe3b   : > { %v2811_v17 = vpop.permute.xlu1 %2810 }
 0xe3c   : > { %v2813_v0 = vadd.f32 %v2811_v17, %v2803_v5  ;;  %v1774_v5 = vmul.f32 %v5727_v48, %v5263_v26 }
 0xe3e   : > { %v2814_v1 = vmax.f32 %v2813_v0, 1e-30  ;;  %v1812_v17 = vsel %vm534_vm4, %v1774_v5, 0.0  ;;  %v1776_v0 = vmul.f32 %v5749_v29, %v5211_v51 }
 0xe40   : > { %4431 = vlog2.f32 %v2814_v1  ;;  %v1818_v1 = vsel %vm534_vm4, %v1776_v0, 0.0 }
 0xe4a   : > { %v4432_v58 = vpop.eup %4431 }
 0xe4b   : > { %v2816_v11 = vmul.f32 0.6931472, %v4432_v58  ;;  %v1778_v58 = vmul.f32 %v5766_v36, %v5268_v30 }
 0xe4c   : > { %v2819_v54 = vpop.permute.xlu1 %2818 }
 0xe4d   : > { %v2821_v40 = vmul.f32 %v2819_v54, %v2816_v11  ;;  %v1824_v11 = vsel %vm534_vm4, %v1778_v58, 0.0 }
 0xe4f   : > { %v2822_v7 = vmul.f32 1.442695, %v2821_v40 }
 0xe50   : > { %v6009_v54 = vpop.permute.xlu1 %3142 }
 0xe51   : > { %4433 = vpow2.f32 %v2822_v7 }
 0xe54   : > { %v6011_v40 = vpop.permute.xlu1 %3146 }
 0xe58   : > { %v6013_v7 = vpop.permute.xlu1 %3150 }
 0xe5b   : > { %v4434_v2 = vpop.eup %4433 }
 0xe5c   : > { %v2824_v9 = vsel %vm1276_vm2, %v4434_v2, 0.0 }
 0xe5d   : > { %2825 = vadd.xlane.f32.xlu1 %v2824_v9 }
 0xe6e   : > { %3154 = vrot.lane.b32.xlu1 %v5211_v51, %s4726_s20  ;;  %s4738_s20 = smov 118  }
 0xe92   : > { %3298 = vadd.xlane.f32.xlu1 %v3297_v31 }
 0xe96   : > { %1892 = vadd.xlane.f32.xlu1 %v1891_v50 }
 0xe9a   : > { %1783 = vadd.xlane.f32.xlu1 %v1782_v62 }
 0xe9e   : > { %1789 = vadd.xlane.f32.xlu1 %v1788_v63  ;;  %v6933_v63 = vld [vmem:[#allocation21_spill] sm:$0xff] }
 0xea2   : > { %1795 = vadd.xlane.f32.xlu1 %v1794_v52  ;;  %v6934_v52 = vld [vmem:[#allocation22_spill] sm:$0xff] }
 0xea6   : > { %1801 = vadd.xlane.f32.xlu1 %v1800_v28 }
 0xeaa   : > { %1807 = vadd.xlane.f32.xlu1 %v1806_v56 }
 0xeae   : > { %1813 = vadd.xlane.f32.xlu1 %v1812_v17  ;;  %v6024_v17 = vpop.permute.xlu0 %3144 }
 0xeb2   : > { %1819 = vadd.xlane.f32.xlu1 %v1818_v1  ;;  %v6026_v0 = vpop.permute.xlu0 %3148 }
 0xeb6   : > { %1825 = vadd.xlane.f32.xlu1 %v1824_v11  ;;  %v6028_v1 = vpop.permute.xlu0 %3152 }
 0xeba   : > { %v6030_v58 = vpop.permute.xlu0 %3156 }
 0xebe   : > { %v6032_v11 = vpop.xlane.xlu0 %1780 }
 0xec7   : > { %3406 = vperm.xlu1 %4315, %v5416_v34  }
 0xecb   : > { %4317 = vset.pattern.permute.xlu1 %v6930_v13 }
 0xeea   : > { %v2826_v9 = vpop.xlane.xlu1 %2825 }
 0xeeb   : > { %v2827_v3 = vadd.f32 1e-16, %v2826_v9 }
 0xeed   : > { %4435 = vrcp.f32 %v2827_v3  ;;  %v6036_v3 = vpop.xlane.xlu0 %1786 }
 0xeee   : > { %v6034_v9 = vpop.permute.xlu1 %3154  ;;  %6937 = vst [vmem:[#allocation20_spill] sm:$0xff] %v6036_v3  ;;  %v6953_v3 = vld [vmem:[#allocation31_spill] sm:$0xff] }
 0xef7   : > { %v4436_v31 = vpop.eup %4435 }
 0xef8   : > { %v2829_v50 = vmul.f32 %v4436_v31, %v4434_v2  ;;  %v6935_v2 = vld [vmem:[#allocation23_spill] sm:$0xff] }
 0xefa   : > { %3947 = vst.msk [vmem:[#allocation3 + $0x8] sm:$0xff] %vm1276_vm2, %v2829_v50  ;;  %v2833_v62 = vrot.slane %v2829_v50, %v6932_v32  ;;  %v2877_v43 = vrot.slane %v2829_v50, %v5392_v12  ;;  %v2910_v13 = vrot.slane %v2829_v50, %v5389_v45  ;;  %v2844_v37 = vrot.slane %v2829_v50, %v6933_v63 }
 0xefb   : > { %v2855_v35 = vrot.slane %v2829_v50, %v6934_v52  ;;  %v2866_v28 = vrot.slane %v2829_v50, %v6935_v2  ;;  %v2888_v56 = vrot.slane %v2829_v50, %v6936_v19  ;;  %v2899_v5 = vrot.slane %v2829_v50, %v5384_v42  ;;  %v6040_v50 = vpop.xlane.xlu0 %1792 }
 0xefc   : > { %2835 = vbcast.lane.b32.xlu0 %v2833_v62, 256  ;;  %2883 = vbcast.lane.b32.xlu1 %v2877_v43, 264  ;;  %6938 = vst [vmem:[#allocation21_spill] sm:$0xff] %v6040_v50 }
 0xf00   : > { %2839 = vbcast.lane.b32.xlu0 %v2833_v62, 264  ;;  %2916 = vbcast.lane.b32.xlu1 %v2910_v13, 264 }
 0xf04   : > { %2846 = vbcast.lane.b32.xlu0 %v2844_v37, 256 }
 0xf08   : > { %2850 = vbcast.lane.b32.xlu0 %v2844_v37, 264 }
 0xf0c   : > { %2857 = vbcast.lane.b32.xlu0 %v2855_v35, 256 }
 0xf10   : > { %2861 = vbcast.lane.b32.xlu0 %v2855_v35, 264 }
 0xf14   : > { %2868 = vbcast.lane.b32.xlu0 %v2866_v28, 256 }
 0xf18   : > { %2872 = vbcast.lane.b32.xlu0 %v2866_v28, 264 }
 0xf1c   : > { %2879 = vbcast.lane.b32.xlu0 %v2877_v43, 256  ;;  %v6044_v43 = vpop.xlane.xlu0 %1798 }
 0xf1d   : > { %6939 = vst [vmem:[#allocation22_spill] sm:$0xff] %v6044_v43 }
 0xf1f   : > { %v6038_v31 = vpop.xlane.xlu1 %3298 }
 0xf20   : > { %2890 = vbcast.lane.b32.xlu0 %v2888_v56, 256 }
 0xf23   : > { %v6042_v62 = vpop.xlane.xlu1 %1892 }
 0xf24   : > { %2894 = vbcast.lane.b32.xlu0 %v2888_v56, 264 }
 0xf27   : > { %v6046_v37 = vpop.xlane.xlu1 %1783 }
 0xf28   : > { %2901 = vbcast.lane.b32.xlu0 %v2899_v5, 256 }
 0xf2b   : > { %v6050_v35 = vpop.xlane.xlu1 %1789 }
 0xf2c   : > { %2905 = vbcast.lane.b32.xlu0 %v2899_v5, 264  ;;  %6941 = vst [vmem:[#allocation24_spill] sm:$0xff] %v6050_v35 }
 0xf2f   : > { %v6054_v56 = vpop.xlane.xlu1 %1795 }
 0xf30   : > { %2912 = vbcast.lane.b32.xlu0 %v2910_v13, 256  ;;  %v6048_v13 = vpop.xlane.xlu0 %1804  ;;  %6943 = vst [vmem:[#allocation66_spill] sm:$0xff] %v6054_v56 }
 0xf31   : > { %6940 = vst [vmem:[#allocation23_spill] sm:$0xff] %v6048_v13 }
 0xf33   : > { %v6058_v15 = vpop.xlane.xlu1 %1801 }
 0xf34   : > { %v6052_v28 = vpop.xlane.xlu0 %1810  ;;  %6945 = vst [vmem:[#allocation68_spill] sm:$0xff] %v6058_v15 }
 0xf35   : > { %6942 = vst [vmem:[#allocation65_spill] sm:$0xff] %v6052_v28 }
 0xf37   : > { %v6062_v59 = vpop.xlane.xlu1 %1807 }
 0xf38   : > { %v6056_v5 = vpop.xlane.xlu0 %1816  ;;  %6947 = vst [vmem:[#allocation70_spill] sm:$0xff] %v6062_v59 }
 0xf39   : > { %6944 = vst [vmem:[#allocation67_spill] sm:$0xff] %v6056_v5 }
 0xf3b   : > { %v6066_v13 = vpop.xlane.xlu1 %1813 }
 0xf3c   : > { %v6060_v23 = vpop.xlane.xlu0 %1822  ;;  %6948 = vst [vmem:[#allocation71_spill] sm:$0xff] %v6066_v13 }
 0xf3d   : > { %6946 = vst [vmem:[#allocation69_spill] sm:$0xff] %v6060_v23 }
 0xf3f   : > { %v6071_v15 = vpop.xlane.xlu1 %1819 }
 0xf40   : > { %6949 = vst [vmem:[#allocation72_spill] sm:$0xff] %v6071_v15 }
 0xf6e   : > { %v2836_v10 = vpop.permute.xlu0 %2835 }
 0xf6f   : > { %v3030_v34 = vmul.f32 %v2836_v10, %v5196_v41  ;;  %v2918_v57 = vmul.f32 %v2836_v10, %v6952_v27 }
 0xf71   : > { %3062 = vrot.lane.b32.xlu0 %v3030_v34, %s4732_s23  ;;  %v6076_v34 = vpop.xlane.xlu1 %1825 }
 0xf72   : > { %v2840_v55 = vpop.permute.xlu0 %2839  ;;  %6950 = vst [vmem:[#allocation73_spill] sm:$0xff] %v6076_v34 }
 0xf73   : > { %v3031_v28 = vmul.f32 %v2840_v55, %v5196_v41 }
 0xf75   : > { %3064 = vrot.lane.b32.xlu1 %v3031_v28, %s4732_s23  ;;  %v6081_v60 = vpop.permute.xlu1 %3406 }
 0xf76   : > { %v2847_v5 = vpop.permute.xlu0 %2846  ;;  %6951 = vst [vmem:[#allocation74_spill] sm:$0xff] %v6081_v60 }
 0xf77   : > { %v3032_v39 = vmul.f32 %v2847_v5, %v5252_v18 }
 0xf79   : > { %3066 = vrot.lane.b32.xlu0 %v3032_v39, %s4732_s23 }
 0xf7a   : > { %v2851_v23 = vpop.permute.xlu0 %2850 }
 0xf7b   : > { %v3033_v59 = vmul.f32 %v2851_v23, %v5252_v18  ;;  %v2884_v18 = vpop.permute.xlu1 %2883  ;;  %v2921_v8 = vmul.f32 %v2851_v23, %v6953_v3 }
 0xf7c   : > { %v3039_v34 = vmul.f32 %v2884_v18, %v5206_v46 }
 0xf7d   : > { %3068 = vrot.lane.b32.xlu1 %v3033_v59, %s4732_s23 }
 0xf7e   : > { %v2858_v13 = vpop.permute.xlu0 %2857 }
 0xf7f   : > { %v3034_v43 = vmul.f32 %v2858_v13, %v5201_v44  ;;  %v2917_v33 = vpop.permute.xlu1 %2916 }
 0xf81   : > { %3070 = vrot.lane.b32.xlu0 %v3034_v43, %s4732_s23 }
 0xf82   : > { %v2862_v41 = vpop.permute.xlu0 %2861 }
 0xf83   : > { %v3035_v28 = vmul.f32 %v2862_v41, %v5201_v44 }
 0xf85   : > { %3072 = vrot.lane.b32.xlu1 %v3035_v28, %s4732_s23 }
 0xf86   : > { %v2869_v39 = vpop.permute.xlu0 %2868 }
 0xf87   : > { %v3036_v15 = vmul.f32 %v2869_v39, %v5258_v24 }
 0xf89   : > { %3074 = vrot.lane.b32.xlu0 %v3036_v15, %s4732_s23 }
 0xf8a   : > { %v2873_v59 = vpop.permute.xlu0 %2872 }
 0xf8b   : > { %v3037_v56 = vmul.f32 %v2873_v59, %v5258_v24 }
 0xf8d   : > { %3080 = vrot.lane.b32.xlu0 %v3039_v34, %s4732_s23  ;;  %3076 = vrot.lane.b32.xlu1 %v3037_v56, %s4732_s23 }
 0xf8e   : > { %v2880_v44 = vpop.permute.xlu0 %2879 }
 0xf8f   : > { %v3038_v43 = vmul.f32 %v2880_v44, %v5206_v46 }
 0xf91   : > { %3078 = vrot.lane.b32.xlu1 %v3038_v43, %s4732_s23 }
 0xf92   : > { %v2891_v28 = vpop.permute.xlu0 %2890 }
 0xf93   : > { %v3040_v60 = vmul.f32 %v2891_v28, %v5263_v26 }
 0xf95   : > { %3082 = vrot.lane.b32.xlu1 %v3040_v60, %s4732_s23  ;;  %v3045_v60 = vmul.f32 %v2917_v33, %v5268_v30 }
 0xf96   : > { %v2895_v15 = vpop.permute.xlu0 %2894 }
 0xf97   : > { %v3041_v50 = vmul.f32 %v2895_v15, %v5263_v26  ;;  %v2919_v26 = vmul.f32 %v2840_v55, %v6952_v27  ;;  %v6954_v27 = vld [vmem:[#allocation32_spill] sm:$0xff] }
 0xf98   : > { %v2922_v55 = vmul.f32 %v2858_v13, %v6954_v27 }
 0xf99   : > { %3084 = vrot.lane.b32.xlu0 %v3041_v50, %s4732_s23  ;;  %v2935_v35 = vsub.f32 1.0, %v2919_v26 }
 0xf9a   : > { %v2902_v24 = vpop.permute.xlu0 %2901 }
 0xf9b   : > { %v3042_v34 = vmul.f32 %v2902_v24, %v5211_v51 }
 0xf9d   : > { %3086 = vrot.lane.b32.xlu1 %v3042_v34, %s4732_s23  ;;  %v2934_v34 = vsub.f32 1.0, %v2918_v57  ;;  %v2938_v57 = vsub.f32 1.0, %v2922_v55  ;;  %v6959_v55 = vld [vmem:[#allocation37_spill] sm:$0xff] }
 0xf9e   : > { %v2906_v56 = vpop.permute.xlu0 %2905 }
 0xf9f   : > { %v3043_v46 = vmul.f32 %v2906_v56, %v5211_v51  ;;  %v2920_v51 = vmul.f32 %v2847_v5, %v6953_v3  ;;  %v6955_v5 = vld [vmem:[#allocation33_spill] sm:$0xff]  ;;  %v6956_v3 = vld [vmem:[#allocation34_spill] sm:$0xff] }
 0xfa0   : > { %v2924_v26 = vmul.f32 %v2869_v39, %v6955_v5  ;;  %v2925_v23 = vmul.f32 %v2873_v59, %v6955_v5 }
 0xfa1   : > { %3088 = vrot.lane.b32.xlu0 %v3043_v46, %s4732_s23  ;;  %v2936_v10 = vsub.f32 1.0, %v2920_v51  ;;  %v2937_v46 = vsub.f32 1.0, %v2921_v8  ;;  %v2927_v8 = vmul.f32 %v2884_v18, %v6956_v3  ;;  %v6957_v51 = vld [vmem:[#allocation35_spill] sm:$0xff] }
 0xfa2   : > { %v2913_v43 = vpop.permute.xlu0 %2912  ;;  %v2941_v13 = vsub.f32 1.0, %v2925_v23  ;;  %v2928_v39 = vmul.f32 %v2891_v28, %v6957_v51  ;;  %v2929_v59 = vmul.f32 %v2895_v15, %v6957_v51 }
 0xfa3   : > { %v3044_v50 = vmul.f32 %v2913_v43, %v5268_v30  ;;  %v2923_v30 = vmul.f32 %v2862_v41, %v6954_v27  ;;  %v2926_v41 = vmul.f32 %v2880_v44, %v6956_v3  ;;  %v2932_v15 = vmul.f32 %v2913_v43, %v6959_v55 }
 0xfa4   : > { %v2945_v18 = vsub.f32 1.0, %v2929_v59 }
 0xfa5   : > { %3092 = vrot.lane.b32.xlu0 %v3045_v60, %s4732_s23  ;;  %3090 = vrot.lane.b32.xlu1 %v3044_v50, %s4732_s23  ;;  %v2939_v60 = vsub.f32 1.0, %v2923_v30  ;;  %v2943_v50 = vsub.f32 1.0, %v2927_v8  ;;  %v2933_v30 = vmul.f32 %v2917_v33, %v6959_v55  ;;  %v2948_v5 = vsub.f32 1.0, %v2932_v15 }
 0xfa9   : > { %2966 = vrot.lane.b32.xlu0 %v2934_v34, %s4733_s16  ;;  %2968 = vrot.lane.b32.xlu1 %v2935_v35, %s4733_s16  ;;  %v2940_v35 = vsub.f32 1.0, %v2924_v26  ;;  %v2942_v34 = vsub.f32 1.0, %v2926_v41 }
 0xfad   : > { %2970 = vrot.lane.b32.xlu0 %v2936_v10, %s4733_s16  ;;  %2972 = vrot.lane.b32.xlu1 %v2937_v46, %s4733_s16  ;;  %v2944_v10 = vsub.f32 1.0, %v2928_v39  ;;  %v6958_v46 = vld [vmem:[#allocation36_spill] sm:$0xff] }
 0xfae   : > { %v2930_v27 = vmul.f32 %v2902_v24, %v6958_v46  ;;  %v2931_v44 = vmul.f32 %v2906_v56, %v6958_v46 }
 0xfb0   : > { %v2947_v28 = vsub.f32 1.0, %v2931_v44 }
 0xfb1   : > { %2974 = vrot.lane.b32.xlu0 %v2938_v57, %s4733_s16  ;;  %2976 = vrot.lane.b32.xlu1 %v2939_v60, %s4733_s16  ;;  %v2946_v57 = vsub.f32 1.0, %v2930_v27  ;;  %v2949_v60 = vsub.f32 1.0, %v2933_v30 }
 0xfb5   : > { %2978 = vrot.lane.b32.xlu0 %v2940_v35, %s4733_s16  ;;  %2980 = vrot.lane.b32.xlu1 %v2941_v13, %s4733_s16 }
 0xfb9   : > { %2982 = vrot.lane.b32.xlu0 %v2942_v34, %s4733_s16  ;;  %2984 = vrot.lane.b32.xlu1 %v2943_v50, %s4733_s16 }
 0xfbd   : > { %2986 = vrot.lane.b32.xlu0 %v2944_v10, %s4733_s16  ;;  %2988 = vrot.lane.b32.xlu1 %v2945_v18, %s4733_s16 }
 0xfc1   : > { %2992 = vrot.lane.b32.xlu0 %v2947_v28, %s4733_s16  ;;  %2990 = vrot.lane.b32.xlu1 %v2946_v57, %s4733_s16 }
 0xfc5   : > { %2996 = vrot.lane.b32.xlu0 %v2949_v60, %s4733_s16  ;;  %2994 = vrot.lane.b32.xlu1 %v2948_v5, %s4733_s16 }
 0xfe3   : > { %v3063_v56 = vpop.permute.xlu0 %3062 }
 0xfe7   : > { %v3065_v24 = vpop.permute.xlu1 %3064 }
 0xfeb   : > { %v3067_v23 = vpop.permute.xlu0 %3066 }
 0xfef   : > { %v3069_v26 = vpop.permute.xlu1 %3068 }
 0xff3   : > { %v3071_v33 = vpop.permute.xlu0 %3070 }
 0xff7   : > { %v3073_v3 = vpop.permute.xlu1 %3072 }
 0xffb   : > { %v3075_v35 = vpop.permute.xlu0 %3074 }
 0xfff   : > { %v3077_v8 = vpop.permute.xlu1 %3076  ;;  %v3081_v43 = vpop.permute.xlu0 %3080 }
0x1003   : > { %v6136_v13 = vpop.permute.xlu1 %3078 }
0x1007   : > { %v6138_v41 = vpop.permute.xlu1 %3082 }
0x100b   : > { %v6140_v50 = vpop.permute.xlu0 %3084 }
0x100f   : > { %v6142_v34 = vpop.permute.xlu1 %3086 }
0x1013   : > { %v6144_v51 = vpop.permute.xlu0 %3088 }
0x1017   : > { %v6146_v39 = vpop.permute.xlu1 %3090  ;;  %v6148_v59 = vpop.permute.xlu0 %3092 }
0x101b   : > { %v2969_v10 = vpop.permute.xlu1 %2968  ;;  %v2967_v18 = vpop.permute.xlu0 %2966 }
0x101c   : > { %v3015_v46 = vmul.f32 %v2969_v10, %v5648_v38  ;;  %v3014_v27 = vmul.f32 %v2967_v18, %v5650_v4 }
0x101e   : > { %v6152_v44 = vadd.f32 %v3065_v24, %v3015_v46  ;;  %v6154_v55 = vadd.f32 %v3063_v56, %v3014_v27 }
0x101f   : > { %v2973_v30 = vpop.permute.xlu1 %2972  ;;  %v2971_v57 = vpop.permute.xlu0 %2970 }
0x1020   : > { %3929 = vst.msk [vmem:[%s6785_s11 + $0x8] sm:$0xff] %vm534_vm4, %v6152_v44  ;;  %3928 = vst.msk [vmem:[%s6785_s11] sm:$0xff] %vm534_vm4, %v6154_v55  ;;  %v3017_v28 = vmul.f32 %v2973_v30, %v5662_v47  ;;  %v3016_v15 = vmul.f32 %v2971_v57, %v5664_v6  ;;  %v3230_v60 = vmul.f32 %v6154_v55, %v6154_v55 }
0x1021   : > { %v3231_v10 = vmul.f32 %v6152_v44, %v6152_v44 }
0x1022   : > { %v6170_v5 = vadd.f32 %v3069_v26, %v3017_v28  ;;  %v6172_v24 = vadd.f32 %v3067_v23, %v3016_v15  ;;  %v3246_v56 = vsel %vm534_vm4, %v3230_v60, 0.0 }
0x1023   : > { %v2977_v18 = vpop.permute.xlu1 %2976  ;;  %3247 = vadd.xlane.f32.xlu0 %v3246_v56  ;;  %v2975_v46 = vpop.permute.xlu0 %2974  ;;  %v3249_v15 = vsel %vm534_vm4, %v3231_v10, 0.0 }
0x1024   : > { %3931 = vst.msk [vmem:[%s6785_s11 + $0x18] sm:$0xff] %vm534_vm4, %v6170_v5  ;;  %3930 = vst.msk [vmem:[%s6785_s11 + $0x10] sm:$0xff] %vm534_vm4, %v6172_v24  ;;  %v3019_v26 = vmul.f32 %v2977_v18, %v5678_v25  ;;  %v3018_v23 = vmul.f32 %v2975_v46, %v5680_v14  ;;  %v3232_v27 = vmul.f32 %v6172_v24, %v6172_v24 }
0x1025   : > { %v3233_v30 = vmul.f32 %v6170_v5, %v6170_v5 }
0x1026   : > { %v6193_v57 = vadd.f32 %v3073_v3, %v3019_v26  ;;  %v6195_v28 = vadd.f32 %v3071_v33, %v3018_v23  ;;  %v3252_v60 = vsel %vm534_vm4, %v3232_v27, 0.0 }
0x1027   : > { %v2981_v56 = vpop.permute.xlu1 %2980  ;;  %3250 = vadd.xlane.f32.xlu0 %v3249_v15  ;;  %3253 = vadd.xlane.f32.xlu1 %v3252_v60  ;;  %v2979_v18 = vpop.permute.xlu0 %2978  ;;  %v3255_v46 = vsel %vm534_vm4, %v3233_v30, 0.0 }
0x1028   : > { %3933 = vst.msk [vmem:[%s6785_s11 + $0x28] sm:$0xff] %vm534_vm4, %v6193_v57  ;;  %3932 = vst.msk [vmem:[%s6785_s11 + $0x20] sm:$0xff] %vm534_vm4, %v6195_v28  ;;  %v3021_v3 = vmul.f32 %v2981_v56, %v5692_v20  ;;  %v3020_v33 = vmul.f32 %v2979_v18, %v5694_v21  ;;  %v3234_v10 = vmul.f32 %v6195_v28, %v6195_v28 }
0x1029   : > { %v3235_v15 = vmul.f32 %v6193_v57, %v6193_v57 }
0x102a   : > { %v6214_v26 = vadd.f32 %v3077_v8, %v3021_v3  ;;  %v6216_v23 = vadd.f32 %v3075_v35, %v3020_v33  ;;  %v3258_v27 = vsel %vm534_vm4, %v3234_v10, 0.0 }
0x102b   : > { %v2985_v60 = vpop.permute.xlu1 %2984  ;;  %3256 = vadd.xlane.f32.xlu0 %v3255_v46  ;;  %3259 = vadd.xlane.f32.xlu1 %v3258_v27  ;;  %v2983_v56 = vpop.permute.xlu0 %2982  ;;  %v3261_v10 = vsel %vm534_vm4, %v3235_v15, 0.0 }
0x102c   : > { %3935 = vst.msk [vmem:[%s6785_s11 + $0x38] sm:$0xff] %vm534_vm4, %v6214_v26  ;;  %3934 = vst.msk [vmem:[%s6785_s11 + $0x30] sm:$0xff] %vm534_vm4, %v6216_v23  ;;  %v3023_v8 = vmul.f32 %v2985_v60, %v5710_v22  ;;  %v3022_v35 = vmul.f32 %v2983_v56, %v5713_v53  ;;  %v3236_v30 = vmul.f32 %v6216_v23, %v6216_v23 }
0x102d   : > { %v3237_v18 = vmul.f32 %v6214_v26, %v6214_v26 }
0x102e   : > { %v6237_v3 = vadd.f32 %v3081_v43, %v3023_v8  ;;  %v6240_v33 = vadd.f32 %v6136_v13, %v3022_v35  ;;  %v3264_v46 = vsel %vm534_vm4, %v3236_v30, 0.0 }
0x102f   : > { %v2989_v27 = vpop.permute.xlu1 %2988  ;;  %3262 = vadd.xlane.f32.xlu0 %v3261_v10  ;;  %3265 = vadd.xlane.f32.xlu1 %v3264_v46  ;;  %v2987_v60 = vpop.permute.xlu0 %2986  ;;  %v3267_v56 = vsel %vm534_vm4, %v3237_v18, 0.0 }
0x1030   : > { %3937 = vst.msk [vmem:[%s6785_s11 + $0x48] sm:$0xff] %vm534_vm4, %v6237_v3  ;;  %3936 = vst.msk [vmem:[%s6785_s11 + $0x40] sm:$0xff] %vm534_vm4, %v6240_v33  ;;  %v3025_v13 = vmul.f32 %v2989_v27, %v5727_v48  ;;  %v3024_v43 = vmul.f32 %v2987_v60, %v5730_v16  ;;  %v3238_v15 = vmul.f32 %v6240_v33, %v6240_v33 }
0x1031   : > { %v3239_v10 = vmul.f32 %v6237_v3, %v6237_v3 }
0x1032   : > { %v6260_v8 = vadd.f32 %v6140_v50, %v3025_v13  ;;  %v6263_v35 = vadd.f32 %v6138_v41, %v3024_v43  ;;  %v3270_v30 = vsel %vm534_vm4, %v3238_v15, 0.0 }
0x1033   : > { %v2991_v46 = vpop.permute.xlu1 %2990  ;;  %3268 = vadd.xlane.f32.xlu0 %v3267_v56  ;;  %3271 = vadd.xlane.f32.xlu1 %v3270_v30  ;;  %v2993_v27 = vpop.permute.xlu0 %2992  ;;  %v3273_v15 = vsel %vm534_vm4, %v3239_v10, 0.0 }
0x1034   : > { %3939 = vst.msk [vmem:[%s6785_s11 + $0x58] sm:$0xff] %vm534_vm4, %v6260_v8  ;;  %3938 = vst.msk [vmem:[%s6785_s11 + $0x50] sm:$0xff] %vm534_vm4, %v6263_v35  ;;  %v3026_v41 = vmul.f32 %v2991_v46, %v5746_v49  ;;  %v3027_v50 = vmul.f32 %v2993_v27, %v5749_v29  ;;  %v3240_v18 = vmul.f32 %v6263_v35, %v6263_v35 }
0x1035   : > { %v3241_v60 = vmul.f32 %v6260_v8, %v6260_v8 }
0x1036   : > { %v6285_v13 = vadd.f32 %v6142_v34, %v3026_v41  ;;  %v6288_v43 = vadd.f32 %v6144_v51, %v3027_v50  ;;  %v3276_v56 = vsel %vm534_vm4, %v3240_v18, 0.0 }
0x1037   : > { %v2995_v30 = vpop.permute.xlu1 %2994  ;;  %3274 = vadd.xlane.f32.xlu0 %v3273_v15  ;;  %3277 = vadd.xlane.f32.xlu1 %v3276_v56  ;;  %v2997_v46 = vpop.permute.xlu0 %2996  ;;  %v3279_v27 = vsel %vm534_vm4, %v3241_v60, 0.0  ;;  %v3166_v56 = vmul.f32 %v6009_v54, %v6154_v55 }
0x1038   : > { %3940 = vst.msk [vmem:[%s6785_s11 + $0x60] sm:$0xff] %vm534_vm4, %v6285_v13  ;;  %3941 = vst.msk [vmem:[%s6785_s11 + $0x68] sm:$0xff] %vm534_vm4, %v6288_v43  ;;  %v3028_v34 = vmul.f32 %v2995_v30, %v5763_v61  ;;  %v3029_v51 = vmul.f32 %v2997_v46, %v5766_v36  ;;  %v3242_v10 = vmul.f32 %v6285_v13, %v6285_v13 }
0x1039   : > { %v3243_v15 = vmul.f32 %v6288_v43, %v6288_v43  ;;  %v3182_v46 = vsel %vm534_vm4, %v3166_v56, 0.0  ;;  %v3171_v56 = vmul.f32 %v6011_v40, %v6193_v57 }
0x103a   : > { %v6308_v41 = vadd.f32 %v6146_v39, %v3028_v34  ;;  %v6311_v50 = vadd.f32 %v6148_v59, %v3029_v51  ;;  %v3282_v18 = vsel %vm534_vm4, %v3242_v10, 0.0  ;;  %v3168_v51 = vmul.f32 %v6024_v17, %v6172_v24 }
0x103b   : > { %3280 = vadd.xlane.f32.xlu0 %v3279_v27  ;;  %3283 = vadd.xlane.f32.xlu1 %v3282_v18  ;;  %v3285_v60 = vsel %vm534_vm4, %v3243_v15, 0.0  ;;  %v3167_v10 = vmul.f32 %v6009_v54, %v6152_v44  ;;  %v3170_v15 = vmul.f32 %v6011_v40, %v6195_v28  ;;  %v3172_v54 = vmul.f32 %v6026_v0, %v6216_v23 }
0x103c   : > { %3942 = vst.msk [vmem:[%s6785_s11 + $0x70] sm:$0xff] %vm534_vm4, %v6308_v41  ;;  %3943 = vst.msk [vmem:[%s6785_s11 + $0x78] sm:$0xff] %vm534_vm4, %v6311_v50  ;;  %v3244_v39 = vmul.f32 %v6308_v41, %v6308_v41  ;;  %v3245_v30 = vmul.f32 %v6311_v50, %v6311_v50  ;;  %v3188_v27 = vsel %vm534_vm4, %v3168_v51, 0.0  ;;  %v3176_v40 = vmul.f32 %v6028_v1, %v6263_v35 }
0x103d   : > { %v3185_v18 = vsel %vm534_vm4, %v3167_v10, 0.0 }
0x103e   : > { %v3288_v59 = vsel %vm534_vm4, %v3244_v39, 0.0  ;;  %v3291_v34 = vsel %vm534_vm4, %v3245_v30, 0.0  ;;  %v3169_v39 = vmul.f32 %v6024_v17, %v6170_v5  ;;  %v3200_v30 = vsel %vm534_vm4, %v3172_v54, 0.0 }
0x103f   : > { %3289 = vadd.xlane.f32.xlu1 %v3288_v59  ;;  %3286 = vadd.xlane.f32.xlu0 %v3285_v60  ;;  %v3194_v59 = vsel %vm534_vm4, %v3170_v15, 0.0  ;;  %v3174_v17 = vmul.f32 %v6013_v7, %v6240_v33  ;;  %v3179_v54 = vmul.f32 %v6034_v9, %v6288_v43 }
0x1040   : > { %v3191_v60 = vsel %vm534_vm4, %v3169_v39, 0.0  ;;  %v3177_v39 = vmul.f32 %v6028_v1, %v6260_v8  ;;  %v3181_v1 = vmul.f32 %v6030_v58, %v6311_v50 }
0x1041   : > { %v3206_v51 = vsel %vm534_vm4, %v3174_v17, 0.0 }
0x1043   : > { %3183 = vadd.xlane.f32.xlu1 %v3182_v46  ;;  %3292 = vadd.xlane.f32.xlu0 %v3291_v34  ;;  %v3197_v46 = vsel %vm534_vm4, %v3171_v56, 0.0  ;;  %v3173_v34 = vmul.f32 %v6026_v0, %v6214_v26  ;;  %v3178_v0 = vmul.f32 %v6034_v9, %v6285_v13  ;;  %v3304_v9 = vrot.slane %v6038_v31, %v6932_v32 }
0x1045   : > { %v3203_v10 = vsel %vm534_vm4, %v3173_v34, 0.0 }
0x1047   : > { %3189 = vadd.xlane.f32.xlu1 %v3188_v27  ;;  %3186 = vadd.xlane.f32.xlu0 %v3185_v18  ;;  %v3175_v27 = vmul.f32 %v6013_v7, %v6237_v3  ;;  %v3212_v18 = vsel %vm534_vm4, %v3176_v40, 0.0  ;;  %v3180_v7 = vmul.f32 %v6030_v58, %v6308_v41 }
0x1049   : > { %v3209_v15 = vsel %vm534_vm4, %v3175_v27, 0.0  ;;  %v3224_v56 = vsel %vm534_vm4, %v3180_v7, 0.0 }
0x104b   : > { %3195 = vadd.xlane.f32.xlu1 %v3194_v59  ;;  %3192 = vadd.xlane.f32.xlu0 %v3191_v60  ;;  %v3218_v59 = vsel %vm534_vm4, %v3178_v0, 0.0  ;;  %v3215_v60 = vsel %vm534_vm4, %v3177_v39, 0.0 }
0x104f   : > { %3201 = vadd.xlane.f32.xlu1 %v3200_v30  ;;  %3198 = vadd.xlane.f32.xlu0 %v3197_v46  ;;  %v3221_v30 = vsel %vm534_vm4, %v3179_v54, 0.0  ;;  %v3227_v46 = vsel %vm534_vm4, %v3181_v1, 0.0 }
0x1053   : > { %3207 = vadd.xlane.f32.xlu1 %v3206_v51  ;;  %3204 = vadd.xlane.f32.xlu0 %v3203_v10 }
0x1057   : > { %3213 = vadd.xlane.f32.xlu1 %v3212_v18  ;;  %3210 = vadd.xlane.f32.xlu0 %v3209_v15 }
0x105b   : > { %3219 = vadd.xlane.f32.xlu1 %v3218_v59  ;;  %3216 = vadd.xlane.f32.xlu0 %v3215_v60  ;;  %v3308_v60 = vrot.slane %v6038_v31, %v6933_v63 }
0x105f   : > { %3225 = vadd.xlane.f32.xlu1 %v3224_v56  ;;  %3222 = vadd.xlane.f32.xlu0 %v3221_v30 }
0x1063   : > { %3228 = vadd.xlane.f32.xlu0 %v3227_v46 }
0x10b0   : > { %v3248_v17 = vpop.xlane.xlu0 %3247 }
0x10b1   : > { %v3341_v15 = vmul.f32 %v3304_v9, %v3248_v17  ;;  %v3312_v17 = vrot.slane %v6038_v31, %v6934_v52 }
0x10b3   : > { %v3357_v59 = vmax.f32 %v3341_v15, 1e-16 }
0x10b4   : > { %v3254_v34 = vpop.xlane.xlu1 %3253  ;;  %v3251_v51 = vpop.xlane.xlu0 %3250 }
0x10b5   : > { %v3342_v58 = vmul.f32 %v3304_v9, %v3251_v51  ;;  %4437 = vrsqrt.f32 %v3357_v59  ;;  %v3343_v56 = vmul.f32 %v3308_v60, %v3254_v34  ;;  %v3320_v34 = vrot.slane %v6038_v31, %v5392_v12 }
0x10b7   : > { %v3358_v30 = vmax.f32 %v3342_v58, 1e-16  ;;  %v3359_v61 = vmax.f32 %v3343_v56, 1e-16 }
0x10b8   : > { %v3260_v10 = vpop.xlane.xlu1 %3259  ;;  %v3257_v40 = vpop.xlane.xlu0 %3256 }
0x10b9   : > { %4439 = vrsqrt.f32 %v3358_v30  ;;  %v3344_v36 = vmul.f32 %v3308_v60, %v3257_v40  ;;  %v3345_v9 = vmul.f32 %v3312_v17, %v3260_v10  ;;  %v3316_v60 = vrot.slane %v6038_v31, %v6935_v2 }
0x10ba   : > { %4441 = vrsqrt.f32 %v3359_v61  ;;  %v3324_v61 = vrot.slane %v6038_v31, %v6936_v19 }
0x10bb   : > { %v3360_v49 = vmax.f32 %v3344_v36, 1e-16  ;;  %v3361_v56 = vmax.f32 %v3345_v9, 1e-16 }
0x10bc   : > { %v3266_v27 = vpop.xlane.xlu1 %3265  ;;  %v3263_v18 = vpop.xlane.xlu0 %3262 }
0x10bd   : > { %v3346_v16 = vmul.f32 %v3312_v17, %v3263_v18  ;;  %4443 = vrsqrt.f32 %v3360_v49  ;;  %v3347_v10 = vmul.f32 %v3316_v60, %v3266_v27  ;;  %v3328_v49 = vrot.slane %v6038_v31, %v5384_v42 }
0x10be   : > { %4445 = vrsqrt.f32 %v3361_v56  ;;  %v3332_v27 = vrot.slane %v6038_v31, %v5389_v45 }
0x10bf   : > { %v4438_v29 = vpop.eup %4437  ;;  %v3362_v53 = vmax.f32 %v3346_v16, 1e-16  ;;  %v3363_v17 = vmax.f32 %v3347_v10, 1e-16 }
0x10c0   : > { %v3272_v0 = vpop.xlane.xlu1 %3271  ;;  %v3269_v39 = vpop.xlane.xlu0 %3268 }
0x10c1   : > { %4447 = vrsqrt.f32 %v3362_v53 }
0x10c3   : > { %v4440_v30 = vpop.eup %4439 }
0x10c4   : > { %v6385_v7 = vpop.xlane.xlu1 %3277  ;;  %v3275_v54 = vpop.xlane.xlu0 %3274 }
0x10c5   : > { %v3350_v40 = vmul.f32 %v3320_v34, %v3275_v54 }
0x10c7   : > { %v3366_v21 = vmax.f32 %v3350_v40, 1e-16 }
0x10c8   : > { %v6387_v1 = vpop.xlane.xlu1 %3283  ;;  %v3281_v46 = vpop.xlane.xlu0 %3280 }
0x10c9   : > { %v3352_v20 = vmul.f32 %v3324_v61, %v3281_v46  ;;  %4449 = vrsqrt.f32 %v3366_v21 }
0x10ca   : > { %4451 = vrsqrt.f32 %v3363_v17 }
0x10cc   : > { %v6391_v15 = vpop.xlane.xlu1 %3289  ;;  %v3287_v51 = vpop.xlane.xlu0 %3286 }
0x10cd   : > { %v3354_v14 = vmul.f32 %v3328_v49, %v3287_v51  ;;  %v3351_v51 = vmul.f32 %v3324_v61, %v6385_v7  ;;  %v1898_v7 = vrot.slane %v6042_v62, %v6932_v32 }
0x10d0   : > { %v3184_v59 = vpop.xlane.xlu1 %3183  ;;  %v3293_v58 = vpop.xlane.xlu0 %3292 }
0x10d1   : > { %v3389_v48 = vmul.f32 %v4438_v29, %v3184_v59  ;;  %v4442_v29 = vpop.eup %4441  ;;  %v3368_v59 = vmax.f32 %v3352_v20, 1e-16  ;;  %v3356_v10 = vmul.f32 %v3332_v27, %v3293_v58  ;;  %v3353_v58 = vmul.f32 %v3328_v49, %v6387_v1  ;;  %v6960_v49 = vld [vmem:[#allocation50_spill] sm:$0xff] }
0x10d2   : > { %v4444_v16 = vpop.eup %4443 }
0x10d3   : > { %3426 = vperm.xlu0 %4316, %v3389_v48   ;;  %v3348_v48 = vmul.f32 %v3316_v60, %v3269_v39  ;;  %4453 = vrsqrt.f32 %v3368_v59  ;;  %v4446_v53 = vpop.eup %4445  ;;  %v3372_v60 = vmax.f32 %v3356_v10, 1e-16 }
0x10d4   : > { %v3187_v36 = vpop.xlane.xlu0 %3186  ;;  %v3190_v18 = vpop.xlane.xlu1 %3189 }
0x10d5   : > { %v3390_v22 = vmul.f32 %v4440_v30, %v3187_v36  ;;  %v3391_v9 = vmul.f32 %v4442_v29, %v3190_v18  ;;  %v3364_v40 = vmax.f32 %v3348_v48, 1e-16  ;;  %v3370_v36 = vmax.f32 %v3354_v14, 1e-16  ;;  %v4448_v18 = vpop.eup %4447 }
0x10d6   : > { %v4450_v29 = vpop.eup %4449  ;;  %v3367_v14 = vmax.f32 %v3351_v51, 1e-16 }
0x10d7   : > { %3429 = vperm.xlu1 %4317, %v3390_v22   ;;  %v3349_v22 = vmul.f32 %v3320_v34, %v3272_v0  ;;  %4455 = vrsqrt.f32 %v3364_v40  ;;  %v4452_v17 = vpop.eup %4451  ;;  %v1935_v40 = vmul.f32 %v1898_v7, %v6960_v49 }
0x10d8   : > { %v3193_v54 = vpop.xlane.xlu0 %3192  ;;  %v3196_v46 = vpop.xlane.xlu1 %3195  ;;  %4457 = vrsqrt.f32 %v3370_v36 }
0x10d9   : > { %v3392_v30 = vmul.f32 %v4444_v16, %v3193_v54  ;;  %v3365_v21 = vmax.f32 %v3349_v22, 1e-16  ;;  %v3393_v20 = vmul.f32 %v4446_v53, %v3196_v46  ;;  %v3369_v46 = vmax.f32 %v3353_v58, 1e-16 }
0x10db   : > { %3432 = vperm.xlu1 %4317, %v3391_v9   ;;  %4459 = vrsqrt.f32 %v3365_v21 }
0x10dc   : > { %v3199_v56 = vpop.xlane.xlu0 %3198  ;;  %v3202_v31 = vpop.xlane.xlu1 %3201  ;;  %4461 = vrsqrt.f32 %v3372_v60  ;;  %v6961_v60 = vld [vmem:[#allocation49_spill] sm:$0xff] }
0x10dd   : > { %v3394_v34 = vmul.f32 %v4448_v18, %v3199_v56  ;;  %v4454_v48 = vpop.eup %4453  ;;  %v3395_v59 = vmul.f32 %v4452_v17, %v3202_v31  ;;  %4463 = vrsqrt.f32 %v3367_v14  ;;  %v3355_v56 = vmul.f32 %v3332_v27, %v6391_v15 }
0x10de   : > { %4465 = vrsqrt.f32 %v3369_v46  ;;  %v1936_v31 = vmul.f32 %v1898_v7, %v6961_v60  ;;  %v1951_v18 = vmax.f32 %v1935_v40, 1e-16  ;;  %v1902_v15 = vrot.slane %v6042_v62, %v6933_v63  ;;  %v6963_v7 = vld [vmem:[#allocation52_spill] sm:$0xff] }
0x10df   : > { %3435 = vperm.xlu1 %4317, %v3392_v30   ;;  %v3371_v53 = vmax.f32 %v3355_v56, 1e-16 }
0x10e0   : > { %v3205_v39 = vpop.xlane.xlu0 %3204  ;;  %v3208_v61 = vpop.xlane.xlu1 %3207 }
0x10e1   : > { %v4456_v22 = vpop.eup %4455  ;;  %4467 = vrsqrt.f32 %v3371_v53 }
0x10e2   : > { %v4458_v1 = vpop.eup %4457  ;;  %v3396_v36 = vmul.f32 %v4456_v22, %v3205_v39  ;;  %4469 = vrsqrt.f32 %v1951_v18 }
0x10e3   : > { %3438 = vperm.xlu1 %4317, %v3393_v20  }
0x10e4   : > { %v3211_v0 = vpop.xlane.xlu0 %3210  ;;  %v3214_v21 = vpop.xlane.xlu1 %3213 }
0x10e5   : > { %v3398_v54 = vmul.f32 %v4450_v29, %v3211_v0  ;;  %v4460_v20 = vpop.eup %4459 }
0x10e6   : > { %v4462_v51 = vpop.eup %4461  ;;  %v3397_v29 = vmul.f32 %v4460_v20, %v3208_v61  ;;  %v1906_v61 = vrot.slane %v6042_v62, %v6934_v52 }
0x10e7   : > { %3441 = vperm.xlu1 %4317, %v3394_v34   ;;  %3453 = vperm.xlu0 %4316, %v3398_v54   ;;  %v4464_v39 = vpop.eup %4463  ;;  %v1952_v34 = vmax.f32 %v1936_v31, 1e-16  ;;  %v6962_v54 = vld [vmem:[#allocation51_spill] sm:$0xff] }
0x10e8   : > { %v3217_v9 = vpop.xlane.xlu0 %3216  ;;  %v1937_v14 = vmul.f32 %v1902_v15, %v6962_v54  ;;  %v3220_v58 = vpop.xlane.xlu1 %3219  ;;  %v3399_v17 = vmul.f32 %v4464_v39, %v3214_v21  ;;  %v1910_v21 = vrot.slane %v6042_v62, %v6935_v2  ;;  %v6966_v31 = vld [vmem:[#allocation55_spill] sm:$0xff] }
0x10e9   : > { %v3400_v16 = vmul.f32 %v4454_v48, %v3217_v9  ;;  %v4466_v48 = vpop.eup %4465  ;;  %4471 = vrsqrt.f32 %v1952_v34  ;;  %v1938_v9 = vmul.f32 %v1902_v15, %v6963_v7  ;;  %v6968_v34 = vld [vmem:[#allocation20_spill] sm:$0xff] }
0x10ea   : > { %v1941_v18 = vmul.f32 %v1910_v21, %v6966_v31  ;;  %v6976_v31 = vld [vmem:[#allocation63_spill] sm:$0xff] }
0x10eb   : > { %3444 = vperm.xlu1 %4317, %v3395_v59   ;;  %3459 = vperm.xlu0 %4316, %v3400_v16   ;;  %v1953_v59 = vmax.f32 %v1937_v14, 1e-16  ;;  %v3401_v16 = vmul.f32 %v4466_v48, %v3220_v58  ;;  %v4468_v56 = vpop.eup %4467  ;;  %v1954_v22 = vmax.f32 %v1938_v9, 1e-16  ;;  %v6969_v48 = vld [vmem:[#allocation24_spill] sm:$0xff]  ;;  %v6970_v9 = vld [vmem:[#allocation58_spill] sm:$0xff] }
0x10ec   : > { %v3223_v30 = vpop.xlane.xlu0 %3222  ;;  %v3226_v46 = vpop.xlane.xlu1 %3225  ;;  %v1957_v39 = vmax.f32 %v1941_v18, 1e-16 }
0x10ed   : > { %v3402_v10 = vmul.f32 %v4458_v1, %v3223_v30  ;;  %v6964_v1 = vld [vmem:[#allocation53_spill] sm:$0xff]  ;;  %4473 = vrsqrt.f32 %v1953_v59  ;;  %v3403_v40 = vmul.f32 %v4468_v56, %v3226_v46  ;;  %v4470_v30 = vpop.eup %4469 }
0x10ee   : > { %v1939_v49 = vmul.f32 %v1906_v61, %v6964_v1  ;;  %4475 = vrsqrt.f32 %v1954_v22  ;;  %v1983_v20 = vmul.f32 %v4470_v30, %v6032_v11  ;;  %v1914_v11 = vrot.slane %v6042_v62, %v5392_v12  ;;  %v6972_v46 = vld [vmem:[#allocation57_spill] sm:$0xff]  ;;  %v6973_v1 = vld [vmem:[#allocation19_spill] sm:$0xff] }
0x10ef   : > { %3447 = vperm.xlu1 %4317, %v3396_v36   ;;  %3465 = vperm.xlu0 %4316, %v3402_v10   ;;  %v6965_v36 = vld [vmem:[#allocation54_spill] sm:$0xff]  ;;  %v1926_v22 = vrot.slane %v6042_v62, %v5389_v45 }
0x10f0   : > { %v3229_v27 = vpop.xlane.xlu0 %3228  ;;  %v1940_v10 = vmul.f32 %v1906_v61, %v6965_v36  ;;  %v1955_v53 = vmax.f32 %v1939_v49, 1e-16  ;;  %v1944_v59 = vmul.f32 %v1914_v11, %v6970_v9  ;;  %v6971_v61 = vld [vmem:[#allocation59_spill] sm:$0xff]  ;;  %v1943_v56 = vmul.f32 %v1914_v11, %v6972_v46 }
0x10f1   : > { %v3404_v0 = vmul.f32 %v4462_v51, %v3229_v27  ;;  %v3127_v49 = vsel %vm3126_vm9, %v6973_v1, -inf  ;;  %v1949_v18 = vmul.f32 %v1926_v22, %v6976_v31 }
0x10f2   : > { %v1956_v60 = vmax.f32 %v1940_v10, 1e-16  ;;  %4477 = vrsqrt.f32 %v1955_v53  ;;  %v1960_v10 = vmax.f32 %v1944_v59, 1e-16  ;;  %v6982_v59 = vld [vmem:[#allocation70_spill] sm:$0xff] }
0x10f3   : > { %3450 = vperm.xlu1 %4317, %v3397_v29   ;;  %3471 = vperm.xlu0 %4316, %v3404_v0   ;;  %v4472_v51 = vpop.eup %4471  ;;  %v6967_v29 = vld [vmem:[#allocation56_spill] sm:$0xff] }
0x10f4   : > { %v1984_v15 = vmul.f32 %v4472_v51, %v6046_v37  ;;  %4479 = vrsqrt.f32 %v1956_v60  ;;  %v1942_v0 = vmul.f32 %v1910_v21, %v6967_v29  ;;  %v1922_v21 = vrot.slane %v6042_v62, %v5384_v42 }
0x10f5   : > { %4481 = vrsqrt.f32 %v1957_v39  ;;  %v1959_v60 = vmax.f32 %v1943_v56, 1e-16  ;;  %v6983_v56 = vld [vmem:[#allocation64_spill] sm:$0xff] }
0x10f6   : > { %v1958_v58 = vmax.f32 %v1942_v0, 1e-16  ;;  %v6978_v0 = vld [vmem:[#allocation61_spill] sm:$0xff] }
0x10f7   : > { %3456 = vperm.xlu1 %4317, %v3399_v17   ;;  %v4474_v27 = vpop.eup %4473  ;;  %v1918_v17 = vrot.slane %v6042_v62, %v6936_v19  ;;  %v1947_v39 = vmul.f32 %v1922_v21, %v6978_v0 }
0x10f8   : > { %v1985_v54 = vmul.f32 %v4474_v27, %v6968_v34  ;;  %v4476_v14 = vpop.eup %4475  ;;  %4483 = vrsqrt.f32 %v1958_v58  ;;  %v6977_v27 = vld [vmem:[#allocation60_spill] sm:$0xff]  ;;  %v1965_v34 = vmax.f32 %v1949_v18, 1e-16 }
0x10f9   : > { %v1986_v37 = vmul.f32 %v4476_v14, %v6969_v48  ;;  %4485 = vrsqrt.f32 %v1960_v10  ;;  %v1946_v29 = vmul.f32 %v1918_v17, %v6977_v27  ;;  %v1963_v62 = vmax.f32 %v1947_v39, 1e-16  ;;  %v6980_v48 = vld [vmem:[#allocation68_spill] sm:$0xff] }
0x10fa   : > { %v4734_v39 = vmov 8  }
0x10fb   : > { %3462 = vperm.xlu1 %4317, %v3401_v16   ;;  %v1945_v16 = vmul.f32 %v1918_v17, %v6971_v61  ;;  %v1962_v58 = vmax.f32 %v1946_v29, 1e-16 }
0x10fc   : > { %v4478_v7 = vpop.eup %4477 }
0x10fd   : > { %v1961_v53 = vmax.f32 %v1945_v16, 1e-16 }
0x10fe   : > { %v4480_v36 = vpop.eup %4479 }
0x10ff   : > { %3468 = vperm.xlu1 %4317, %v3403_v40   ;;  %v6974_v40 = vld [vmem:[#allocation21_spill] sm:$0xff]  ;;  %4487 = vrsqrt.f32 %v1961_v53  ;;  %v6985_v53 = vld [vmem:[#allocation23_spill] sm:$0xff] }
0x1100   : > { %v1987_v30 = vmul.f32 %v4478_v7, %v6974_v40  ;;  %4489 = vrsqrt.f32 %v1959_v60  ;;  %v6981_v7 = vld [vmem:[#allocation62_spill] sm:$0xff]  ;;  %v6986_v60 = vld [vmem:[#allocation71_spill] sm:$0xff] }
0x1101   : > { %4491 = vrsqrt.f32 %v1965_v34  ;;  %v1948_v9 = vmul.f32 %v1922_v21, %v6981_v7  ;;  %v6989_v34 = vld [vmem:[#allocation72_spill] sm:$0xff]  ;;  %v1748_v7 = vsel %vm1747_vm8, %v6973_v1, -inf }
0x1102   : > { %4493 = vrsqrt.f32 %v1962_v58  ;;  %v6991_v58 = vld [vmem:[#allocation73_spill] sm:$0xff] }
0x1103   : > { %2020 = vperm.xlu1 %4317, %v1983_v20   ;;  %v6975_v20 = vld [vmem:[#allocation66_spill] sm:$0xff]  ;;  %4495 = vrsqrt.f32 %v1963_v62  ;;  %v1964_v46 = vmax.f32 %v1948_v9, 1e-16 }
0x1104   : > { %v1988_v51 = vmul.f32 %v4480_v36, %v6975_v20 }
0x1105   : > { %4497 = vrsqrt.f32 %v1964_v46 }
0x1107   : > { %2023 = vperm.xlu1 %4317, %v1984_v15   ;;  %v4482_v15 = vpop.eup %4481 }
0x1108   : > { %v4484_v11 = vpop.eup %4483 }
0x1109   : > { %v4486_v17 = vpop.eup %4485 }
0x110a   : > { %v1992_v61 = vmul.f32 %v4486_v17, %v6982_v59  ;;  %v4488_v16 = vpop.eup %4487 }
0x110b   : > { %2026 = vperm.xlu1 %4317, %v1985_v54   ;;  %v6979_v54 = vld [vmem:[#allocation22_spill] sm:$0xff]  ;;  %v4490_v40 = vpop.eup %4489 }
0x110c   : > { %v1989_v14 = vmul.f32 %v4482_v15, %v6979_v54  ;;  %v1991_v20 = vmul.f32 %v4490_v40, %v6985_v53  ;;  %v6987_v15 = vld [vmem:[#allocation69_spill] sm:$0xff] }
0x110f   : > { %2029 = vperm.xlu1 %4317, %v1986_v37   ;;  %v1990_v37 = vmul.f32 %v4484_v11, %v6980_v48 }
0x1112   : > { %3128 = vmax.xlane.f32.xlu0 %v3127_v49  ;;  %v1950_v49 = vmul.f32 %v1926_v22, %v6983_v56  ;;  %v6988_v22 = vld [vmem:[#allocation67_spill] sm:$0xff] }
0x1113   : > { %2032 = vperm.xlu1 %4317, %v1987_v30   ;;  %v6984_v30 = vld [vmem:[#allocation65_spill] sm:$0xff] }
0x1114   : > { %v1993_v36 = vmul.f32 %v4488_v16, %v6984_v30  ;;  %v1966_v10 = vmax.f32 %v1950_v49, 1e-16  ;;  %v6992_v30 = vld [vmem:[#allocation27_spill] sm:$0xff] }
0x1116   : > { %4499 = vrsqrt.f32 %v1966_v10 }
0x1117   : > { %2035 = vperm.xlu1 %4317, %v1988_v51   ;;  %v4492_v51 = vpop.eup %4491 }
0x1118   : > { %v4494_v21 = vpop.eup %4493  ;;  %v1997_v27 = vmul.f32 %v4492_v51, %v6987_v15 }
0x1119   : > { %v1994_v31 = vmul.f32 %v4494_v21, %v6986_v60  ;;  %v4496_v18 = vpop.eup %4495  ;;  %v6993_v21 = vld [vmem:[#allocation26_spill] sm:$0xff] }
0x111a   : > { %v1995_v29 = vmul.f32 %v4496_v18, %v6988_v22  ;;  %v4498_v0 = vpop.eup %4497 }
0x111b   : > { %2038 = vperm.xlu1 %4317, %v1989_v14   ;;  %v1996_v54 = vmul.f32 %v4498_v0, %v6989_v34  ;;  %v6990_v14 = vld [vmem:[#allocation25_spill] sm:$0xff] }
0x111f   : > { %2041 = vperm.xlu1 %4317, %v1990_v37  }
0x1120   : > { %v4500_v11 = vpop.eup %4499 }
0x1121   : > { %v1998_v62 = vmul.f32 %v4500_v11, %v6991_v58 }
0x1123   : > { %2047 = vperm.xlu1 %4317, %v1992_v61  }
0x1127   : > { %2050 = vperm.xlu1 %4317, %v1993_v36  }
0x1128   : > { %2044 = vperm.xlu0 %4316, %v1991_v20  }
0x112b   : > { %2053 = vperm.xlu1 %4317, %v1994_v31  }
0x112c   : > { %2062 = vperm.xlu0 %4316, %v1997_v27  }
0x112f   : > { %2056 = vperm.xlu1 %4317, %v1995_v29  }
0x1130   : > { %4318 = vset.pattern.permute.xlu0 %v4734_v39 }
0x1131   : > { %2000 = vperm.xlu0 %4318, %v6990_v14  }
0x1133   : > { %2059 = vperm.xlu1 %4317, %v1996_v54  }
0x1137   : > { %2065 = vperm.xlu1 %4317, %v1998_v62  }
0x1152   : > { %v3427_v59 = vpop.permute.xlu0 %3426 }
0x1153   : > { %v3476_v27 = vrot.slane %v3427_v59, %v6993_v21 }
0x1156   : > { %v3430_v48 = vpop.permute.xlu1 %3429 }
0x1157   : > { %v3480_v51 = vrot.slane %v3430_v48, %v6992_v30 }
0x1159   : > { %v3481_v14 = vsel %vm1195_vm10, %v3480_v51, %v3476_v27 }
0x115a   : > { %v3433_v37 = vpop.permute.xlu1 %3432 }
0x115b   : > { %1749 = vmax.xlane.f32.xlu1 %v1748_v7  ;;  %v3485_v60 = vrot.slane %v3433_v37, %v6993_v21 }
0x115e   : > { %v3436_v9 = vpop.permute.xlu1 %3435 }
0x115f   : > { %v3489_v36 = vrot.slane %v3436_v9, %v6992_v30 }
0x1161   : > { %v3490_v22 = vsel %vm1195_vm10, %v3489_v36, %v3485_v60  ;;  %v6994_v60 = vld [vmem:[#allocation74_spill] sm:$0xff] }
0x1162   : > { %v3439_v17 = vpop.permute.xlu1 %3438  ;;  %v3545_v48 = vsel %vm1260_vm11, %v3490_v22, %v3481_v14 }
0x1163   : > { %v3494_v18 = vrot.slane %v3439_v17, %v6993_v21 }
0x1166   : > { %v3442_v61 = vpop.permute.xlu1 %3441  ;;  %v3454_v16 = vpop.permute.xlu0 %3453 }
0x1167   : > { %v3498_v10 = vrot.slane %v3442_v61, %v6992_v30  ;;  %v3516_v34 = vrot.slane %v3454_v16, %v6992_v30 }
0x1169   : > { %v3499_v39 = vsel %vm1195_vm10, %v3498_v10, %v3494_v18 }
0x116a   : > { %v3445_v46 = vpop.permute.xlu1 %3444  ;;  %v3460_v49 = vpop.permute.xlu0 %3459  ;;  %v3546_v17 = vsel %vm1262_vm12, %v3499_v39, %v3545_v48 }
0x116b   : > { %v3503_v29 = vrot.slane %v3445_v46, %v6993_v21  ;;  %v3525_v11 = vrot.slane %v3460_v49, %v6992_v30 }
0x116e   : > { %v3448_v56 = vpop.permute.xlu1 %3447  ;;  %v3466_v53 = vpop.permute.xlu0 %3465 }
0x116f   : > { %v3507_v31 = vrot.slane %v3448_v56, %v6992_v30  ;;  %v3534_v37 = vrot.slane %v3466_v53, %v6992_v30 }
0x1171   : > { %v3508_v58 = vsel %vm1195_vm10, %v3507_v31, %v3503_v29 }
0x1172   : > { %v3451_v40 = vpop.permute.xlu1 %3450  ;;  %v3472_v9 = vpop.permute.xlu0 %3471  ;;  %v3547_v61 = vsel %vm1264_vm13, %v3508_v58, %v3546_v17 }
0x1173   : > { %v3512_v15 = vrot.slane %v3451_v40, %v6993_v21  ;;  %v3543_v49 = vrot.slane %v3472_v9, %v6992_v30 }
0x1175   : > { %v3517_v7 = vsel %vm1195_vm10, %v3516_v34, %v3512_v15 }
0x1176   : > { %v3457_v20 = vpop.permute.xlu1 %3456  ;;  %v3548_v56 = vsel %vm1266_vm14, %v3517_v7, %v3547_v61 }
0x1177   : > { %v3521_v0 = vrot.slane %v3457_v20, %v6993_v21 }
0x1179   : > { %v3526_v59 = vsel %vm1195_vm10, %v3525_v11, %v3521_v0 }
0x117a   : > { %v3463_v54 = vpop.permute.xlu1 %3462  ;;  %v3549_v36 = vsel %vm1268_vm15, %v3526_v59, %v3548_v56 }
0x117b   : > { %v3530_v62 = vrot.slane %v3463_v54, %v6993_v21 }
0x117d   : > { %v3535_v16 = vsel %vm1195_vm10, %v3534_v37, %v3530_v62  ;;  %v4735_v62 = vmov 23  }
0x117e   : > { %v3469_v46 = vpop.permute.xlu1 %3468  ;;  %v3550_v53 = vsel %vm1270_vm0, %v3535_v16, %v3549_v36  ;;  %4319 = vset.pattern.permute.xlu1 %v4735_v62 }
0x117f   : > { %v3539_v40 = vrot.slane %v3469_v46, %v6993_v21 }
0x1181   : > { %v3544_v10 = vsel %vm1195_vm10, %v3543_v49, %v3539_v40 }
0x1182   : > { %v2021_v20 = vpop.permute.xlu1 %2020  ;;  %v3551_v51 = vsel %vm1272_vm1, %v3544_v10, %v3550_v53 }
0x1183   : > { %v6489_v31 = vmul.f32 %v3551_v51, %v6994_v60  ;;  %v2070_v36 = vrot.slane %v2021_v20, %v6993_v21 }
0x1185   : > { %v3554_v18 = vsel %vm1276_vm2, %v6489_v31, -inf }
0x1186   : > { %v2024_v15 = vpop.permute.xlu1 %2023  ;;  %3555 = vmax.xlane.f32.xlu0 %v3554_v18 }
0x1187   : > { %v2074_v16 = vrot.slane %v2024_v15, %v6992_v30 }
0x118a   : > { %v2027_v27 = vpop.permute.xlu1 %2026 }
0x118b   : > { %v2079_v46 = vrot.slane %v2027_v27, %v6993_v21  ;;  %v2075_v27 = vsel %vm1195_vm10, %v2074_v16, %v2070_v36 }
0x118e   : > { %v2030_v22 = vpop.permute.xlu1 %2029 }
0x118f   : > { %v2083_v7 = vrot.slane %v2030_v22, %v6992_v30 }
0x1191   : > { %v2084_v10 = vsel %vm1195_vm10, %v2083_v7, %v2079_v46 }
0x1192   : > { %v2033_v29 = vpop.permute.xlu1 %2032  ;;  %v2139_v20 = vsel %vm1260_vm11, %v2084_v10, %v2075_v27 }
0x1193   : > { %v2088_v49 = vrot.slane %v2033_v29, %v6993_v21 }
0x1196   : > { %v2036_v0 = vpop.permute.xlu1 %2035 }
0x1197   : > { %v2092_v59 = vrot.slane %v2036_v0, %v6992_v30 }
0x1199   : > { %v2093_v60 = vsel %vm1195_vm10, %v2092_v59, %v2088_v49 }
0x119a   : > { %v2039_v39 = vpop.permute.xlu1 %2038 }
0x119b   : > { %v2097_v53 = vrot.slane %v2039_v39, %v6993_v21 }
0x119e   : > { %v2042_v34 = vpop.permute.xlu1 %2041 }
0x119f   : > { %v3129_v54 = vpop.xlane.xlu0 %3128  ;;  %v2101_v56 = vrot.slane %v2042_v34, %v6992_v30 }
0x11a0   : > { %v3130_v14 = vsub.f32 %v6973_v1, %v3129_v54 }
0x11a1   : > { %v2102_v22 = vsel %vm1195_vm10, %v2101_v56, %v2097_v53 }
0x11a2   : > { %v3131_v11 = vmul.f32 1.442695, %v3130_v14  ;;  %v2048_v58 = vpop.permute.xlu1 %2047  ;;  %v2140_v14 = vsel %vm1262_vm12, %v2093_v60, %v2139_v20 }
0x11a3   : > { %v2110_v18 = vrot.slane %v2048_v58, %v6992_v30  ;;  %v2141_v58 = vsel %vm1264_vm13, %v2102_v22, %v2140_v14 }
0x11a4   : > { %4501 = vpow2.f32 %v3131_v11 }
0x11a6   : > { %v2051_v48 = vpop.permute.xlu1 %2050 }
0x11a7   : > { %v2045_v9 = vpop.permute.xlu0 %2044  ;;  %v2115_v29 = vrot.slane %v2051_v48, %v6993_v21 }
0x11a8   : > { %v2106_v40 = vrot.slane %v2045_v9, %v6993_v21 }
0x11aa   : > { %v2054_v37 = vpop.permute.xlu1 %2053  ;;  %v2111_v34 = vsel %vm1195_vm10, %v2110_v18, %v2106_v40 }
0x11ab   : > { %v2119_v51 = vrot.slane %v2054_v37, %v6992_v30  ;;  %v2063_v39 = vpop.permute.xlu0 %2062  ;;  %v2142_v48 = vsel %vm1266_vm14, %v2111_v34, %v2141_v58 }
0x11ac   : > { %v2133_v7 = vrot.slane %v2063_v39, %v6993_v21 }
0x11ad   : > { %v2120_v11 = vsel %vm1195_vm10, %v2119_v51, %v2115_v29 }
0x11ae   : > { %v6495_v17 = vpop.eup %4501  ;;  %v2057_v61 = vpop.permute.xlu1 %2056  ;;  %v2143_v59 = vsel %vm1268_vm15, %v2120_v11, %v2142_v48 }
0x11af   : > { %3134 = vrot.lane.b32.xlu1 %v6495_v17, %s4736_s27  ;;  %v2124_v54 = vrot.slane %v2057_v61, %v6993_v21  ;;  %v4737_v21 = vmov 9  }
0x11b0   : > { %v2001_v46 = vpop.permute.xlu0 %2000  ;;  %4320 = vset.pattern.permute.xlu0 %v4737_v21  ;;  %v4743_v21 = vmov 24  }
0x11b2   : > { %v2060_v15 = vpop.permute.xlu1 %2059 }
0x11b3   : > { %v2128_v0 = vrot.slane %v2060_v15, %v6992_v30 }
0x11b5   : > { %v2129_v62 = vsel %vm1195_vm10, %v2128_v0, %v2124_v54  ;;  %v4739_v0 = vmov 25  }
0x11b6   : > { %v2066_v37 = vpop.permute.xlu1 %2065  ;;  %v2144_v61 = vsel %vm1270_vm0, %v2129_v62, %v2143_v59 }
0x11b7   : > { %v2137_v9 = vrot.slane %v2066_v37, %v6992_v30 }
0x11b9   : > { %v2138_v16 = vsel %vm1195_vm10, %v2137_v9, %v2133_v7  ;;  %v509_v9 = vld [vmem:[#allocation2 + $0x8] sm:$0xff]  ;;  %vm3846_vm10 = vcmask 392192  }
0x11ba   : > { %v2145_v56 = vsel %vm1272_vm1, %v2138_v16, %v2144_v61  ;;  %v4740_v61 = vmov 26  }
0x11bb   : > { %v2147_v49 = vmul.f32 %v2145_v56, %v2001_v46 }
0x11bd   : > { %v2148_v40 = vsel %vm1276_vm2, %v2147_v49, -inf }
0x11be   : > { %2149 = vmax.xlane.f32.xlu0 %v2148_v40  ;;  %v4742_v40 = vmov 27  }
0x11e8   : > { %v1750_v36 = vpop.xlane.xlu1 %1749 }
0x11e9   : > { %v1751_v10 = vsub.f32 %v6973_v1, %v1750_v36  ;;  %v6995_v1 = vld [vmem:[#allocation28_spill] sm:$0xff] }
0x11eb   : > { %v1752_v53 = vmul.f32 1.442695, %v1751_v10 }
0x11ed   : > { %4503 = vpow2.f32 %v1752_v53 }
0x11f7   : > { %v4504_v30 = vpop.eup %4503 }
0x11f8   : > { %1755 = vrot.lane.b32.xlu0 %v4504_v30, %s4738_s20 }
0x1213   : > { %v3556_v51 = vpop.xlane.xlu0 %3555 }
0x1214   : > { %v3557_v60 = vsub.f32 %v6489_v31, %v3556_v51 }
0x1216   : > { %v3558_v18 = vmul.f32 1.442695, %v3557_v60  ;;  %v508_v60 = vld [vmem:[#allocation2] sm:$0xff] }
0x1218   : > { %4505 = vpow2.f32 %v3558_v18 }
0x1221   : > { %v3135_v15 = vpop.permute.xlu1 %3134 }
0x1222   : > { %v4506_v27 = vpop.eup %4505  ;;  %v3137_v22 = vsel %vm761_vm3, %v3135_v15, 0.0 }
0x1223   : > { %3138 = vadd.xlane.f32.xlu1 %v3137_v22  ;;  %v3560_v29 = vsel %vm1276_vm2, %v4506_v27, 0.0 }
0x1224   : > { %3561 = vadd.xlane.f32.xlu0 %v3560_v29 }
0x1234   : > { %3566 = vperm.xlu1 %4319, %v6995_v1  }
0x1238   : > { %4321 = vset.pattern.permute.xlu1 %v4739_v0 }
0x124b   : > { %v2150_v20 = vpop.xlane.xlu0 %2149 }
0x124c   : > { %v2151_v34 = vsub.f32 %v2147_v49, %v2150_v20  ;;  %v4741_v49 = vmov 11  }
0x124e   : > { %v2152_v39 = vmul.f32 1.442695, %v2151_v34 }
0x1250   : > { %4507 = vpow2.f32 %v2152_v39 }
0x125a   : > { %v4508_v14 = vpop.eup %4507 }
0x125b   : > { %v2154_v11 = vsel %vm1276_vm2, %v4508_v14, 0.0 }
0x126a   : > { %v1756_v54 = vpop.permute.xlu0 %1755 }
0x126b   : > { %v1758_v31 = vsel %vm761_vm3, %v1756_v54, 0.0 }
0x126c   : > { %1759 = vadd.xlane.f32.xlu0 %v1758_v31 }
0x1270   : > { %2155 = vadd.xlane.f32.xlu0 %v2154_v11 }
0x1286   : > { %2160 = vperm.xlu0 %4320, %v6995_v1   ;;  %v4745_v1 = vmov 10  }
0x128a   : > { %4326 = vset.pattern.permute.xlu0 %v4742_v40 }
0x12b0   : > { %v3139_v58 = vpop.xlane.xlu1 %3138 }
0x12b1   : > { %4509 = vrcp.f32 %v3139_v58  ;;  %v3562_v62 = vpop.xlane.xlu0 %3561  ;;  %v6996_v58 = vld [vmem:[#allocation29_spill] sm:$0xff] }
0x12b2   : > { %4511 = vrcp.f32 %v3562_v62  ;;  %v4746_v62 = vmov 13  }
0x12b4   : > { %v3567_v59 = vpop.permute.xlu1 %3566 }
0x12b5   : > { %v3569_v46 = vmul.f32 %v3567_v59, %v509_v9 }
0x12bb   : > { %v4510_v37 = vpop.eup %4509 }
0x12bc   : > { %v3141_v48 = vmul.f32 %v4510_v37, %v6495_v17  ;;  %v4512_v7 = vpop.eup %4511 }
0x12bd   : > { %v3564_v16 = vmul.f32 %v4512_v7, %v4506_v27  ;;  %v4744_v27 = vmov 12  }
0x12be   : > { %3590 = vperm.xlu1 %4321, %v3141_v48  }
0x12bf   : > { %v3570_v56 = vadd.f32 %v3569_v46, %v3564_v16 }
0x12c2   : > { %4322 = vset.pattern.permute.xlu1 %v4740_v61 }
0x12c3   : > { %3600 = vperm.xlu1 %4322, %v3141_v48  }
0x12c7   : > { %3572 = vrot.lane.b32.xlu1 %v3570_v56, %s4714_s21 }
0x12c8   : > { %4323 = vset.pattern.permute.xlu1 %v4741_v49 }
0x12cb   : > { %3575 = vrot.lane.b32.xlu1 %v3570_v56, %s4716_s17 }
0x12cf   : > { %3578 = vrot.lane.b32.xlu1 %v3570_v56, %s4717_s15 }
0x12f9   : > { %v1760_v17 = vpop.xlane.xlu0 %1759 }
0x12fa   : > { %4513 = vrcp.f32 %v1760_v17 }
0x12fd   : > { %v2156_v36 = vpop.xlane.xlu0 %2155 }
0x12fe   : > { %4515 = vrcp.f32 %v2156_v36 }
0x1304   : > { %v4514_v10 = vpop.eup %4513 }
0x1305   : > { %v1762_v53 = vmul.f32 %v4514_v10, %v4504_v30  ;;  %v2161_v18 = vpop.permute.xlu0 %2160 }
0x1306   : > { %v2163_v22 = vmul.f32 %v2161_v18, %v508_v60 }
0x1307   : > { %2184 = vperm.xlu1 %4323, %v1762_v53  }
0x1308   : > { %v4516_v51 = vpop.eup %4515 }
0x1309   : > { %v2158_v15 = vmul.f32 %v4516_v51, %v4508_v14 }
0x130b   : > { %4324 = vset.pattern.permute.xlu1 %v4743_v21  ;;  %v2164_v29 = vadd.f32 %v2163_v22, %v2158_v15 }
0x130c   : > { %3585 = vperm.xlu1 %4324, %v3141_v48  }
0x1310   : > { %4325 = vset.pattern.permute.xlu1 %v4744_v27 }
0x1311   : > { %2194 = vperm.xlu1 %4325, %v1762_v53  }
0x1315   : > { %2166 = vrot.lane.b32.xlu1 %v2164_v29, %s4714_s21 }
0x1316   : > { %4327 = vset.pattern.permute.xlu1 %v4745_v1 }
0x1319   : > { %2169 = vrot.lane.b32.xlu1 %v2164_v29, %s4716_s17 }
0x131d   : > { %2172 = vrot.lane.b32.xlu1 %v2164_v29, %s4717_s15  ;;  %s4747_s15 = smov 96  }
0x133d   : > { %v3591_v30 = vpop.permute.xlu1 %3590 }
0x1342   : > { %v3601_v0 = vpop.permute.xlu1 %3600 }
0x1346   : > { %v3573_v20 = vpop.permute.xlu1 %3572 }
0x134a   : > { %v3576_v34 = vpop.permute.xlu1 %3575 }
0x134b   : > { %v3581_v39 = vsel %vm1306_vm5, %v3573_v20, %v3576_v34 }
0x134e   : > { %v3579_v54 = vpop.permute.xlu1 %3578 }
0x134f   : > { %v3582_v31 = vsel %vm1308_vm7, %v3581_v39, %v3579_v54 }
0x1350   : > { %v3593_v14 = vmul.f32 %v3591_v30, %v3582_v31  ;;  %v3603_v11 = vmul.f32 %v3601_v0, %v3582_v31 }
0x1352   : > { %3595 = vrot.lane.b32.xlu0 %v3593_v14, %s4719_s0  ;;  %3605 = vrot.lane.b32.xlu1 %v3603_v11, %s6931_s22 }
0x1356   : > { %3613 = vperm.xlu0 %4326, %v6996_v58   ;;  %2179 = vperm.xlu1 %4327, %v1762_v53  }
0x135a   : > { %4328 = vset.pattern.permute.xlu1 %v4746_v62 }
0x1386   : > { %v2185_v37 = vpop.permute.xlu1 %2184 }
0x138b   : > { %v3586_v48 = vpop.permute.xlu1 %3585 }
0x138c   : > { %v3588_v40 = vmul.f32 %v3586_v48, %v3582_v31 }
0x1390   : > { %v2195_v7 = vpop.permute.xlu1 %2194 }
0x1394   : > { %v2167_v9 = vpop.permute.xlu1 %2166 }
0x1398   : > { %v2170_v59 = vpop.permute.xlu1 %2169 }
0x1399   : > { %v2175_v16 = vsel %vm1306_vm5, %v2167_v9, %v2170_v59 }
0x139c   : > { %v2173_v61 = vpop.permute.xlu1 %2172 }
0x139d   : > { %v2176_v46 = vsel %vm1308_vm7, %v2175_v16, %v2173_v61 }
0x139e   : > { %v2187_v56 = vmul.f32 %v2185_v37, %v2176_v46  ;;  %v2197_v49 = vmul.f32 %v2195_v7, %v2176_v46 }
0x13a0   : > { %2199 = vrot.lane.b32.xlu0 %v2197_v49, %s6931_s22  ;;  %2189 = vrot.lane.b32.xlu1 %v2187_v56, %s4719_s0  ;;  %s4748_s0 = smov [#allocation8]  }
0x13a1   : > { %s3976_s22 = sshll.u32 %s4748_s0, 4  ;;  %s3977_s22 = int_to_ptr.vmem [resolvable:$true] %s3976_s22 }
0x13a2   : > { %s4573_s16 = scalar_lea.vmem %s3977_s22, 128  ;;  %p4580_p13 = scmp.lt.s32.totalorder %s3977_s22, %s3977_s22 }
0x13a3   : > { %p4574_p6 = scmp.ne.s32.totalorder %s3977_s22, %s4573_s16  ;;  %p4581_p4 = scmp.lt.s32.totalorder %s4573_s16, %s4573_s16 }
0x13a4   : > { %2207 = vperm.xlu1 %4328, %v6996_v58  }
0x13a5   : > { %p4575_p10 = pnand %p4574_p6, %p7012_p9  ;;  %p4582_p7 = por %p4581_p4, %p4580_p13 }
0x13a7   : > { %p4576_p11 = pneg %p4575_p10 }
0x13a9   : > { %p4583_p8 = pnand %p4582_p7, %p4576_p11 }
0x13c4   : > { %v3596_v17 = vpop.permute.xlu0 %3595  ;;  %v3606_v10 = vpop.permute.xlu1 %3605 }
0x13c5   : > { %v3598_v36 = vadd.f32 %v3596_v17, %v3588_v40 }
0x13c7   : > { %v3608_v53 = vadd.f32 %v3606_v10, %v3598_v36 }
0x13c9   : > { %v3609_v21 = vmax.f32 %v3608_v53, 1e-30 }
0x13cb   : > { %4517 = vlog2.f32 %v3609_v21 }
0x13d5   : > { %v4518_v51 = vpop.eup %4517  ;;  %v3614_v18 = vpop.permute.xlu0 %3613 }
0x13d6   : > { %v3611_v60 = vmul.f32 0.6931472, %v4518_v51  ;;  %v2180_v1 = vpop.permute.xlu1 %2179 }
0x13d7   : > { %v2182_v30 = vmul.f32 %v2180_v1, %v2176_v46 }
0x13d8   : > { %v3616_v15 = vmul.f32 %v3614_v18, %v3611_v60 }
0x13da   : > { %v3617_v27 = vmul.f32 1.442695, %v3616_v15 }
0x13dc   : > { %4519 = vpow2.f32 %v3617_v27 }
0x13e6   : > { %v4520_v22 = vpop.eup %4519 }
0x13e7   : > { %v3619_v29 = vsel %vm1276_vm2, %v4520_v22, 0.0 }
0x13e8   : > { %3620 = vadd.xlane.f32.xlu0 %v3619_v29 }
0x1412   : > { %v2190_v0 = vpop.permute.xlu1 %2189  ;;  %v2200_v34 = vpop.permute.xlu0 %2199 }
0x1413   : > { %v2192_v20 = vadd.f32 %v2190_v0, %v2182_v30  ;;  %v6997_v30 = vld [vmem:[#allocation18_spill] sm:$0xff]  ;;  %v6998_v0 = vmov 0.0|0.0  }
0x1415   : > { %v2202_v39 = vadd.f32 %v2200_v34, %v2192_v20  ;;  %v527_v20 = vld [vmem:[%s6782_s8 + $0x20] sm:$0xff]  ;;  %v528_v34 = vld [vmem:[%s6782_s8 + $0x28] sm:$0xff] }
0x1417   : > { %v2203_v54 = vmax.f32 %v2202_v39, 1e-30  ;;  %v4183_v39 = vpack.c.bf16 %v528_v34, %v527_v20 }
0x1419   : > { %4521 = vlog2.f32 %v2203_v54 }
0x1423   : > { %v4522_v31 = vpop.eup %4521  ;;  %v2208_v11 = vpop.permute.xlu1 %2207 }
0x1424   : > { %v2205_v14 = vmul.f32 0.6931472, %v4522_v31 }
0x1426   : > { %v2210_v58 = vmul.f32 %v2208_v11, %v2205_v14 }
0x1428   : > { %v2211_v62 = vmul.f32 1.442695, %v2210_v58 }
0x142a   : > { %4523 = vpow2.f32 %v2211_v62 }
0x1434   : > { %v4524_v37 = vpop.eup %4523 }
0x1435   : > { %v2213_v48 = vsel %vm1276_vm2, %v4524_v37, 0.0 }
0x1436   : > { %2214 = vadd.xlane.f32.xlu1 %v2213_v48 }
0x1475   : > { %v3621_v7 = vpop.xlane.xlu0 %3620 }
0x1476   : > { %v3622_v9 = vadd.f32 1e-16, %v3621_v7 }
0x1478   : > { %4525 = vrcp.f32 %v3622_v9 }
0x1482   : > { %v4526_v59 = vpop.eup %4525 }
0x1483   : > { %v3624_v16 = vmul.f32 %v4526_v59, %v4520_v22 }
0x1485   : > { %3945 = vst.msk [vmem:[#allocation2 + $0x8] sm:$0xff] %vm1276_vm2, %v3624_v16  ;;  %v3628_v61 = vrot.slane %v3624_v16, %v6932_v32  ;;  %v3639_v46 = vrot.slane %v3624_v16, %v6933_v63  ;;  %v3650_v56 = vrot.slane %v3624_v16, %v6934_v52  ;;  %v3661_v49 = vrot.slane %v3624_v16, %v6935_v2 }
0x1486   : > { %v3672_v40 = vrot.slane %v3624_v16, %v5392_v12  ;;  %v3683_v17 = vrot.slane %v3624_v16, %v6936_v19  ;;  %v3694_v36 = vrot.slane %v3624_v16, %v5384_v42  ;;  %v3705_v10 = vrot.slane %v3624_v16, %v5389_v45 }
0x1487   : > { %3634 = vbcast.lane.b32.xlu1 %v3628_v61, 264  ;;  %3630 = vbcast.lane.b32.xlu0 %v3628_v61, 256 }
0x148b   : > { %3645 = vbcast.lane.b32.xlu1 %v3639_v46, 264  ;;  %3641 = vbcast.lane.b32.xlu0 %v3639_v46, 256 }
0x148f   : > { %3656 = vbcast.lane.b32.xlu1 %v3650_v56, 264  ;;  %3652 = vbcast.lane.b32.xlu0 %v3650_v56, 256 }
0x1493   : > { %3667 = vbcast.lane.b32.xlu1 %v3661_v49, 264  ;;  %3663 = vbcast.lane.b32.xlu0 %v3661_v49, 256 }
0x1497   : > { %3678 = vbcast.lane.b32.xlu1 %v3672_v40, 264  ;;  %3674 = vbcast.lane.b32.xlu0 %v3672_v40, 256 }
0x149b   : > { %3689 = vbcast.lane.b32.xlu1 %v3683_v17, 264  ;;  %3685 = vbcast.lane.b32.xlu0 %v3683_v17, 256 }
0x149f   : > { %3700 = vbcast.lane.b32.xlu1 %v3694_v36, 264  ;;  %3696 = vbcast.lane.b32.xlu0 %v3694_v36, 256 }
0x14a3   : > { %3711 = vbcast.lane.b32.xlu1 %v3705_v10, 264  ;;  %3707 = vbcast.lane.b32.xlu0 %v3705_v10, 256 }
0x14c3   : > { %v2215_v53 = vpop.xlane.xlu1 %2214 }
0x14c4   : > { %v2216_v21 = vadd.f32 1e-16, %v2215_v53 }
0x14c6   : > { %4527 = vrcp.f32 %v2216_v21 }
0x14d0   : > { %v4528_v51 = vpop.eup %4527 }
0x14d1   : > { %v2218_v60 = vmul.f32 %v4528_v51, %v4524_v37 }
0x14d3   : > { %3944 = vst.msk [vmem:[#allocation2] sm:$0xff] %vm1276_vm2, %v2218_v60  ;;  %v2222_v18 = vrot.slane %v2218_v60, %v6932_v32  ;;  %v2233_v15 = vrot.slane %v2218_v60, %v6933_v63  ;;  %v2244_v27 = vrot.slane %v2218_v60, %v6934_v52  ;;  %v2255_v22 = vrot.slane %v2218_v60, %v6935_v2  ;;  %v523_v2 = vld [vmem:[%s6782_s8] sm:$0xff] }
0x14d4   : > { %v2266_v29 = vrot.slane %v2218_v60, %v5392_v12  ;;  %v2277_v32 = vrot.slane %v2218_v60, %v6936_v19  ;;  %v2288_v63 = vrot.slane %v2218_v60, %v5384_v42  ;;  %v2299_v52 = vrot.slane %v2218_v60, %v5389_v45  ;;  %v524_v12 = vld [vmem:[%s6782_s8 + $0x8] sm:$0xff]  ;;  %v525_v19 = vld [vmem:[%s6782_s8 + $0x10] sm:$0xff]  ;;  %v526_v42 = vld [vmem:[%s6782_s8 + $0x18] sm:$0xff] }
0x14d5   : > { %2228 = vbcast.lane.b32.xlu1 %v2222_v18, 264  ;;  %2224 = vbcast.lane.b32.xlu0 %v2222_v18, 256  ;;  %v4177_v1 = vpack.c.bf16 %v524_v12, %v523_v2  ;;  %v4180_v45 = vpack.c.bf16 %v526_v42, %v525_v19 }
0x14d7   : > { %4178 = vmatpush3.bf16.msra.mxu1 %v4177_v1 }
0x14d8   : > { %4179 = vmatprep.subr.bf16.mxu1 %v6998_v0 }
0x14d9   : > { %2239 = vbcast.lane.b32.xlu1 %v2233_v15, 264  ;;  %2235 = vbcast.lane.b32.xlu0 %v2233_v15, 256 }
0x14db   : > { %4181 = vmatpush3.bf16.msra.mxu1 %v4180_v45 }
0x14dc   : > { %4182 = vmatprep.subr.bf16.mxu1 %v6998_v0 }
0x14dd   : > { %2250 = vbcast.lane.b32.xlu1 %v2244_v27, 264  ;;  %2246 = vbcast.lane.b32.xlu0 %v2244_v27, 256 }
0x14df   : > { %4184 = vmatpush3.bf16.msra.mxu1 %v4183_v39 }
0x14e1   : > { %2261 = vbcast.lane.b32.xlu1 %v2255_v22, 264  ;;  %2257 = vbcast.lane.b32.xlu0 %v2255_v22, 256 }
0x14e5   : > { %2272 = vbcast.lane.b32.xlu1 %v2266_v29, 264  ;;  %2268 = vbcast.lane.b32.xlu0 %v2266_v29, 256 }
0x14e9   : > { %2283 = vbcast.lane.b32.xlu1 %v2277_v32, 264  ;;  %2279 = vbcast.lane.b32.xlu0 %v2277_v32, 256 }
0x14ed   : > { %2294 = vbcast.lane.b32.xlu1 %v2288_v63, 264  ;;  %2290 = vbcast.lane.b32.xlu0 %v2288_v63, 256 }
0x14f1   : > { %2305 = vbcast.lane.b32.xlu1 %v2299_v52, 264  ;;  %2301 = vbcast.lane.b32.xlu0 %v2299_v52, 256 }
0x14f5   : > { %3835 = vrot.lane.b32.xlu1 %v6997_v30, %s4732_s23  ;;  %s6999_s23 = smov 8  }
0x14f9   : > { %v3635_v54 = vpop.permute.xlu1 %3634  ;;  %v3631_v31 = vpop.permute.xlu0 %3630 }
0x14fa   : > { %v3714_v37 = vmul.f32 %v3635_v54, %v6152_v44  ;;  %v3713_v48 = vmul.f32 %v3631_v31, %v6154_v55 }
0x14fc   : > { %v3730_v56 = vsel %vm534_vm4, %v3714_v37, 0.0 }
0x14fd   : > { %v3646_v14 = vpop.permute.xlu1 %3645  ;;  %v3642_v11 = vpop.permute.xlu0 %3641 }
0x14fe   : > { %v3716_v58 = vmul.f32 %v3646_v14, %v6170_v5  ;;  %v3715_v62 = vmul.f32 %v3642_v11, %v6172_v24  ;;  %v3729_v5 = vsel %vm534_vm4, %v3713_v48, 0.0 }
0x14ff   : > { %v3731_v53 = vadd.f32 %v3730_v56, %v3729_v5 }
0x1500   : > { %v3739_v59 = vsel %vm534_vm4, %v3716_v58, 0.0  ;;  %v3738_v16 = vsel %vm534_vm4, %v3715_v62, 0.0 }
0x1501   : > { %v3657_v7 = vpop.permute.xlu1 %3656  ;;  %v3653_v9 = vpop.permute.xlu0 %3652  ;;  %v3740_v49 = vadd.f32 %v3739_v59, %v3738_v16  ;;  %v3732_v29 = vrot.slane %v3731_v53, 4 }
0x1502   : > { %v3718_v61 = vmul.f32 %v3657_v7, %v6193_v57  ;;  %v3717_v46 = vmul.f32 %v3653_v9, %v6195_v28 }
0x1503   : > { %v3741_v21 = vrot.slane %v3740_v49, 4  ;;  %v3733_v45 = vadd.f32 %v3732_v29, %v3731_v53 }
0x1504   : > { %v3748_v24 = vsel %vm534_vm4, %v3718_v61, 0.0  ;;  %v3747_v44 = vsel %vm534_vm4, %v3717_v46, 0.0 }
0x1505   : > { %v3668_v55 = vpop.permute.xlu1 %3667  ;;  %v3664_v40 = vpop.permute.xlu0 %3663  ;;  %v3749_v17 = vadd.f32 %v3748_v24, %v3747_v44  ;;  %v3742_v63 = vadd.f32 %v3741_v21, %v3740_v49 }
0x1506   : > { %v3720_v36 = vmul.f32 %v3668_v55, %v6214_v26  ;;  %v3719_v10 = vmul.f32 %v3664_v40, %v6216_v23 }
0x1507   : > { %v3750_v15 = vrot.slane %v3749_v17, 4  ;;  %v3743_v20 = vrot.slane %v3742_v63, 2 }
0x1508   : > { %v3757_v57 = vsel %vm534_vm4, %v3720_v36, 0.0  ;;  %v3756_v28 = vsel %vm534_vm4, %v3719_v10, 0.0 }
0x1509   : > { %v3758_v51 = vadd.f32 %v3757_v57, %v3756_v28  ;;  %v3679_v60 = vpop.permute.xlu1 %3678  ;;  %v3675_v18 = vpop.permute.xlu0 %3674  ;;  %v3751_v19 = vadd.f32 %v3750_v15, %v3749_v17  ;;  %v3744_v9 = vadd.f32 %v3743_v20, %v3742_v63 }
0x150a   : > { %v3722_v27 = vmul.f32 %v3679_v60, %v6237_v3  ;;  %v3721_v22 = vmul.f32 %v3675_v18, %v6240_v33 }
0x150b   : > { %v3759_v32 = vrot.slane %v3758_v51, 4  ;;  %v3752_v14 = vrot.slane %v3751_v19, 2  ;;  %v3745_v36 = vrot.slane %v3744_v9, 1 }
0x150c   : > { %v3766_v26 = vsel %vm534_vm4, %v3722_v27, 0.0  ;;  %v3765_v23 = vsel %vm534_vm4, %v3721_v22, 0.0 }
0x150d   : > { %v3767_v52 = vadd.f32 %v3766_v26, %v3765_v23  ;;  %v3690_v2 = vpop.permute.xlu1 %3689  ;;  %v3686_v12 = vpop.permute.xlu0 %3685  ;;  %v3760_v30 = vadd.f32 %v3759_v32, %v3758_v51  ;;  %v3753_v56 = vadd.f32 %v3752_v14, %v3751_v19 }
0x150e   : > { %v3724_v1 = vmul.f32 %v3690_v2, %v6260_v8  ;;  %v3723_v42 = vmul.f32 %v3686_v12, %v6263_v35  ;;  %v3734_v8 = vrot.slane %v3733_v45, 2 }
0x150f   : > { %v3768_v3 = vrot.slane %v3767_v52, 4  ;;  %v3761_v62 = vrot.slane %v3760_v30, 2  ;;  %v3754_v28 = vrot.slane %v3753_v56, 1 }
0x1510   : > { %v3775_v33 = vsel %vm534_vm4, %v3724_v1, 0.0  ;;  %v3774_v0 = vsel %vm534_vm4, %v3723_v42, 0.0  ;;  %v3735_v24 = vadd.f32 %v3734_v8, %v3733_v45 }
0x1511   : > { %v3769_v34 = vadd.f32 %v3768_v3, %v3767_v52  ;;  %v3776_v39 = vadd.f32 %v3775_v33, %v3774_v0  ;;  %v3701_v54 = vpop.permute.xlu1 %3700  ;;  %v3697_v31 = vpop.permute.xlu0 %3696  ;;  %v3755_v29 = vadd.f32 %v3754_v28, %v3753_v56  ;;  %v7006_v28 = vld [vmem:[#allocation43_spill] sm:$0xff] }
0x1512   : > { %v3726_v11 = vmul.f32 %v3701_v54, %v6288_v43  ;;  %v3725_v58 = vmul.f32 %v3697_v31, %v6285_v13  ;;  %v3762_v13 = vadd.f32 %v3761_v62, %v3760_v30  ;;  %v3736_v21 = vrot.slane %v3735_v24, 1 }
0x1513   : > { %v3777_v35 = vrot.slane %v3776_v39, 4  ;;  %v3770_v37 = vrot.slane %v3769_v34, 2 }
0x1514   : > { %v3784_v48 = vsel %vm534_vm4, %v3726_v11, 0.0  ;;  %v3783_v7 = vsel %vm534_vm4, %v3725_v58, 0.0  ;;  %v3763_v51 = vrot.slane %v3762_v13, 1  ;;  %v3737_v32 = vadd.f32 %v3736_v21, %v3735_v24  ;;  %v7001_v24 = vld [vmem:[#allocation38_spill] sm:$0xff] }
0x1515   : > { %v3778_v59 = vadd.f32 %v3777_v35, %v3776_v39  ;;  %v3785_v16 = vadd.f32 %v3784_v48, %v3783_v7  ;;  %v3712_v61 = vpop.permute.xlu1 %3711  ;;  %v3708_v46 = vpop.permute.xlu0 %3707  ;;  %v3771_v55 = vadd.f32 %v3770_v37, %v3769_v34  ;;  %v7000_v39 = vld [vmem:[#allocation17_spill] sm:$0xff] }
0x1516   : > { %v3728_v5 = vmul.f32 %v3712_v61, %v6311_v50  ;;  %v3727_v43 = vmul.f32 %v3708_v46, %v6308_v41  ;;  %v3746_v41 = vadd.f32 %v3745_v36, %v3744_v9  ;;  %v3764_v26 = vadd.f32 %v3763_v51, %v3762_v13  ;;  %v7007_v51 = vld [vmem:[#allocation44_spill] sm:$0xff] }
0x1517   : > { %v3779_v44 = vrot.slane %v3778_v59, 2  ;;  %v3786_v49 = vrot.slane %v3785_v16, 4  ;;  %v3772_v18 = vrot.slane %v3771_v55, 1 }
0x1518   : > { %v3793_v40 = vsel %vm534_vm4, %v3728_v5, 0.0  ;;  %v3792_v17 = vsel %vm534_vm4, %v3727_v43, 0.0  ;;  %v3825_v2 = vsel %vm1260_vm11, %v3746_v41, %v3737_v32  ;;  %v7008_v41 = vld [vmem:[#allocation46_spill] sm:$0xff] }
0x1519   : > { %v3780_v10 = vadd.f32 %v3779_v44, %v3778_v59  ;;  %v3787_v53 = vadd.f32 %v3786_v49, %v3785_v16  ;;  %v3794_v57 = vadd.f32 %v3793_v40, %v3792_v17  ;;  %v3773_v52 = vadd.f32 %v3772_v18, %v3771_v55  ;;  %v7002_v44 = vld [vmem:[#allocation39_spill] sm:$0xff]  ;;  %v7003_v55 = vld [vmem:[#allocation40_spill] sm:$0xff] }
0x151a   : > { %v3826_v1 = vsel %vm1262_vm12, %v3755_v29, %v3825_v2 }
0x151b   : > { %v3788_v60 = vrot.slane %v3787_v53, 2  ;;  %v3795_v50 = vrot.slane %v3794_v57, 4  ;;  %v3781_v15 = vrot.slane %v3780_v10, 1  ;;  %v3827_v30 = vsel %vm1264_vm13, %v3764_v26, %v3826_v1  ;;  %v7010_v26 = vld [vmem:[#allocation48_spill] sm:$0xff] }
0x151c   : > { %v3828_v3 = vsel %vm1266_vm14, %v3773_v52, %v3827_v30 }
0x151d   : > { %v3789_v27 = vadd.f32 %v3788_v60, %v3787_v53  ;;  %v3796_v22 = vadd.f32 %v3795_v50, %v3794_v57  ;;  %v3782_v12 = vadd.f32 %v3781_v15, %v3780_v10  ;;  %v7004_v10 = vld [vmem:[#allocation41_spill] sm:$0xff]  ;;  %v7005_v53 = vld [vmem:[#allocation42_spill] sm:$0xff] }
0x151f   : > { %v3790_v23 = vrot.slane %v3789_v27, 1  ;;  %v3797_v63 = vrot.slane %v3796_v22, 2  ;;  %v3829_v0 = vsel %vm1268_vm15, %v3782_v12, %v3828_v3 }
0x1521   : > { %v3798_v19 = vadd.f32 %v3797_v63, %v3796_v22  ;;  %v3791_v42 = vadd.f32 %v3790_v23, %v3789_v27  ;;  %v7009_v27 = vld [vmem:[#allocation45_spill] sm:$0xff]  ;;  %v7011_v63 = vld [vmem:[#allocation47_spill] sm:$0xff] }
0x1523   : > { %v3799_v45 = vrot.slane %v3798_v19, 1  ;;  %v3830_v20 = vsel %vm1270_vm0, %v3791_v42, %v3829_v0 }
0x1525   : > { %v3800_v33 = vadd.f32 %v3799_v45, %v3798_v19 }
0x1527   : > { %v3831_v34 = vsel %vm1272_vm1, %v3800_v33, %v3830_v20 }
0x1528   : > { %3832 = vrot.lane.b32.xlu0 %v3831_v34, %s6999_s23 }
0x152c   : > { %3924 = vrot.lane.b32.xlu0 %v7000_v39, %s4747_s15 }
0x1547   : > { %v2229_v54 = vpop.permute.xlu1 %2228  ;;  %v2225_v31 = vpop.permute.xlu0 %2224 }
0x1548   : > { %v2308_v61 = vmul.f32 %v2229_v54, %v5648_v38  ;;  %v2307_v46 = vmul.f32 %v2225_v31, %v5650_v4 }
0x154a   : > { %v2324_v17 = vsel %vm534_vm4, %v2308_v61, 0.0  ;;  %v2323_v36 = vsel %vm534_vm4, %v2307_v46, 0.0 }
0x154b   : > { %v2240_v14 = vpop.permute.xlu1 %2239  ;;  %v2236_v11 = vpop.permute.xlu0 %2235  ;;  %v2325_v30 = vadd.f32 %v2324_v17, %v2323_v36 }
0x154c   : > { %v2310_v56 = vmul.f32 %v2240_v14, %v5662_v47  ;;  %v2309_v5 = vmul.f32 %v2236_v11, %v5664_v6 }
0x154e   : > { %v2333_v6 = vsel %vm534_vm4, %v2310_v56, 0.0 }
0x154f   : > { %v2251_v58 = vpop.permute.xlu1 %2250  ;;  %v2247_v8 = vpop.permute.xlu0 %2246 }
0x1550   : > { %v2312_v43 = vmul.f32 %v2251_v58, %v5678_v25  ;;  %v2311_v13 = vmul.f32 %v2247_v8, %v7001_v24  ;;  %v2332_v25 = vsel %vm534_vm4, %v2309_v5, 0.0  ;;  %v2326_v58 = vrot.slane %v2325_v30, 4 }
0x1551   : > { %v2334_v2 = vadd.f32 %v2333_v6, %v2332_v25 }
0x1552   : > { %v2342_v50 = vsel %vm534_vm4, %v2312_v43, 0.0  ;;  %v2341_v18 = vsel %vm534_vm4, %v2311_v13, 0.0 }
0x1553   : > { %v2262_v62 = vpop.permute.xlu1 %2261  ;;  %v2258_v35 = vpop.permute.xlu0 %2257  ;;  %v2343_v1 = vadd.f32 %v2342_v50, %v2341_v18  ;;  %v2335_v54 = vrot.slane %v2334_v2, 4 }
0x1554   : > { %v2314_v49 = vmul.f32 %v2262_v62, %v7002_v44  ;;  %v2313_v40 = vmul.f32 %v2258_v35, %v7003_v55 }
0x1555   : > { %v2344_v14 = vrot.slane %v2343_v1, 4 }
0x1556   : > { %v2351_v29 = vsel %vm534_vm4, %v2314_v49, 0.0  ;;  %v2350_v32 = vsel %vm534_vm4, %v2313_v40, 0.0 }
0x1557   : > { %v2273_v37 = vpop.permute.xlu1 %2272  ;;  %v2269_v48 = vpop.permute.xlu0 %2268  ;;  %v2352_v3 = vadd.f32 %v2351_v29, %v2350_v32 }
0x1558   : > { %v2316_v38 = vmul.f32 %v2273_v37, %v7004_v10  ;;  %v2315_v4 = vmul.f32 %v2269_v48, %v7005_v53  ;;  %v2336_v37 = vadd.f32 %v2335_v54, %v2334_v2 }
0x1559   : > { %v2353_v8 = vrot.slane %v2352_v3, 4 }
0x155a   : > { %v2360_v12 = vsel %vm534_vm4, %v2316_v38, 0.0  ;;  %v2359_v19 = vsel %vm534_vm4, %v2315_v4, 0.0  ;;  %v2337_v56 = vrot.slane %v2336_v37, 2 }
0x155b   : > { %v2284_v7 = vpop.permute.xlu1 %2283  ;;  %v2280_v9 = vpop.permute.xlu0 %2279  ;;  %v2361_v20 = vadd.f32 %v2360_v12, %v2359_v19 }
0x155c   : > { %v2318_v21 = vmul.f32 %v2284_v7, %v7006_v28  ;;  %v2317_v60 = vmul.f32 %v2280_v9, %v7007_v51  ;;  %v2345_v7 = vadd.f32 %v2344_v14, %v2343_v1  ;;  %v2338_v40 = vadd.f32 %v2337_v56, %v2336_v37 }
0x155d   : > { %v2362_v35 = vrot.slane %v2361_v20, 4 }
0x155e   : > { %v2369_v42 = vsel %vm534_vm4, %v2318_v21, 0.0  ;;  %v2368_v45 = vsel %vm534_vm4, %v2317_v60, 0.0  ;;  %v2346_v43 = vrot.slane %v2345_v7, 2 }
0x155f   : > { %v2295_v59 = vpop.permute.xlu1 %2294  ;;  %v2291_v16 = vpop.permute.xlu0 %2290  ;;  %v2370_v31 = vadd.f32 %v2369_v42, %v2368_v45  ;;  %v2363_v46 = vadd.f32 %v2362_v35, %v2361_v20 }
0x1560   : > { %v2320_v15 = vmul.f32 %v2295_v59, %v7008_v41  ;;  %v2319_v22 = vmul.f32 %v2291_v16, %v7009_v27  ;;  %v2327_v59 = vadd.f32 %v2326_v58, %v2325_v30  ;;  %v2354_v16 = vadd.f32 %v2353_v8, %v2352_v3 }
0x1561   : > { %v2371_v48 = vrot.slane %v2370_v31, 4  ;;  %v2364_v55 = vrot.slane %v2363_v46, 2  ;;  %v2347_v36 = vadd.f32 %v2346_v43, %v2345_v7 }
0x1562   : > { %v2378_v33 = vsel %vm534_vm4, %v2320_v15, 0.0  ;;  %v2377_v0 = vsel %vm534_vm4, %v2319_v22, 0.0  ;;  %v2328_v13 = vrot.slane %v2327_v59, 2  ;;  %v2355_v44 = vrot.slane %v2354_v16, 2 }
0x1563   : > { %v2306_v57 = vpop.permute.xlu1 %2305  ;;  %v2302_v47 = vpop.permute.xlu0 %2301  ;;  %v2379_v11 = vadd.f32 %v2378_v33, %v2377_v0  ;;  %v2372_v5 = vadd.f32 %v2371_v48, %v2370_v31  ;;  %v2348_v25 = vrot.slane %v2347_v36, 1 }
0x1564   : > { %v2322_v23 = vmul.f32 %v2306_v57, %v7010_v26  ;;  %v2321_v52 = vmul.f32 %v2302_v47, %v7011_v63  ;;  %v2329_v38 = vadd.f32 %v2328_v13, %v2327_v59  ;;  %v2356_v53 = vadd.f32 %v2355_v44, %v2354_v16 }
0x1565   : > { %v2380_v9 = vrot.slane %v2379_v11, 4  ;;  %v2373_v17 = vrot.slane %v2372_v5, 2  ;;  %v2365_v57 = vadd.f32 %v2364_v55, %v2363_v46  ;;  %v2339_v47 = vrot.slane %v2338_v40, 1 }
0x1566   : > { %v2387_v34 = vsel %vm534_vm4, %v2322_v23, 0.0  ;;  %v2386_v39 = vsel %vm534_vm4, %v2321_v52, 0.0  ;;  %v2330_v21 = vrot.slane %v2329_v38, 1  ;;  %v2357_v51 = vrot.slane %v2356_v53, 1 }
0x1567   : > { %v2388_v62 = vadd.f32 %v2387_v34, %v2386_v39  ;;  %v2381_v24 = vadd.f32 %v2380_v9, %v2379_v11  ;;  %v2374_v6 = vadd.f32 %v2373_v17, %v2372_v5  ;;  %v2366_v50 = vrot.slane %v2365_v57, 1  ;;  %v3836_v33 = vpop.permute.xlu1 %3835 }
0x1568   : > { %v2340_v18 = vadd.f32 %v2339_v47, %v2338_v40  ;;  %v2349_v15 = vadd.f32 %v2348_v25, %v2347_v36  ;;  %v2331_v22 = vadd.f32 %v2330_v21, %v2329_v38  ;;  %v2358_v29 = vadd.f32 %v2357_v51, %v2356_v53 }
0x1569   : > { %v2389_v61 = vrot.slane %v2388_v62, 4  ;;  %v2382_v10 = vrot.slane %v2381_v24, 2  ;;  %v2375_v41 = vrot.slane %v2374_v6, 1  ;;  %v2367_v26 = vadd.f32 %v2366_v50, %v2365_v57 }
0x156a   : > { %v3809_v23 = vsel %vm1260_vm11, %v2340_v18, %v2331_v22 }
0x156b   : > { %v2390_v49 = vadd.f32 %v2389_v61, %v2388_v62  ;;  %v2383_v28 = vadd.f32 %v2382_v10, %v2381_v24  ;;  %v2376_v63 = vadd.f32 %v2375_v41, %v2374_v6  ;;  %v3810_v52 = vsel %vm1262_vm12, %v2349_v15, %v3809_v23 }
0x156c   : > { %v3811_v19 = vsel %vm1264_vm13, %v2358_v29, %v3810_v52 }
0x156d   : > { %v2391_v4 = vrot.slane %v2390_v49, 2  ;;  %v2384_v27 = vrot.slane %v2383_v28, 1  ;;  %v3812_v1 = vsel %vm1266_vm14, %v2367_v26, %v3811_v19 }
0x156e   : > { %v3813_v42 = vsel %vm1268_vm15, %v2376_v63, %v3812_v1 }
0x156f   : > { %v2392_v60 = vadd.f32 %v2391_v4, %v2390_v49  ;;  %v2385_v2 = vadd.f32 %v2384_v27, %v2383_v28 }
0x1571   : > { %v2393_v32 = vrot.slane %v2392_v60, 1  ;;  %v3814_v45 = vsel %vm1270_vm0, %v2385_v2, %v3813_v42 }
0x1573   : > { %v2394_v12 = vadd.f32 %v2393_v32, %v2392_v60 }
0x1575   : > { %v3815_v30 = vsel %vm1272_vm1, %v2394_v12, %v3814_v45 }
0x159a   : > { %v3833_v3 = vpop.permute.xlu0 %3832 }
0x159b   : > { %v3838_v0 = vsel %vm534_vm4, %v3815_v30, %v3833_v3 }
0x159c   : > { %v3839_v20 = vsel %vm1276_vm2, %v3838_v0, %v3836_v33 }
0x159d   : > { %4162 = vmatmul.mubr.msk.f32.vlgmr.msra.gmra.mrb[0].mxu1 %vm3846_vm10, %v3839_v20 }
0x159e   : > { %v3925_v34 = vpop.permute.xlu0 %3924 }
0x159f   : > { %3927 = vst.msk [vmem:[#allocation10] sm:$0xff] %vm653_vm6, %v3925_v34 }
0x15a0   : > { %4586 = shalt.err (!%p4583_p8)
}
0x15a1   : > { %s4587_s27 = scalar_lea.hbm %s6786_s12, 128  ;;  %p7013_p0 = pmov %p7012_p9 }
0x15a2   : > { %p4588_p12 = scmp.ne.s32.totalorder %s6786_s12, %s4587_s27  ;;  %p4593_p2 = scmp.lt.u32.totalorder %s4587_s27, %s6786_s12 }
0x15a4   : > { %p4589_p3 = pnand %p4588_p12, %p7013_p0 }
0x15a6   : > { %p4590_p1 = pneg %p4589_p3 }
0x15a8   : > { %p4595_p5 = pnand %p4593_p2, %p4590_p1 }
0x15aa   : > { %4598 = shalt.err (!%p4595_p5)
}
0x15ab   : > { %p7014_p6 = pmov %p7013_p0  ;;  %s4749_s16 = smov [#allocation10]  }
0x15ac   : > { %s3987_s24 = sshll.u32 %s4749_s16, 4  ;;  %p7015_p10 = pmov %p7013_p0  ;;  %s3988_s24 = int_to_ptr.vmem [resolvable:$true] %s3987_s24 }
0x15ad   : > { %4191 = dma.vmem_to_hbm [thread:$0]  (%p7014_p6), %s3977_s22, 128, %s6786_s12, [#allocation9]  }
0x15ae   : > { %s4599_s30 = scalar_lea.vmem %s3988_s24, 128  ;;  %p4606_p4 = scmp.lt.s32.totalorder %s3988_s24, %s3988_s24 }
0x15af   : > { %p4600_p9 = scmp.ne.s32.totalorder %s3988_s24, %s4599_s30  ;;  %p4607_p7 = scmp.lt.s32.totalorder %s4599_s30, %s4599_s30 }
0x15b1   : > { %p4601_p11 = pnand %p4600_p9, %p7015_p10  ;;  %p4608_p8 = por %p4607_p7, %p4606_p4 }
0x15b3   : > { %p4602_p13 = pneg %p4601_p11 }
0x15b5   : > { %p4609_p12 = pnand %p4608_p8, %p4602_p13 }
0x15b7   : > { %4612 = shalt.err (!%p4609_p12)
}
0x15b8   : > { %s4613_s21 = scalar_lea.hbm %s6787_s13, 128  ;;  %p7016_p3 = pmov %p7014_p6 }
0x15b9   : > { %p4614_p0 = scmp.ne.s32.totalorder %s6787_s13, %s4613_s21  ;;  %p4619_p5 = scmp.lt.u32.totalorder %s4613_s21, %s6787_s13 }
0x15bb   : > { %p4615_p1 = pnand %p4614_p0, %p7016_p3 }
0x15bd   : > { %p4616_p2 = pneg %p4615_p1 }
0x15bf   : > { %p4621_p6 = pnand %p4619_p5, %p4616_p2 }
0x15c1   : > { %4624 = shalt.err (!%p4621_p6)
}
0x15c2   : > { %p7017_p9 = pmov %p7016_p3  ;;  %v4097_v39 = vld [vmem:[%s6783_s9] ss:$0 sm:$0xff]  ;;  %s4100_s20 = sshll.u32 %s4842_s29, 7 }
0x15c3   : > { %s7018_s17 = scalar_lea.vmem [#allocation7], %s4911_s14  ;;  %s6724_s15 = scalar_lea.hbm %s6784_s10, %s4100_s20 }
0x15c4   : > { %4193 = dma.vmem_to_hbm [thread:$0]  (%p7017_p9), %s3988_s24, 128, %s6787_s13, [#allocation9]  }
0x15c5   : > { %s3962_s21 = sshll.u32 %s7018_s17, 4  ;;  %s7019_s0 = smov %s7018_s17  ;;  %s6726_s21 = int_to_ptr.vmem [resolvable:$true] %s3962_s21 }
0x15c6   : > { %s7020_s24 = sand.u32 1, %s4687_s26   ;;  %s4625_s30 = scalar_lea.vmem %s6726_s21, 128 }
0x15c7   : > { %s3949_s16 = scalar_lea.sflag [#allocation6], %s7020_s24  ;;  %p4626_p10 = scmp.ne.s32.totalorder %s6726_s21, %s4625_s30 }
0x15c8   : > { %p7021_p11 = scmp.ne.s32.totalorder %s6873_s18, 0  ;;  %s4750_s27 = smov [#allocation7]  }
0x15c9   : > { %s4629_s17 = sshll.u32 %s4750_s27, 4  ;;  %s4630_s17 = int_to_ptr.vmem [resolvable:$false] %s4629_s17 }
0x15ca   : > { %p4627_p13 = pnand %p4626_p10, %p7021_p11  ;;  %s4631_s22 = scalar_lea.vmem %s4630_s17, 256 }
0x15cb   : > { %p4632_p7 = scmp.lt.s32.totalorder %s6726_s21, %s4630_s17  ;;  %p4633_p8 = scmp.lt.s32.totalorder %s4631_s22, %s4625_s30 }
0x15cc   : > { %p4628_p4 = pneg %p4627_p13 }
0x15cd   : > { %p4634_p12 = por %p4633_p8, %p4632_p7 }
0x15cf   : > { %p4635_p0 = pnand %p4634_p12, %p4628_p4 }
0x1670   : > { %v3916_v54 = vpop.f32.mrb[0].mxu1 }
0x1671   : > { %v3917_v31 = vadd.f32 %v4097_v39, %v3916_v54  ;;  %v4163_v14 = vpop.f32.mrb[1].mxu1 }
0x1673   : > { %3920 = vst [vmem:[%s7019_s0] sm:$0xff] %v3917_v31 }
0x1674   : > { %4638 = shalt.err (!%p4635_p0)
}
0x1675   : > { %s4639_s14 = scalar_lea.hbm %s6724_s15, 128  ;;  %s4643_s0 = scalar_lea.hbm %s6784_s10, 1024 }
0x1676   : > { %p4640_p3 = scmp.ne.s32.totalorder %s6724_s15, %s4639_s14  ;;  %p4644_p5 = scmp.lt.u32.totalorder %s6724_s15, %s6784_s10 }
0x1677   : > { %p4645_p6 = scmp.lt.u32.totalorder %s4643_s0, %s4639_s14  ;;  %p4647_p10 = scmp.lt.u32.totalorder %s4639_s14, %s6724_s15 }
0x1678   : > { %p4641_p1 = pnand %p4640_p3, %p7021_p11 }
0x1679   : > { %p4646_p9 = por %p4645_p6, %p4644_p5 }
0x167a   : > { %p4642_p2 = pneg %p4641_p1 }
0x167b   : > { %p4648_p13 = por %p4647_p10, %p4646_p9 }
0x167d   : > { %p4649_p4 = pnand %p4648_p13, %p4642_p2 }
0x167f   : > { %4652 = shalt.err (!%p4649_p4)
}
0x1680   : > { %4189 = dma.vmem_to_hbm [thread:$0]  (%p7021_p11), %s6726_s21, 128, %s6724_s15, %s3949_s16  }
0x1681   : > { %p7022_p7 = scmp.eq.s32.totalorder %s4842_s29, 7 }
0x1683   : > { %4674 = dma.done.wait (%p7022_p7), [#allocation9], 256   ;;  %p7023_p8 = pmov %p7022_p7 }
0x1685   : > { %4676 = vsyncadd (%p7023_p8), [#allocation9], 4294967040 }
0x1686 PF: > { %p4213_p12 = scmp.ge.s32.totalorder %s4695_s28, 2  ;;  %s4010_s30 = sand.u32 1, %s4683_s25  }
0x1687   : > { %p7024_p0 = scmp.ne.s32.totalorder %s6874_s19, 0  ;;  %s4011_s17 = scalar_lea.sflag [#allocation6], %s4010_s30 }
0x1689   : > { %p4204_p3 = pnand %p4213_p12, %p7024_p0 }
0x168b   : > { %4678 = dma.done.wait (!%p4204_p3), %s4011_s17, 128  }
0x168c   : > { %4680 = vsyncadd (!%p4204_p3), %s4011_s17, 4294967168  ;;  %s7025_s28 = sld [smem:[#allocation15_spill]]  ;;  %s7026_s18 = sld [smem:[#allocation14_spill]] }
0x168d   : > { %s7027_s27 = sld [smem:[#allocation16_spill]]  ;;  %s7028_s25 = smov %s4687_s26 }
0x1692   : > { %p26_p11 = scmp.ge.s32.totalorder %s7025_s28, 10   ;;  %s7029_s26 = smov %s7026_s18 }
0x1694   :  { %28 = sbr.rel (!%p26_p11) target bundleno = 7 (0x7), region = 128 }
0x169b   :  { %4016 = vsyncpa [#allocation5], 1 }
0x169c   :  { %4018 = vsyncpa [#allocation5 + $0x1], 1 }
0x169d   :  { %4019 = vsyncpa [#allocation6], 1 }
0x169e   :  { %4021 = vsyncpa [#allocation6 + $0x1], 1 }
0x169f   :  { %4022 = vsyncpa [#allocation9], 1 }

</bundles_post_ra>
